<compile_context>
chip_gen: v6e
topology: v6e:2x2x1
jax: 0.10.0
libtpu: 0.0.40
codegen_flags: <defaults>
</compile_context>

<pallas_src>
import functools

import jax
import jax.numpy as jnp
from jax.experimental import pallas as pl
from jax.experimental.pallas import tpu as pltpu


def _round_up(v, m):
    return ((v + m - 1) // m) * m


# -----------------------------------------------------------------------------
# Pallas kernel: DRBs forward for a group of B batch elements.
# -----------------------------------------------------------------------------
def drbs_kernel(x_ref, w_in_ref, b_in_ref, w_dil_ref, b_dil_ref,
                w_1x1_ref, b_1x1_ref, w_out_ref, b_out_ref, out_ref,
                *, l_valid):
    B, Cp, Lp = x_ref.shape           # Lp is a multiple of 128, Cp of 8
    S = w_in_ref.shape[0]
    Ln = w_dil_ref.shape[1]
    f32 = jnp.float32

    # Boundary masks depend only on the dilation; build once, reuse across all
    # stages and batch elements (JAX does not reliably CSE these compares).
    lane = jax.lax.broadcasted_iota(jnp.int32, (Cp, Lp), 1)
    left_mask = [lane >= (2 ** li) for li in range(Ln)]
    right_mask = [lane < (l_valid - 2 ** li) for li in range(Ln)]

    for b in range(B):
        cur = x_ref[b]                                           # (Cp, Lp)
        for s in range(S):
            # Stage-input 1x1 conv:  (Cp, Cp) @ (Cp, Lp) + bias column.
            h = jnp.dot(w_in_ref[s], cur, preferred_element_type=f32) \
                + b_in_ref[s]

            for li in range(Ln):
                d = 2 ** li
                # Dilated conv (kernel=3, padding=d, dilation=d) -> same len.
                # Tap k=0 reads h[:, t-d], k=1 reads h[:, t], k=2 h[:, t+d].
                # Shifts via XLU rolls; wrapped / out-of-sequence columns are
                # zeroed BEFORE the matmuls (matches the conv's zero padding
                # and keeps L-padding from leaking into valid outputs).
                left = jnp.where(left_mask[li],
                                 pltpu.roll(h, d, axis=1), 0.0)        # t-d
                right = jnp.where(right_mask[li],
                                  pltpu.roll(h, Lp - d, axis=1), 0.0)  # t+d
                # Three accumulating MXU pushes; no sublane concat.
                acc = jnp.dot(w_dil_ref[s, li, 1], h,
                              preferred_element_type=f32)
                acc = acc + jnp.dot(w_dil_ref[s, li, 0], left,
                                    preferred_element_type=f32)
                acc = acc + jnp.dot(w_dil_ref[s, li, 2], right,
                                    preferred_element_type=f32)
                acc = acc + b_dil_ref[s, li]
                acc = jnp.maximum(acc, 0.0)                            # ReLU
                # 1x1 conv
                acc = jnp.dot(w_1x1_ref[s, li], acc,
                              preferred_element_type=f32) + b_1x1_ref[s, li]
                h = h + acc                                            # residual

            # Stage-output 1x1 conv, streamed straight into its output slot.
            stage_out = jnp.dot(w_out_ref[s], h, preferred_element_type=f32) \
                        + b_out_ref[s]
            out_ref[s, b] = stage_out.astype(out_ref.dtype)
            cur = stage_out                                            # chain


# -----------------------------------------------------------------------------
# Wrapper
# -----------------------------------------------------------------------------
def _batch_groups(n):
    """One program per batch element only on multi-TensorCore chips (v7x);
    single-TC chips (v5e/v6e) take the whole batch in one program so a grid
    step doesn't cost ~0.35us of pure overhead + weight reload."""
    try:
        kind = jax.devices()[0].device_kind.lower()
    except Exception:  # pragma: no cover - conservative fallback
        kind = ""
    return n if ("v7" in kind and n > 1) else 1


def drbs_pallas(x, params):
    N, Cin, L = x.shape
    S, Cf, Cin_w = params["w_in"].shape
    assert Cin_w == Cin
    Cout = params["w_out"].shape[1]
    Ln = params["w_dil"].shape[1]

    # Channel padding (full sublanes) and lane padding (lane-dense stores).
    Cp = _round_up(max(Cin, Cf, Cout), 8)
    Lp = _round_up(L, 128)

    xp = jnp.pad(x, ((0, 0), (0, Cp - Cin), (0, Lp - L)))

    # Host-side weight re-layout / zero padding:
    #   * all channel dims padded to Cp with zeros (so padded activation
    #     channels stay exactly zero through residuals and stage chaining),
    #   * dilated taps moved to a leading axis: (S, Ln, 3, Cp, Cp),
    #   * biases stored as (..., Cp, 1) columns (no in-kernel relayout).
    def pad2(w, r, c):
        return jnp.pad(w, [(0, 0)] * (w.ndim - 2) + [(0, r), (0, c)])

    w_in = pad2(params["w_in"], Cp - Cf, Cp - Cin)                  # (S,Cp,Cp)
    b_in = jnp.pad(params["b_in"], ((0, 0), (0, Cp - Cf)))[..., None]
    w_dil = jnp.transpose(params["w_dil"], (0, 1, 4, 2, 3))         # (S,Ln,3,Cf,Cf)
    w_dil = pad2(w_dil, Cp - Cf, Cp - Cf)                           # (S,Ln,3,Cp,Cp)
    b_dil = jnp.pad(params["b_dil"],
                    ((0, 0), (0, 0), (0, Cp - Cf)))[..., None]
    w_1x1 = pad2(params["w_1x1"], Cp - Cf, Cp - Cf)                 # (S,Ln,Cp,Cp)
    b_1x1 = jnp.pad(params["b_1x1"],
                    ((0, 0), (0, 0), (0, Cp - Cf)))[..., None]
    w_out = pad2(params["w_out"], Cp - Cout, Cp - Cf)               # (S,Cp,Cp)
    b_out = jnp.pad(params["b_out"], ((0, 0), (0, Cp - Cout)))[..., None]

    param_list = [w_in, b_in, w_dil, b_dil, w_1x1, b_1x1, w_out, b_out]

    G = _batch_groups(N)            # grid programs
    Bp = N // G                     # batch elements per program

    def full_spec(p):
        nd = p.ndim
        return pl.BlockSpec(p.shape, lambda g, _nd=nd: (0,) * _nd)

    in_specs = [pl.BlockSpec((Bp, Cp, Lp), lambda g: (g, 0, 0))] + \
               [full_spec(p) for p in param_list]
    out_specs = pl.BlockSpec((S, Bp, Cp, Lp), lambda g: (0, g, 0, 0))

    out = pl.pallas_call(
        functools.partial(drbs_kernel, l_valid=L),
        out_shape=jax.ShapeDtypeStruct((S, N, Cp, Lp), x.dtype),
        grid_spec=pltpu.PrefetchScalarGridSpec(
            num_scalar_prefetch=0,
            grid=(G,),
            in_specs=in_specs,
            out_specs=out_specs,
        ),
        compiler_params=pltpu.CompilerParams(
            dimension_semantics=("parallel",)),
    )(xp, *param_list)

    # Slice off channel and lane padding.
    return out[:, :, :Cout, :L]


# -----------------------------------------------------------------------------
# Pure-JAX reference (lax.conv) for verification.
# -----------------------------------------------------------------------------
def _conv1d_ref(x, w, b, dilation=1, padding=0):
    y = jax.lax.conv_general_dilated(
        x, w, window_strides=(1,), padding=[(padding, padding)],
        rhs_dilation=(dilation,), dimension_numbers=("NCH", "OIH", "NCH"))
    return y + b[None, :, None]


def drbs_ref(x, params):
    S = params["w_in"].shape[0]
    Ln = params["w_dil"].shape[1]
    outs = []
    cur = x
    for s in range(S):
        h = _conv1d_ref(cur, params["w_in"][s][:, :, None], params["b_in"][s])
        for li in range(Ln):
            d = 2 ** li
            t = _conv1d_ref(h, params["w_dil"][s, li], params["b_dil"][s, li],
                            dilation=d, padding=d)
            t = jax.nn.relu(t)
            t = _conv1d_ref(t, params["w_1x1"][s, li][:, :, None],
                            params["b_1x1"][s, li])
            h = h + t
        cur = _conv1d_ref(h, params["w_out"][s][:, :, None],
                          params["b_out"][s])
        outs.append(cur)
    return jnp.stack(outs, axis=0)


# -----------------------------------------------------------------------------
# Deterministic parameter construction (matches PyTorch module shapes).
# -----------------------------------------------------------------------------
def make_params(key, num_stages, num_layers, num_f_maps, in_channels,
                out_channels):
    assert in_channels == out_channels, \
        "stage chaining requires in_channels == out_channels"
    keys = jax.random.split(key, 8)
    scale = 0.1
    params = {
        "w_in": jax.random.normal(
            keys[0], (num_stages, num_f_maps, in_channels), jnp.float32) * scale,
        "b_in": jax.random.normal(
            keys[1], (num_stages, num_f_maps), jnp.float32) * scale,
        "w_dil": jax.random.normal(
            keys[2], (num_stages, num_layers, num_f_maps, num_f_maps, 3),
            jnp.float32) * scale,
        "b_dil": jax.random.normal(
            keys[3], (num_stages, num_layers, num_f_maps), jnp.float32) * scale,
        "w_1x1": jax.random.normal(
            keys[4], (num_stages, num_layers, num_f_maps, num_f_maps),
            jnp.float32) * scale,
        "b_1x1": jax.random.normal(
            keys[5], (num_stages, num_layers, num_f_maps), jnp.float32) * scale,
        "w_out": jax.random.normal(
            keys[6], (num_stages, out_channels, num_f_maps), jnp.float32) * scale,
        "b_out": jax.random.normal(
            keys[7], (num_stages, out_channels), jnp.float32) * scale,
    }
    return params


if __name__ == "__main__":
    # DRBs defaults: num_stages=3, num_layers=3, num_f_maps=5, in=out=5.
    num_stages, num_layers, num_f_maps = 3, 3, 5
    in_channels = out_channels = 5          # F = frames per input
    N = 2                                   # batch
    H = W = 16
    L = H * W                               # spatial positions = 256

    key = jax.random.PRNGKey(0)
    kx, kp = jax.random.split(key)
    x = jax.random.normal(kx, (N, in_channels, L), jnp.float32)
    params = make_params(kp, num_stages, num_layers, num_f_maps,
                         in_channels, out_channels)

    out = drbs_pallas(x, params)
    out = jax.block_until_ready(out)

    ref = drbs_ref(x, params)
    assert out.shape == (num_stages, N, out_channels, L)
    assert jnp.allclose(out, ref, rtol=1e-4, atol=1e-5), \
        f"max err {jnp.max(jnp.abs(out - ref))}"

    print("KERNEL_OK")
</pallas_src>

<mosaic_0001>
module attributes {stable_mosaic.version = 11 : i64} {
  func.func @drbs_kernel(%arg0: i32, %arg1: memref<2x8x256xf32, #tpu.memory_space<vmem>>, %arg2: memref<3x8x8xf32, #tpu.memory_space<vmem>>, %arg3: memref<3x8x1xf32, #tpu.memory_space<vmem>>, %arg4: memref<3x3x3x8x8xf32, #tpu.memory_space<vmem>>, %arg5: memref<3x3x8x1xf32, #tpu.memory_space<vmem>>, %arg6: memref<3x3x8x8xf32, #tpu.memory_space<vmem>>, %arg7: memref<3x3x8x1xf32, #tpu.memory_space<vmem>>, %arg8: memref<3x8x8xf32, #tpu.memory_space<vmem>>, %arg9: memref<3x8x1xf32, #tpu.memory_space<vmem>>, %arg10: memref<3x2x8x256xf32, #tpu.memory_space<vmem>>) attributes {dimension_semantics = [#tpu.dimension_semantics<parallel>], iteration_bounds = array<i64: 1>, scalar_prefetch = 0 : i64, scratch_operands = 0 : i64, tpu.core_type = #tpu.core_type<tc>, window_params = [{transform_indices = @transform_0, window_bounds = array<i64: 2, 8, 256>}, {pipeline_mode = #tpu.pipeline_mode<synchronous>, transform_indices = @transform_1, window_bounds = array<i64: 3, 8, 8>}, {pipeline_mode = #tpu.pipeline_mode<synchronous>, transform_indices = @transform_2, window_bounds = array<i64: 3, 8, 1>}, {pipeline_mode = #tpu.pipeline_mode<synchronous>, transform_indices = @transform_3, window_bounds = array<i64: 3, 3, 3, 8, 8>}, {pipeline_mode = #tpu.pipeline_mode<synchronous>, transform_indices = @transform_4, window_bounds = array<i64: 3, 3, 8, 1>}, {pipeline_mode = #tpu.pipeline_mode<synchronous>, transform_indices = @transform_5, window_bounds = array<i64: 3, 3, 8, 8>}, {pipeline_mode = #tpu.pipeline_mode<synchronous>, transform_indices = @transform_6, window_bounds = array<i64: 3, 3, 8, 1>}, {pipeline_mode = #tpu.pipeline_mode<synchronous>, transform_indices = @transform_7, window_bounds = array<i64: 3, 8, 8>}, {pipeline_mode = #tpu.pipeline_mode<synchronous>, transform_indices = @transform_8, window_bounds = array<i64: 3, 8, 1>}, {transform_indices = @transform_9, window_bounds = array<i64: 3, 2, 8, 256>}]} {
    %0 = tpu.iota {dimensions = array<i32: 1>} : vector<8x256xi32>
    %c1_i32 = arith.constant 1 : i32
    %1 = vector.broadcast %c1_i32 : i32 to vector<8x256xi32>
    %2 = arith.cmpi sge, %0, %1 : vector<8x256xi32>
    %c2_i32 = arith.constant 2 : i32
    %3 = vector.broadcast %c2_i32 : i32 to vector<8x256xi32>
    %4 = arith.cmpi sge, %0, %3 : vector<8x256xi32>
    %c4_i32 = arith.constant 4 : i32
    %5 = vector.broadcast %c4_i32 : i32 to vector<8x256xi32>
    %6 = arith.cmpi sge, %0, %5 : vector<8x256xi32>
    %c255_i32 = arith.constant 255 : i32
    %7 = vector.broadcast %c255_i32 : i32 to vector<8x256xi32>
    %8 = arith.cmpi slt, %0, %7 : vector<8x256xi32>
    %c254_i32 = arith.constant 254 : i32
    %9 = vector.broadcast %c254_i32 : i32 to vector<8x256xi32>
    %10 = arith.cmpi slt, %0, %9 : vector<8x256xi32>
    %c252_i32 = arith.constant 252 : i32
    %11 = vector.broadcast %c252_i32 : i32 to vector<8x256xi32>
    %12 = arith.cmpi slt, %0, %11 : vector<8x256xi32>
    %c0 = arith.constant 0 : index
    %c0_0 = arith.constant 0 : index
    %c0_1 = arith.constant 0 : index
    %13 = vector.load %arg1[%c0, %c0_0, %c0_1] : memref<2x8x256xf32, #tpu.memory_space<vmem>>, vector<1x8x256xf32>
    %14 = vector.shape_cast %13 : vector<1x8x256xf32> to vector<8x256xf32>
    %c0_2 = arith.constant 0 : index
    %c0_3 = arith.constant 0 : index
    %c0_4 = arith.constant 0 : index
    %15 = vector.load %arg2[%c0_2, %c0_3, %c0_4] : memref<3x8x8xf32, #tpu.memory_space<vmem>>, vector<1x8x8xf32>
    %16 = vector.shape_cast %15 : vector<1x8x8xf32> to vector<8x8xf32>
    %cst = arith.constant dense<0.000000e+00> : vector<8x256xf32>
    %17 = tpu.matmul %16, %14, %cst {dimension_numbers = #tpu.dot_dimension_numbers<[1], [0], [0], [1], [0, 0, 1, 1], [], []>} : vector<8x8xf32>, vector<8x256xf32>, vector<8x256xf32> -> vector<8x256xf32>
    %c0_5 = arith.constant 0 : index
    %c0_6 = arith.constant 0 : index
    %c0_7 = arith.constant 0 : index
    %18 = vector.load %arg3[%c0_5, %c0_6, %c0_7] : memref<3x8x1xf32, #tpu.memory_space<vmem>>, vector<1x8x1xf32>
    %19 = vector.shape_cast %18 : vector<1x8x1xf32> to vector<8x1xf32>
    %20 = vector.broadcast %19 : vector<8x1xf32> to vector<8x256xf32>
    %21 = arith.addf %17, %20 : vector<8x256xf32>
    %c1_i32_8 = arith.constant 1 : i32
    %22 = tpu.dynamic_rotate %21 by %c1_i32_8 dim 1 : vector<8x256xf32>, i32 -> vector<8x256xf32>
    %cst_9 = arith.constant 0.000000e+00 : f32
    %23 = vector.broadcast %cst_9 : f32 to vector<8x256xf32>
    %24 = arith.select %2, %22, %23 : vector<8x256xi1>, vector<8x256xf32>
    %c255_i32_10 = arith.constant 255 : i32
    %25 = tpu.dynamic_rotate %21 by %c255_i32_10 dim 1 : vector<8x256xf32>, i32 -> vector<8x256xf32>
    %cst_11 = arith.constant 0.000000e+00 : f32
    %26 = vector.broadcast %cst_11 : f32 to vector<8x256xf32>
    %27 = arith.select %8, %25, %26 : vector<8x256xi1>, vector<8x256xf32>
    %c0_12 = arith.constant 0 : index
    %c0_13 = arith.constant 0 : index
    %c1 = arith.constant 1 : index
    %c0_14 = arith.constant 0 : index
    %c0_15 = arith.constant 0 : index
    %28 = vector.load %arg4[%c0_12, %c0_13, %c1, %c0_14, %c0_15] : memref<3x3x3x8x8xf32, #tpu.memory_space<vmem>>, vector<1x1x1x8x8xf32>
    %29 = vector.shape_cast %28 : vector<1x1x1x8x8xf32> to vector<8x8xf32>
    %cst_16 = arith.constant dense<0.000000e+00> : vector<8x256xf32>
    %30 = tpu.matmul %29, %21, %cst_16 {dimension_numbers = #tpu.dot_dimension_numbers<[1], [0], [0], [1], [0, 0, 1, 1], [], []>} : vector<8x8xf32>, vector<8x256xf32>, vector<8x256xf32> -> vector<8x256xf32>
    %c0_17 = arith.constant 0 : index
    %c0_18 = arith.constant 0 : index
    %c0_19 = arith.constant 0 : index
    %c0_20 = arith.constant 0 : index
    %c0_21 = arith.constant 0 : index
    %31 = vector.load %arg4[%c0_17, %c0_18, %c0_19, %c0_20, %c0_21] : memref<3x3x3x8x8xf32, #tpu.memory_space<vmem>>, vector<1x1x1x8x8xf32>
    %32 = vector.shape_cast %31 : vector<1x1x1x8x8xf32> to vector<8x8xf32>
    %cst_22 = arith.constant dense<0.000000e+00> : vector<8x256xf32>
    %33 = tpu.matmul %32, %24, %cst_22 {dimension_numbers = #tpu.dot_dimension_numbers<[1], [0], [0], [1], [0, 0, 1, 1], [], []>} : vector<8x8xf32>, vector<8x256xf32>, vector<8x256xf32> -> vector<8x256xf32>
    %34 = arith.addf %30, %33 : vector<8x256xf32>
    %c0_23 = arith.constant 0 : index
    %c0_24 = arith.constant 0 : index
    %c2 = arith.constant 2 : index
    %c0_25 = arith.constant 0 : index
    %c0_26 = arith.constant 0 : index
    %35 = vector.load %arg4[%c0_23, %c0_24, %c2, %c0_25, %c0_26] : memref<3x3x3x8x8xf32, #tpu.memory_space<vmem>>, vector<1x1x1x8x8xf32>
    %36 = vector.shape_cast %35 : vector<1x1x1x8x8xf32> to vector<8x8xf32>
    %cst_27 = arith.constant dense<0.000000e+00> : vector<8x256xf32>
    %37 = tpu.matmul %36, %27, %cst_27 {dimension_numbers = #tpu.dot_dimension_numbers<[1], [0], [0], [1], [0, 0, 1, 1], [], []>} : vector<8x8xf32>, vector<8x256xf32>, vector<8x256xf32> -> vector<8x256xf32>
    %38 = arith.addf %34, %37 : vector<8x256xf32>
    %c0_28 = arith.constant 0 : index
    %c0_29 = arith.constant 0 : index
    %c0_30 = arith.constant 0 : index
    %c0_31 = arith.constant 0 : index
    %39 = vector.load %arg5[%c0_28, %c0_29, %c0_30, %c0_31] : memref<3x3x8x1xf32, #tpu.memory_space<vmem>>, vector<1x1x8x1xf32>
    %40 = vector.shape_cast %39 : vector<1x1x8x1xf32> to vector<8x1xf32>
    %41 = vector.broadcast %40 : vector<8x1xf32> to vector<8x256xf32>
    %42 = arith.addf %38, %41 : vector<8x256xf32>
    %cst_32 = arith.constant 0.000000e+00 : f32
    %43 = vector.broadcast %cst_32 : f32 to vector<8x256xf32>
    %44 = arith.maximumf %42, %43 : vector<8x256xf32>
    %c0_33 = arith.constant 0 : index
    %c0_34 = arith.constant 0 : index
    %c0_35 = arith.constant 0 : index
    %c0_36 = arith.constant 0 : index
    %45 = vector.load %arg6[%c0_33, %c0_34, %c0_35, %c0_36] : memref<3x3x8x8xf32, #tpu.memory_space<vmem>>, vector<1x1x8x8xf32>
    %46 = vector.shape_cast %45 : vector<1x1x8x8xf32> to vector<8x8xf32>
    %cst_37 = arith.constant dense<0.000000e+00> : vector<8x256xf32>
    %47 = tpu.matmul %46, %44, %cst_37 {dimension_numbers = #tpu.dot_dimension_numbers<[1], [0], [0], [1], [0, 0, 1, 1], [], []>} : vector<8x8xf32>, vector<8x256xf32>, vector<8x256xf32> -> vector<8x256xf32>
    %c0_38 = arith.constant 0 : index
    %c0_39 = arith.constant 0 : index
    %c0_40 = arith.constant 0 : index
    %c0_41 = arith.constant 0 : index
    %48 = vector.load %arg7[%c0_38, %c0_39, %c0_40, %c0_41] : memref<3x3x8x1xf32, #tpu.memory_space<vmem>>, vector<1x1x8x1xf32>
    %49 = vector.shape_cast %48 : vector<1x1x8x1xf32> to vector<8x1xf32>
    %50 = vector.broadcast %49 : vector<8x1xf32> to vector<8x256xf32>
    %51 = arith.addf %47, %50 : vector<8x256xf32>
    %52 = arith.addf %21, %51 : vector<8x256xf32>
    %c2_i32_42 = arith.constant 2 : i32
    %53 = tpu.dynamic_rotate %52 by %c2_i32_42 dim 1 : vector<8x256xf32>, i32 -> vector<8x256xf32>
    %cst_43 = arith.constant 0.000000e+00 : f32
    %54 = vector.broadcast %cst_43 : f32 to vector<8x256xf32>
    %55 = arith.select %4, %53, %54 : vector<8x256xi1>, vector<8x256xf32>
    %c254_i32_44 = arith.constant 254 : i32
    %56 = tpu.dynamic_rotate %52 by %c254_i32_44 dim 1 : vector<8x256xf32>, i32 -> vector<8x256xf32>
    %cst_45 = arith.constant 0.000000e+00 : f32
    %57 = vector.broadcast %cst_45 : f32 to vector<8x256xf32>
    %58 = arith.select %10, %56, %57 : vector<8x256xi1>, vector<8x256xf32>
    %c0_46 = arith.constant 0 : index
    %c1_47 = arith.constant 1 : index
    %c1_48 = arith.constant 1 : index
    %c0_49 = arith.constant 0 : index
    %c0_50 = arith.constant 0 : index
    %59 = vector.load %arg4[%c0_46, %c1_47, %c1_48, %c0_49, %c0_50] : memref<3x3x3x8x8xf32, #tpu.memory_space<vmem>>, vector<1x1x1x8x8xf32>
    %60 = vector.shape_cast %59 : vector<1x1x1x8x8xf32> to vector<8x8xf32>
    %cst_51 = arith.constant dense<0.000000e+00> : vector<8x256xf32>
    %61 = tpu.matmul %60, %52, %cst_51 {dimension_numbers = #tpu.dot_dimension_numbers<[1], [0], [0], [1], [0, 0, 1, 1], [], []>} : vector<8x8xf32>, vector<8x256xf32>, vector<8x256xf32> -> vector<8x256xf32>
    %c0_52 = arith.constant 0 : index
    %c1_53 = arith.constant 1 : index
    %c0_54 = arith.constant 0 : index
    %c0_55 = arith.constant 0 : index
    %c0_56 = arith.constant 0 : index
    %62 = vector.load %arg4[%c0_52, %c1_53, %c0_54, %c0_55, %c0_56] : memref<3x3x3x8x8xf32, #tpu.memory_space<vmem>>, vector<1x1x1x8x8xf32>
    %63 = vector.shape_cast %62 : vector<1x1x1x8x8xf32> to vector<8x8xf32>
    %cst_57 = arith.constant dense<0.000000e+00> : vector<8x256xf32>
    %64 = tpu.matmul %63, %55, %cst_57 {dimension_numbers = #tpu.dot_dimension_numbers<[1], [0], [0], [1], [0, 0, 1, 1], [], []>} : vector<8x8xf32>, vector<8x256xf32>, vector<8x256xf32> -> vector<8x256xf32>
    %65 = arith.addf %61, %64 : vector<8x256xf32>
    %c0_58 = arith.constant 0 : index
    %c1_59 = arith.constant 1 : index
    %c2_60 = arith.constant 2 : index
    %c0_61 = arith.constant 0 : index
    %c0_62 = arith.constant 0 : index
    %66 = vector.load %arg4[%c0_58, %c1_59, %c2_60, %c0_61, %c0_62] : memref<3x3x3x8x8xf32, #tpu.memory_space<vmem>>, vector<1x1x1x8x8xf32>
    %67 = vector.shape_cast %66 : vector<1x1x1x8x8xf32> to vector<8x8xf32>
    %cst_63 = arith.constant dense<0.000000e+00> : vector<8x256xf32>
    %68 = tpu.matmul %67, %58, %cst_63 {dimension_numbers = #tpu.dot_dimension_numbers<[1], [0], [0], [1], [0, 0, 1, 1], [], []>} : vector<8x8xf32>, vector<8x256xf32>, vector<8x256xf32> -> vector<8x256xf32>
    %69 = arith.addf %65, %68 : vector<8x256xf32>
    %c0_64 = arith.constant 0 : index
    %c1_65 = arith.constant 1 : index
    %c0_66 = arith.constant 0 : index
    %c0_67 = arith.constant 0 : index
    %70 = vector.load %arg5[%c0_64, %c1_65, %c0_66, %c0_67] : memref<3x3x8x1xf32, #tpu.memory_space<vmem>>, vector<1x1x8x1xf32>
    %71 = vector.shape_cast %70 : vector<1x1x8x1xf32> to vector<8x1xf32>
    %72 = vector.broadcast %71 : vector<8x1xf32> to vector<8x256xf32>
    %73 = arith.addf %69, %72 : vector<8x256xf32>
    %cst_68 = arith.constant 0.000000e+00 : f32
    %74 = vector.broadcast %cst_68 : f32 to vector<8x256xf32>
    %75 = arith.maximumf %73, %74 : vector<8x256xf32>
    %c0_69 = arith.constant 0 : index
    %c1_70 = arith.constant 1 : index
    %c0_71 = arith.constant 0 : index
    %c0_72 = arith.constant 0 : index
    %76 = vector.load %arg6[%c0_69, %c1_70, %c0_71, %c0_72] : memref<3x3x8x8xf32, #tpu.memory_space<vmem>>, vector<1x1x8x8xf32>
    %77 = vector.shape_cast %76 : vector<1x1x8x8xf32> to vector<8x8xf32>
    %cst_73 = arith.constant dense<0.000000e+00> : vector<8x256xf32>
    %78 = tpu.matmul %77, %75, %cst_73 {dimension_numbers = #tpu.dot_dimension_numbers<[1], [0], [0], [1], [0, 0, 1, 1], [], []>} : vector<8x8xf32>, vector<8x256xf32>, vector<8x256xf32> -> vector<8x256xf32>
    %c0_74 = arith.constant 0 : index
    %c1_75 = arith.constant 1 : index
    %c0_76 = arith.constant 0 : index
    %c0_77 = arith.constant 0 : index
    %79 = vector.load %arg7[%c0_74, %c1_75, %c0_76, %c0_77] : memref<3x3x8x1xf32, #tpu.memory_space<vmem>>, vector<1x1x8x1xf32>
    %80 = vector.shape_cast %79 : vector<1x1x8x1xf32> to vector<8x1xf32>
    %81 = vector.broadcast %80 : vector<8x1xf32> to vector<8x256xf32>
    %82 = arith.addf %78, %81 : vector<8x256xf32>
    %83 = arith.addf %52, %82 : vector<8x256xf32>
    %c4_i32_78 = arith.constant 4 : i32
    %84 = tpu.dynamic_rotate %83 by %c4_i32_78 dim 1 : vector<8x256xf32>, i32 -> vector<8x256xf32>
    %cst_79 = arith.constant 0.000000e+00 : f32
    %85 = vector.broadcast %cst_79 : f32 to vector<8x256xf32>
    %86 = arith.select %6, %84, %85 : vector<8x256xi1>, vector<8x256xf32>
    %c252_i32_80 = arith.constant 252 : i32
    %87 = tpu.dynamic_rotate %83 by %c252_i32_80 dim 1 : vector<8x256xf32>, i32 -> vector<8x256xf32>
    %cst_81 = arith.constant 0.000000e+00 : f32
    %88 = vector.broadcast %cst_81 : f32 to vector<8x256xf32>
    %89 = arith.select %12, %87, %88 : vector<8x256xi1>, vector<8x256xf32>
    %c0_82 = arith.constant 0 : index
    %c2_83 = arith.constant 2 : index
    %c1_84 = arith.constant 1 : index
    %c0_85 = arith.constant 0 : index
    %c0_86 = arith.constant 0 : index
    %90 = vector.load %arg4[%c0_82, %c2_83, %c1_84, %c0_85, %c0_86] : memref<3x3x3x8x8xf32, #tpu.memory_space<vmem>>, vector<1x1x1x8x8xf32>
    %91 = vector.shape_cast %90 : vector<1x1x1x8x8xf32> to vector<8x8xf32>
    %cst_87 = arith.constant dense<0.000000e+00> : vector<8x256xf32>
    %92 = tpu.matmul %91, %83, %cst_87 {dimension_numbers = #tpu.dot_dimension_numbers<[1], [0], [0], [1], [0, 0, 1, 1], [], []>} : vector<8x8xf32>, vector<8x256xf32>, vector<8x256xf32> -> vector<8x256xf32>
    %c0_88 = arith.constant 0 : index
    %c2_89 = arith.constant 2 : index
    %c0_90 = arith.constant 0 : index
    %c0_91 = arith.constant 0 : index
    %c0_92 = arith.constant 0 : index
    %93 = vector.load %arg4[%c0_88, %c2_89, %c0_90, %c0_91, %c0_92] : memref<3x3x3x8x8xf32, #tpu.memory_space<vmem>>, vector<1x1x1x8x8xf32>
    %94 = vector.shape_cast %93 : vector<1x1x1x8x8xf32> to vector<8x8xf32>
    %cst_93 = arith.constant dense<0.000000e+00> : vector<8x256xf32>
    %95 = tpu.matmul %94, %86, %cst_93 {dimension_numbers = #tpu.dot_dimension_numbers<[1], [0], [0], [1], [0, 0, 1, 1], [], []>} : vector<8x8xf32>, vector<8x256xf32>, vector<8x256xf32> -> vector<8x256xf32>
    %96 = arith.addf %92, %95 : vector<8x256xf32>
    %c0_94 = arith.constant 0 : index
    %c2_95 = arith.constant 2 : index
    %c2_96 = arith.constant 2 : index
    %c0_97 = arith.constant 0 : index
    %c0_98 = arith.constant 0 : index
    %97 = vector.load %arg4[%c0_94, %c2_95, %c2_96, %c0_97, %c0_98] : memref<3x3x3x8x8xf32, #tpu.memory_space<vmem>>, vector<1x1x1x8x8xf32>
    %98 = vector.shape_cast %97 : vector<1x1x1x8x8xf32> to vector<8x8xf32>
    %cst_99 = arith.constant dense<0.000000e+00> : vector<8x256xf32>
    %99 = tpu.matmul %98, %89, %cst_99 {dimension_numbers = #tpu.dot_dimension_numbers<[1], [0], [0], [1], [0, 0, 1, 1], [], []>} : vector<8x8xf32>, vector<8x256xf32>, vector<8x256xf32> -> vector<8x256xf32>
    %100 = arith.addf %96, %99 : vector<8x256xf32>
    %c0_100 = arith.constant 0 : index
    %c2_101 = arith.constant 2 : index
    %c0_102 = arith.constant 0 : index
    %c0_103 = arith.constant 0 : index
    %101 = vector.load %arg5[%c0_100, %c2_101, %c0_102, %c0_103] : memref<3x3x8x1xf32, #tpu.memory_space<vmem>>, vector<1x1x8x1xf32>
    %102 = vector.shape_cast %101 : vector<1x1x8x1xf32> to vector<8x1xf32>
    %103 = vector.broadcast %102 : vector<8x1xf32> to vector<8x256xf32>
    %104 = arith.addf %100, %103 : vector<8x256xf32>
    %cst_104 = arith.constant 0.000000e+00 : f32
    %105 = vector.broadcast %cst_104 : f32 to vector<8x256xf32>
    %106 = arith.maximumf %104, %105 : vector<8x256xf32>
    %c0_105 = arith.constant 0 : index
    %c2_106 = arith.constant 2 : index
    %c0_107 = arith.constant 0 : index
    %c0_108 = arith.constant 0 : index
    %107 = vector.load %arg6[%c0_105, %c2_106, %c0_107, %c0_108] : memref<3x3x8x8xf32, #tpu.memory_space<vmem>>, vector<1x1x8x8xf32>
    %108 = vector.shape_cast %107 : vector<1x1x8x8xf32> to vector<8x8xf32>
    %cst_109 = arith.constant dense<0.000000e+00> : vector<8x256xf32>
    %109 = tpu.matmul %108, %106, %cst_109 {dimension_numbers = #tpu.dot_dimension_numbers<[1], [0], [0], [1], [0, 0, 1, 1], [], []>} : vector<8x8xf32>, vector<8x256xf32>, vector<8x256xf32> -> vector<8x256xf32>
    %c0_110 = arith.constant 0 : index
    %c2_111 = arith.constant 2 : index
    %c0_112 = arith.constant 0 : index
    %c0_113 = arith.constant 0 : index
    %110 = vector.load %arg7[%c0_110, %c2_111, %c0_112, %c0_113] : memref<3x3x8x1xf32, #tpu.memory_space<vmem>>, vector<1x1x8x1xf32>
    %111 = vector.shape_cast %110 : vector<1x1x8x1xf32> to vector<8x1xf32>
    %112 = vector.broadcast %111 : vector<8x1xf32> to vector<8x256xf32>
    %113 = arith.addf %109, %112 : vector<8x256xf32>
    %114 = arith.addf %83, %113 : vector<8x256xf32>
    %c0_114 = arith.constant 0 : index
    %c0_115 = arith.constant 0 : index
    %c0_116 = arith.constant 0 : index
    %115 = vector.load %arg8[%c0_114, %c0_115, %c0_116] : memref<3x8x8xf32, #tpu.memory_space<vmem>>, vector<1x8x8xf32>
    %116 = vector.shape_cast %115 : vector<1x8x8xf32> to vector<8x8xf32>
    %cst_117 = arith.constant dense<0.000000e+00> : vector<8x256xf32>
    %117 = tpu.matmul %116, %114, %cst_117 {dimension_numbers = #tpu.dot_dimension_numbers<[1], [0], [0], [1], [0, 0, 1, 1], [], []>} : vector<8x8xf32>, vector<8x256xf32>, vector<8x256xf32> -> vector<8x256xf32>
    %c0_118 = arith.constant 0 : index
    %c0_119 = arith.constant 0 : index
    %c0_120 = arith.constant 0 : index
    %118 = vector.load %arg9[%c0_118, %c0_119, %c0_120] : memref<3x8x1xf32, #tpu.memory_space<vmem>>, vector<1x8x1xf32>
    %119 = vector.shape_cast %118 : vector<1x8x1xf32> to vector<8x1xf32>
    %120 = vector.broadcast %119 : vector<8x1xf32> to vector<8x256xf32>
    %121 = arith.addf %117, %120 : vector<8x256xf32>
    %c0_121 = arith.constant 0 : index
    %c0_122 = arith.constant 0 : index
    %c0_123 = arith.constant 0 : index
    %c0_124 = arith.constant 0 : index
    %122 = vector.load %arg10[%c0_121, %c0_122, %c0_123, %c0_124] : memref<3x2x8x256xf32, #tpu.memory_space<vmem>>, vector<1x1x8x256xf32>
    %123 = vector.shape_cast %122 : vector<1x1x8x256xf32> to vector<8x256xf32>
    %124 = vector.shape_cast %121 : vector<8x256xf32> to vector<1x1x8x256xf32>
    tpu.vector_store %arg10[%c0_121, %c0_122, %c0_123, %c0_124], %124 {strides = array<i32>} : memref<3x2x8x256xf32, #tpu.memory_space<vmem>>, vector<1x1x8x256xf32>,
    %c1_125 = arith.constant 1 : index
    %c0_126 = arith.constant 0 : index
    %c0_127 = arith.constant 0 : index
    %125 = vector.load %arg2[%c1_125, %c0_126, %c0_127] : memref<3x8x8xf32, #tpu.memory_space<vmem>>, vector<1x8x8xf32>
    %126 = vector.shape_cast %125 : vector<1x8x8xf32> to vector<8x8xf32>
    %cst_128 = arith.constant dense<0.000000e+00> : vector<8x256xf32>
    %127 = tpu.matmul %126, %121, %cst_128 {dimension_numbers = #tpu.dot_dimension_numbers<[1], [0], [0], [1], [0, 0, 1, 1], [], []>} : vector<8x8xf32>, vector<8x256xf32>, vector<8x256xf32> -> vector<8x256xf32>
    %c1_129 = arith.constant 1 : index
    %c0_130 = arith.constant 0 : index
    %c0_131 = arith.constant 0 : index
    %128 = vector.load %arg3[%c1_129, %c0_130, %c0_131] : memref<3x8x1xf32, #tpu.memory_space<vmem>>, vector<1x8x1xf32>
    %129 = vector.shape_cast %128 : vector<1x8x1xf32> to vector<8x1xf32>
    %130 = vector.broadcast %129 : vector<8x1xf32> to vector<8x256xf32>
    %131 = arith.addf %127, %130 : vector<8x256xf32>
    %c1_i32_132 = arith.constant 1 : i32
    %132 = tpu.dynamic_rotate %131 by %c1_i32_132 dim 1 : vector<8x256xf32>, i32 -> vector<8x256xf32>
    %cst_133 = arith.constant 0.000000e+00 : f32
    %133 = vector.broadcast %cst_133 : f32 to vector<8x256xf32>
    %134 = arith.select %2, %132, %133 : vector<8x256xi1>, vector<8x256xf32>
    %c255_i32_134 = arith.constant 255 : i32
    %135 = tpu.dynamic_rotate %131 by %c255_i32_134 dim 1 : vector<8x256xf32>, i32 -> vector<8x256xf32>
    %cst_135 = arith.constant 0.000000e+00 : f32
    %136 = vector.broadcast %cst_135 : f32 to vector<8x256xf32>
    %137 = arith.select %8, %135, %136 : vector<8x256xi1>, vector<8x256xf32>
    %c1_136 = arith.constant 1 : index
    %c0_137 = arith.constant 0 : index
    %c1_138 = arith.constant 1 : index
    %c0_139 = arith.constant 0 : index
    %c0_140 = arith.constant 0 : index
    %138 = vector.load %arg4[%c1_136, %c0_137, %c1_138, %c0_139, %c0_140] : memref<3x3x3x8x8xf32, #tpu.memory_space<vmem>>, vector<1x1x1x8x8xf32>
    %139 = vector.shape_cast %138 : vector<1x1x1x8x8xf32> to vector<8x8xf32>
    %cst_141 = arith.constant dense<0.000000e+00> : vector<8x256xf32>
    %140 = tpu.matmul %139, %131, %cst_141 {dimension_numbers = #tpu.dot_dimension_numbers<[1], [0], [0], [1], [0, 0, 1, 1], [], []>} : vector<8x8xf32>, vector<8x256xf32>, vector<8x256xf32> -> vector<8x256xf32>
    %c1_142 = arith.constant 1 : index
    %c0_143 = arith.constant 0 : index
    %c0_144 = arith.constant 0 : index
    %c0_145 = arith.constant 0 : index
    %c0_146 = arith.constant 0 : index
    %141 = vector.load %arg4[%c1_142, %c0_143, %c0_144, %c0_145, %c0_146] : memref<3x3x3x8x8xf32, #tpu.memory_space<vmem>>, vector<1x1x1x8x8xf32>
    %142 = vector.shape_cast %141 : vector<1x1x1x8x8xf32> to vector<8x8xf32>
    %cst_147 = arith.constant dense<0.000000e+00> : vector<8x256xf32>
    %143 = tpu.matmul %142, %134, %cst_147 {dimension_numbers = #tpu.dot_dimension_numbers<[1], [0], [0], [1], [0, 0, 1, 1], [], []>} : vector<8x8xf32>, vector<8x256xf32>, vector<8x256xf32> -> vector<8x256xf32>
    %144 = arith.addf %140, %143 : vector<8x256xf32>
    %c1_148 = arith.constant 1 : index
    %c0_149 = arith.constant 0 : index
    %c2_150 = arith.constant 2 : index
    %c0_151 = arith.constant 0 : index
    %c0_152 = arith.constant 0 : index
    %145 = vector.load %arg4[%c1_148, %c0_149, %c2_150, %c0_151, %c0_152] : memref<3x3x3x8x8xf32, #tpu.memory_space<vmem>>, vector<1x1x1x8x8xf32>
    %146 = vector.shape_cast %145 : vector<1x1x1x8x8xf32> to vector<8x8xf32>
    %cst_153 = arith.constant dense<0.000000e+00> : vector<8x256xf32>
    %147 = tpu.matmul %146, %137, %cst_153 {dimension_numbers = #tpu.dot_dimension_numbers<[1], [0], [0], [1], [0, 0, 1, 1], [], []>} : vector<8x8xf32>, vector<8x256xf32>, vector<8x256xf32> -> vector<8x256xf32>
    %148 = arith.addf %144, %147 : vector<8x256xf32>
    %c1_154 = arith.constant 1 : index
    %c0_155 = arith.constant 0 : index
    %c0_156 = arith.constant 0 : index
    %c0_157 = arith.constant 0 : index
    %149 = vector.load %arg5[%c1_154, %c0_155, %c0_156, %c0_157] : memref<3x3x8x1xf32, #tpu.memory_space<vmem>>, vector<1x1x8x1xf32>
    %150 = vector.shape_cast %149 : vector<1x1x8x1xf32> to vector<8x1xf32>
    %151 = vector.broadcast %150 : vector<8x1xf32> to vector<8x256xf32>
    %152 = arith.addf %148, %151 : vector<8x256xf32>
    %cst_158 = arith.constant 0.000000e+00 : f32
    %153 = vector.broadcast %cst_158 : f32 to vector<8x256xf32>
    %154 = arith.maximumf %152, %153 : vector<8x256xf32>
    %c1_159 = arith.constant 1 : index
    %c0_160 = arith.constant 0 : index
    %c0_161 = arith.constant 0 : index
    %c0_162 = arith.constant 0 : index
    %155 = vector.load %arg6[%c1_159, %c0_160, %c0_161, %c0_162] : memref<3x3x8x8xf32, #tpu.memory_space<vmem>>, vector<1x1x8x8xf32>
    %156 = vector.shape_cast %155 : vector<1x1x8x8xf32> to vector<8x8xf32>
    %cst_163 = arith.constant dense<0.000000e+00> : vector<8x256xf32>
    %157 = tpu.matmul %156, %154, %cst_163 {dimension_numbers = #tpu.dot_dimension_numbers<[1], [0], [0], [1], [0, 0, 1, 1], [], []>} : vector<8x8xf32>, vector<8x256xf32>, vector<8x256xf32> -> vector<8x256xf32>
    %c1_164 = arith.constant 1 : index
    %c0_165 = arith.constant 0 : index
    %c0_166 = arith.constant 0 : index
    %c0_167 = arith.constant 0 : index
    %158 = vector.load %arg7[%c1_164, %c0_165, %c0_166, %c0_167] : memref<3x3x8x1xf32, #tpu.memory_space<vmem>>, vector<1x1x8x1xf32>
    %159 = vector.shape_cast %158 : vector<1x1x8x1xf32> to vector<8x1xf32>
    %160 = vector.broadcast %159 : vector<8x1xf32> to vector<8x256xf32>
    %161 = arith.addf %157, %160 : vector<8x256xf32>
    %162 = arith.addf %131, %161 : vector<8x256xf32>
    %c2_i32_168 = arith.constant 2 : i32
    %163 = tpu.dynamic_rotate %162 by %c2_i32_168 dim 1 : vector<8x256xf32>, i32 -> vector<8x256xf32>
    %cst_169 = arith.constant 0.000000e+00 : f32
    %164 = vector.broadcast %cst_169 : f32 to vector<8x256xf32>
    %165 = arith.select %4, %163, %164 : vector<8x256xi1>, vector<8x256xf32>
    %c254_i32_170 = arith.constant 254 : i32
    %166 = tpu.dynamic_rotate %162 by %c254_i32_170 dim 1 : vector<8x256xf32>, i32 -> vector<8x256xf32>
    %cst_171 = arith.constant 0.000000e+00 : f32
    %167 = vector.broadcast %cst_171 : f32 to vector<8x256xf32>
    %168 = arith.select %10, %166, %167 : vector<8x256xi1>, vector<8x256xf32>
    %c1_172 = arith.constant 1 : index
    %c1_173 = arith.constant 1 : index
    %c1_174 = arith.constant 1 : index
    %c0_175 = arith.constant 0 : index
    %c0_176 = arith.constant 0 : index
    %169 = vector.load %arg4[%c1_172, %c1_173, %c1_174, %c0_175, %c0_176] : memref<3x3x3x8x8xf32, #tpu.memory_space<vmem>>, vector<1x1x1x8x8xf32>
    %170 = vector.shape_cast %169 : vector<1x1x1x8x8xf32> to vector<8x8xf32>
    %cst_177 = arith.constant dense<0.000000e+00> : vector<8x256xf32>
    %171 = tpu.matmul %170, %162, %cst_177 {dimension_numbers = #tpu.dot_dimension_numbers<[1], [0], [0], [1], [0, 0, 1, 1], [], []>} : vector<8x8xf32>, vector<8x256xf32>, vector<8x256xf32> -> vector<8x256xf32>
    %c1_178 = arith.constant 1 : index
    %c1_179 = arith.constant 1 : index
    %c0_180 = arith.constant 0 : index
    %c0_181 = arith.constant 0 : index
    %c0_182 = arith.constant 0 : index
    %172 = vector.load %arg4[%c1_178, %c1_179, %c0_180, %c0_181, %c0_182] : memref<3x3x3x8x8xf32, #tpu.memory_space<vmem>>, vector<1x1x1x8x8xf32>
    %173 = vector.shape_cast %172 : vector<1x1x1x8x8xf32> to vector<8x8xf32>
    %cst_183 = arith.constant dense<0.000000e+00> : vector<8x256xf32>
    %174 = tpu.matmul %173, %165, %cst_183 {dimension_numbers = #tpu.dot_dimension_numbers<[1], [0], [0], [1], [0, 0, 1, 1], [], []>} : vector<8x8xf32>, vector<8x256xf32>, vector<8x256xf32> -> vector<8x256xf32>
    %175 = arith.addf %171, %174 : vector<8x256xf32>
    %c1_184 = arith.constant 1 : index
    %c1_185 = arith.constant 1 : index
    %c2_186 = arith.constant 2 : index
    %c0_187 = arith.constant 0 : index
    %c0_188 = arith.constant 0 : index
    %176 = vector.load %arg4[%c1_184, %c1_185, %c2_186, %c0_187, %c0_188] : memref<3x3x3x8x8xf32, #tpu.memory_space<vmem>>, vector<1x1x1x8x8xf32>
    %177 = vector.shape_cast %176 : vector<1x1x1x8x8xf32> to vector<8x8xf32>
    %cst_189 = arith.constant dense<0.000000e+00> : vector<8x256xf32>
    %178 = tpu.matmul %177, %168, %cst_189 {dimension_numbers = #tpu.dot_dimension_numbers<[1], [0], [0], [1], [0, 0, 1, 1], [], []>} : vector<8x8xf32>, vector<8x256xf32>, vector<8x256xf32> -> vector<8x256xf32>
    %179 = arith.addf %175, %178 : vector<8x256xf32>
    %c1_190 = arith.constant 1 : index
    %c1_191 = arith.constant 1 : index
    %c0_192 = arith.constant 0 : index
    %c0_193 = arith.constant 0 : index
    %180 = vector.load %arg5[%c1_190, %c1_191, %c0_192, %c0_193] : memref<3x3x8x1xf32, #tpu.memory_space<vmem>>, vector<1x1x8x1xf32>
    %181 = vector.shape_cast %180 : vector<1x1x8x1xf32> to vector<8x1xf32>
    %182 = vector.broadcast %181 : vector<8x1xf32> to vector<8x256xf32>
    %183 = arith.addf %179, %182 : vector<8x256xf32>
    %cst_194 = arith.constant 0.000000e+00 : f32
    %184 = vector.broadcast %cst_194 : f32 to vector<8x256xf32>
    %185 = arith.maximumf %183, %184 : vector<8x256xf32>
    %c1_195 = arith.constant 1 : index
    %c1_196 = arith.constant 1 : index
    %c0_197 = arith.constant 0 : index
    %c0_198 = arith.constant 0 : index
    %186 = vector.load %arg6[%c1_195, %c1_196, %c0_197, %c0_198] : memref<3x3x8x8xf32, #tpu.memory_space<vmem>>, vector<1x1x8x8xf32>
    %187 = vector.shape_cast %186 : vector<1x1x8x8xf32> to vector<8x8xf32>
    %cst_199 = arith.constant dense<0.000000e+00> : vector<8x256xf32>
    %188 = tpu.matmul %187, %185, %cst_199 {dimension_numbers = #tpu.dot_dimension_numbers<[1], [0], [0], [1], [0, 0, 1, 1], [], []>} : vector<8x8xf32>, vector<8x256xf32>, vector<8x256xf32> -> vector<8x256xf32>
    %c1_200 = arith.constant 1 : index
    %c1_201 = arith.constant 1 : index
    %c0_202 = arith.constant 0 : index
    %c0_203 = arith.constant 0 : index
    %189 = vector.load %arg7[%c1_200, %c1_201, %c0_202, %c0_203] : memref<3x3x8x1xf32, #tpu.memory_space<vmem>>, vector<1x1x8x1xf32>
    %190 = vector.shape_cast %189 : vector<1x1x8x1xf32> to vector<8x1xf32>
    %191 = vector.broadcast %190 : vector<8x1xf32> to vector<8x256xf32>
    %192 = arith.addf %188, %191 : vector<8x256xf32>
    %193 = arith.addf %162, %192 : vector<8x256xf32>
    %c4_i32_204 = arith.constant 4 : i32
    %194 = tpu.dynamic_rotate %193 by %c4_i32_204 dim 1 : vector<8x256xf32>, i32 -> vector<8x256xf32>
    %cst_205 = arith.constant 0.000000e+00 : f32
    %195 = vector.broadcast %cst_205 : f32 to vector<8x256xf32>
    %196 = arith.select %6, %194, %195 : vector<8x256xi1>, vector<8x256xf32>
    %c252_i32_206 = arith.constant 252 : i32
    %197 = tpu.dynamic_rotate %193 by %c252_i32_206 dim 1 : vector<8x256xf32>, i32 -> vector<8x256xf32>
    %cst_207 = arith.constant 0.000000e+00 : f32
    %198 = vector.broadcast %cst_207 : f32 to vector<8x256xf32>
    %199 = arith.select %12, %197, %198 : vector<8x256xi1>, vector<8x256xf32>
    %c1_208 = arith.constant 1 : index
    %c2_209 = arith.constant 2 : index
    %c1_210 = arith.constant 1 : index
    %c0_211 = arith.constant 0 : index
    %c0_212 = arith.constant 0 : index
    %200 = vector.load %arg4[%c1_208, %c2_209, %c1_210, %c0_211, %c0_212] : memref<3x3x3x8x8xf32, #tpu.memory_space<vmem>>, vector<1x1x1x8x8xf32>
    %201 = vector.shape_cast %200 : vector<1x1x1x8x8xf32> to vector<8x8xf32>
    %cst_213 = arith.constant dense<0.000000e+00> : vector<8x256xf32>
    %202 = tpu.matmul %201, %193, %cst_213 {dimension_numbers = #tpu.dot_dimension_numbers<[1], [0], [0], [1], [0, 0, 1, 1], [], []>} : vector<8x8xf32>, vector<8x256xf32>, vector<8x256xf32> -> vector<8x256xf32>
    %c1_214 = arith.constant 1 : index
    %c2_215 = arith.constant 2 : index
    %c0_216 = arith.constant 0 : index
    %c0_217 = arith.constant 0 : index
    %c0_218 = arith.constant 0 : index
    %203 = vector.load %arg4[%c1_214, %c2_215, %c0_216, %c0_217, %c0_218] : memref<3x3x3x8x8xf32, #tpu.memory_space<vmem>>, vector<1x1x1x8x8xf32>
    %204 = vector.shape_cast %203 : vector<1x1x1x8x8xf32> to vector<8x8xf32>
    %cst_219 = arith.constant dense<0.000000e+00> : vector<8x256xf32>
    %205 = tpu.matmul %204, %196, %cst_219 {dimension_numbers = #tpu.dot_dimension_numbers<[1], [0], [0], [1], [0, 0, 1, 1], [], []>} : vector<8x8xf32>, vector<8x256xf32>, vector<8x256xf32> -> vector<8x256xf32>
    %206 = arith.addf %202, %205 : vector<8x256xf32>
    %c1_220 = arith.constant 1 : index
    %c2_221 = arith.constant 2 : index
    %c2_222 = arith.constant 2 : index
    %c0_223 = arith.constant 0 : index
    %c0_224 = arith.constant 0 : index
    %207 = vector.load %arg4[%c1_220, %c2_221, %c2_222, %c0_223, %c0_224] : memref<3x3x3x8x8xf32, #tpu.memory_space<vmem>>, vector<1x1x1x8x8xf32>
    %208 = vector.shape_cast %207 : vector<1x1x1x8x8xf32> to vector<8x8xf32>
    %cst_225 = arith.constant dense<0.000000e+00> : vector<8x256xf32>
    %209 = tpu.matmul %208, %199, %cst_225 {dimension_numbers = #tpu.dot_dimension_numbers<[1], [0], [0], [1], [0, 0, 1, 1], [], []>} : vector<8x8xf32>, vector<8x256xf32>, vector<8x256xf32> -> vector<8x256xf32>
    %210 = arith.addf %206, %209 : vector<8x256xf32>
    %c1_226 = arith.constant 1 : index
    %c2_227 = arith.constant 2 : index
    %c0_228 = arith.constant 0 : index
    %c0_229 = arith.constant 0 : index
    %211 = vector.load %arg5[%c1_226, %c2_227, %c0_228, %c0_229] : memref<3x3x8x1xf32, #tpu.memory_space<vmem>>, vector<1x1x8x1xf32>
    %212 = vector.shape_cast %211 : vector<1x1x8x1xf32> to vector<8x1xf32>
    %213 = vector.broadcast %212 : vector<8x1xf32> to vector<8x256xf32>
    %214 = arith.addf %210, %213 : vector<8x256xf32>
    %cst_230 = arith.constant 0.000000e+00 : f32
    %215 = vector.broadcast %cst_230 : f32 to vector<8x256xf32>
    %216 = arith.maximumf %214, %215 : vector<8x256xf32>
    %c1_231 = arith.constant 1 : index
    %c2_232 = arith.constant 2 : index
    %c0_233 = arith.constant 0 : index
    %c0_234 = arith.constant 0 : index
    %217 = vector.load %arg6[%c1_231, %c2_232, %c0_233, %c0_234] : memref<3x3x8x8xf32, #tpu.memory_space<vmem>>, vector<1x1x8x8xf32>
    %218 = vector.shape_cast %217 : vector<1x1x8x8xf32> to vector<8x8xf32>
    %cst_235 = arith.constant dense<0.000000e+00> : vector<8x256xf32>
    %219 = tpu.matmul %218, %216, %cst_235 {dimension_numbers = #tpu.dot_dimension_numbers<[1], [0], [0], [1], [0, 0, 1, 1], [], []>} : vector<8x8xf32>, vector<8x256xf32>, vector<8x256xf32> -> vector<8x256xf32>
    %c1_236 = arith.constant 1 : index
    %c2_237 = arith.constant 2 : index
    %c0_238 = arith.constant 0 : index
    %c0_239 = arith.constant 0 : index
    %220 = vector.load %arg7[%c1_236, %c2_237, %c0_238, %c0_239] : memref<3x3x8x1xf32, #tpu.memory_space<vmem>>, vector<1x1x8x1xf32>
    %221 = vector.shape_cast %220 : vector<1x1x8x1xf32> to vector<8x1xf32>
    %222 = vector.broadcast %221 : vector<8x1xf32> to vector<8x256xf32>
    %223 = arith.addf %219, %222 : vector<8x256xf32>
    %224 = arith.addf %193, %223 : vector<8x256xf32>
    %c1_240 = arith.constant 1 : index
    %c0_241 = arith.constant 0 : index
    %c0_242 = arith.constant 0 : index
    %225 = vector.load %arg8[%c1_240, %c0_241, %c0_242] : memref<3x8x8xf32, #tpu.memory_space<vmem>>, vector<1x8x8xf32>
    %226 = vector.shape_cast %225 : vector<1x8x8xf32> to vector<8x8xf32>
    %cst_243 = arith.constant dense<0.000000e+00> : vector<8x256xf32>
    %227 = tpu.matmul %226, %224, %cst_243 {dimension_numbers = #tpu.dot_dimension_numbers<[1], [0], [0], [1], [0, 0, 1, 1], [], []>} : vector<8x8xf32>, vector<8x256xf32>, vector<8x256xf32> -> vector<8x256xf32>
    %c1_244 = arith.constant 1 : index
    %c0_245 = arith.constant 0 : index
    %c0_246 = arith.constant 0 : index
    %228 = vector.load %arg9[%c1_244, %c0_245, %c0_246] : memref<3x8x1xf32, #tpu.memory_space<vmem>>, vector<1x8x1xf32>
    %229 = vector.shape_cast %228 : vector<1x8x1xf32> to vector<8x1xf32>
    %230 = vector.broadcast %229 : vector<8x1xf32> to vector<8x256xf32>
    %231 = arith.addf %227, %230 : vector<8x256xf32>
    %c1_247 = arith.constant 1 : index
    %c0_248 = arith.constant 0 : index
    %c0_249 = arith.constant 0 : index
    %c0_250 = arith.constant 0 : index
    %232 = vector.load %arg10[%c1_247, %c0_248, %c0_249, %c0_250] : memref<3x2x8x256xf32, #tpu.memory_space<vmem>>, vector<1x1x8x256xf32>
    %233 = vector.shape_cast %232 : vector<1x1x8x256xf32> to vector<8x256xf32>
    %234 = vector.shape_cast %231 : vector<8x256xf32> to vector<1x1x8x256xf32>
    tpu.vector_store %arg10[%c1_247, %c0_248, %c0_249, %c0_250], %234 {strides = array<i32>} : memref<3x2x8x256xf32, #tpu.memory_space<vmem>>, vector<1x1x8x256xf32>,
    %c2_251 = arith.constant 2 : index
    %c0_252 = arith.constant 0 : index
    %c0_253 = arith.constant 0 : index
    %235 = vector.load %arg2[%c2_251, %c0_252, %c0_253] : memref<3x8x8xf32, #tpu.memory_space<vmem>>, vector<1x8x8xf32>
    %236 = vector.shape_cast %235 : vector<1x8x8xf32> to vector<8x8xf32>
    %cst_254 = arith.constant dense<0.000000e+00> : vector<8x256xf32>
    %237 = tpu.matmul %236, %231, %cst_254 {dimension_numbers = #tpu.dot_dimension_numbers<[1], [0], [0], [1], [0, 0, 1, 1], [], []>} : vector<8x8xf32>, vector<8x256xf32>, vector<8x256xf32> -> vector<8x256xf32>
    %c2_255 = arith.constant 2 : index
    %c0_256 = arith.constant 0 : index
    %c0_257 = arith.constant 0 : index
    %238 = vector.load %arg3[%c2_255, %c0_256, %c0_257] : memref<3x8x1xf32, #tpu.memory_space<vmem>>, vector<1x8x1xf32>
    %239 = vector.shape_cast %238 : vector<1x8x1xf32> to vector<8x1xf32>
    %240 = vector.broadcast %239 : vector<8x1xf32> to vector<8x256xf32>
    %241 = arith.addf %237, %240 : vector<8x256xf32>
    %c1_i32_258 = arith.constant 1 : i32
    %242 = tpu.dynamic_rotate %241 by %c1_i32_258 dim 1 : vector<8x256xf32>, i32 -> vector<8x256xf32>
    %cst_259 = arith.constant 0.000000e+00 : f32
    %243 = vector.broadcast %cst_259 : f32 to vector<8x256xf32>
    %244 = arith.select %2, %242, %243 : vector<8x256xi1>, vector<8x256xf32>
    %c255_i32_260 = arith.constant 255 : i32
    %245 = tpu.dynamic_rotate %241 by %c255_i32_260 dim 1 : vector<8x256xf32>, i32 -> vector<8x256xf32>
    %cst_261 = arith.constant 0.000000e+00 : f32
    %246 = vector.broadcast %cst_261 : f32 to vector<8x256xf32>
    %247 = arith.select %8, %245, %246 : vector<8x256xi1>, vector<8x256xf32>
    %c2_262 = arith.constant 2 : index
    %c0_263 = arith.constant 0 : index
    %c1_264 = arith.constant 1 : index
    %c0_265 = arith.constant 0 : index
    %c0_266 = arith.constant 0 : index
    %248 = vector.load %arg4[%c2_262, %c0_263, %c1_264, %c0_265, %c0_266] : memref<3x3x3x8x8xf32, #tpu.memory_space<vmem>>, vector<1x1x1x8x8xf32>
    %249 = vector.shape_cast %248 : vector<1x1x1x8x8xf32> to vector<8x8xf32>
    %cst_267 = arith.constant dense<0.000000e+00> : vector<8x256xf32>
    %250 = tpu.matmul %249, %241, %cst_267 {dimension_numbers = #tpu.dot_dimension_numbers<[1], [0], [0], [1], [0, 0, 1, 1], [], []>} : vector<8x8xf32>, vector<8x256xf32>, vector<8x256xf32> -> vector<8x256xf32>
    %c2_268 = arith.constant 2 : index
    %c0_269 = arith.constant 0 : index
    %c0_270 = arith.constant 0 : index
    %c0_271 = arith.constant 0 : index
    %c0_272 = arith.constant 0 : index
    %251 = vector.load %arg4[%c2_268, %c0_269, %c0_270, %c0_271, %c0_272] : memref<3x3x3x8x8xf32, #tpu.memory_space<vmem>>, vector<1x1x1x8x8xf32>
    %252 = vector.shape_cast %251 : vector<1x1x1x8x8xf32> to vector<8x8xf32>
    %cst_273 = arith.constant dense<0.000000e+00> : vector<8x256xf32>
    %253 = tpu.matmul %252, %244, %cst_273 {dimension_numbers = #tpu.dot_dimension_numbers<[1], [0], [0], [1], [0, 0, 1, 1], [], []>} : vector<8x8xf32>, vector<8x256xf32>, vector<8x256xf32> -> vector<8x256xf32>
    %254 = arith.addf %250, %253 : vector<8x256xf32>
    %c2_274 = arith.constant 2 : index
    %c0_275 = arith.constant 0 : index
    %c2_276 = arith.constant 2 : index
    %c0_277 = arith.constant 0 : index
    %c0_278 = arith.constant 0 : index
    %255 = vector.load %arg4[%c2_274, %c0_275, %c2_276, %c0_277, %c0_278] : memref<3x3x3x8x8xf32, #tpu.memory_space<vmem>>, vector<1x1x1x8x8xf32>
    %256 = vector.shape_cast %255 : vector<1x1x1x8x8xf32> to vector<8x8xf32>
    %cst_279 = arith.constant dense<0.000000e+00> : vector<8x256xf32>
    %257 = tpu.matmul %256, %247, %cst_279 {dimension_numbers = #tpu.dot_dimension_numbers<[1], [0], [0], [1], [0, 0, 1, 1], [], []>} : vector<8x8xf32>, vector<8x256xf32>, vector<8x256xf32> -> vector<8x256xf32>
    %258 = arith.addf %254, %257 : vector<8x256xf32>
    %c2_280 = arith.constant 2 : index
    %c0_281 = arith.constant 0 : index
    %c0_282 = arith.constant 0 : index
    %c0_283 = arith.constant 0 : index
    %259 = vector.load %arg5[%c2_280, %c0_281, %c0_282, %c0_283] : memref<3x3x8x1xf32, #tpu.memory_space<vmem>>, vector<1x1x8x1xf32>
    %260 = vector.shape_cast %259 : vector<1x1x8x1xf32> to vector<8x1xf32>
    %261 = vector.broadcast %260 : vector<8x1xf32> to vector<8x256xf32>
    %262 = arith.addf %258, %261 : vector<8x256xf32>
    %cst_284 = arith.constant 0.000000e+00 : f32
    %263 = vector.broadcast %cst_284 : f32 to vector<8x256xf32>
    %264 = arith.maximumf %262, %263 : vector<8x256xf32>
    %c2_285 = arith.constant 2 : index
    %c0_286 = arith.constant 0 : index
    %c0_287 = arith.constant 0 : index
    %c0_288 = arith.constant 0 : index
    %265 = vector.load %arg6[%c2_285, %c0_286, %c0_287, %c0_288] : memref<3x3x8x8xf32, #tpu.memory_space<vmem>>, vector<1x1x8x8xf32>
    %266 = vector.shape_cast %265 : vector<1x1x8x8xf32> to vector<8x8xf32>
    %cst_289 = arith.constant dense<0.000000e+00> : vector<8x256xf32>
    %267 = tpu.matmul %266, %264, %cst_289 {dimension_numbers = #tpu.dot_dimension_numbers<[1], [0], [0], [1], [0, 0, 1, 1], [], []>} : vector<8x8xf32>, vector<8x256xf32>, vector<8x256xf32> -> vector<8x256xf32>
    %c2_290 = arith.constant 2 : index
    %c0_291 = arith.constant 0 : index
    %c0_292 = arith.constant 0 : index
    %c0_293 = arith.constant 0 : index
    %268 = vector.load %arg7[%c2_290, %c0_291, %c0_292, %c0_293] : memref<3x3x8x1xf32, #tpu.memory_space<vmem>>, vector<1x1x8x1xf32>
    %269 = vector.shape_cast %268 : vector<1x1x8x1xf32> to vector<8x1xf32>
    %270 = vector.broadcast %269 : vector<8x1xf32> to vector<8x256xf32>
    %271 = arith.addf %267, %270 : vector<8x256xf32>
    %272 = arith.addf %241, %271 : vector<8x256xf32>
    %c2_i32_294 = arith.constant 2 : i32
    %273 = tpu.dynamic_rotate %272 by %c2_i32_294 dim 1 : vector<8x256xf32>, i32 -> vector<8x256xf32>
    %cst_295 = arith.constant 0.000000e+00 : f32
    %274 = vector.broadcast %cst_295 : f32 to vector<8x256xf32>
    %275 = arith.select %4, %273, %274 : vector<8x256xi1>, vector<8x256xf32>
    %c254_i32_296 = arith.constant 254 : i32
    %276 = tpu.dynamic_rotate %272 by %c254_i32_296 dim 1 : vector<8x256xf32>, i32 -> vector<8x256xf32>
    %cst_297 = arith.constant 0.000000e+00 : f32
    %277 = vector.broadcast %cst_297 : f32 to vector<8x256xf32>
    %278 = arith.select %10, %276, %277 : vector<8x256xi1>, vector<8x256xf32>
    %c2_298 = arith.constant 2 : index
    %c1_299 = arith.constant 1 : index
    %c1_300 = arith.constant 1 : index
    %c0_301 = arith.constant 0 : index
    %c0_302 = arith.constant 0 : index
    %279 = vector.load %arg4[%c2_298, %c1_299, %c1_300, %c0_301, %c0_302] : memref<3x3x3x8x8xf32, #tpu.memory_space<vmem>>, vector<1x1x1x8x8xf32>
    %280 = vector.shape_cast %279 : vector<1x1x1x8x8xf32> to vector<8x8xf32>
    %cst_303 = arith.constant dense<0.000000e+00> : vector<8x256xf32>
    %281 = tpu.matmul %280, %272, %cst_303 {dimension_numbers = #tpu.dot_dimension_numbers<[1], [0], [0], [1], [0, 0, 1, 1], [], []>} : vector<8x8xf32>, vector<8x256xf32>, vector<8x256xf32> -> vector<8x256xf32>
    %c2_304 = arith.constant 2 : index
    %c1_305 = arith.constant 1 : index
    %c0_306 = arith.constant 0 : index
    %c0_307 = arith.constant 0 : index
    %c0_308 = arith.constant 0 : index
    %282 = vector.load %arg4[%c2_304, %c1_305, %c0_306, %c0_307, %c0_308] : memref<3x3x3x8x8xf32, #tpu.memory_space<vmem>>, vector<1x1x1x8x8xf32>
    %283 = vector.shape_cast %282 : vector<1x1x1x8x8xf32> to vector<8x8xf32>
    %cst_309 = arith.constant dense<0.000000e+00> : vector<8x256xf32>
    %284 = tpu.matmul %283, %275, %cst_309 {dimension_numbers = #tpu.dot_dimension_numbers<[1], [0], [0], [1], [0, 0, 1, 1], [], []>} : vector<8x8xf32>, vector<8x256xf32>, vector<8x256xf32> -> vector<8x256xf32>
    %285 = arith.addf %281, %284 : vector<8x256xf32>
    %c2_310 = arith.constant 2 : index
    %c1_311 = arith.constant 1 : index
    %c2_312 = arith.constant 2 : index
    %c0_313 = arith.constant 0 : index
    %c0_314 = arith.constant 0 : index
    %286 = vector.load %arg4[%c2_310, %c1_311, %c2_312, %c0_313, %c0_314] : memref<3x3x3x8x8xf32, #tpu.memory_space<vmem>>, vector<1x1x1x8x8xf32>
    %287 = vector.shape_cast %286 : vector<1x1x1x8x8xf32> to vector<8x8xf32>
    %cst_315 = arith.constant dense<0.000000e+00> : vector<8x256xf32>
    %288 = tpu.matmul %287, %278, %cst_315 {dimension_numbers = #tpu.dot_dimension_numbers<[1], [0], [0], [1], [0, 0, 1, 1], [], []>} : vector<8x8xf32>, vector<8x256xf32>, vector<8x256xf32> -> vector<8x256xf32>
    %289 = arith.addf %285, %288 : vector<8x256xf32>
    %c2_316 = arith.constant 2 : index
    %c1_317 = arith.constant 1 : index
    %c0_318 = arith.constant 0 : index
    %c0_319 = arith.constant 0 : index
    %290 = vector.load %arg5[%c2_316, %c1_317, %c0_318, %c0_319] : memref<3x3x8x1xf32, #tpu.memory_space<vmem>>, vector<1x1x8x1xf32>
    %291 = vector.shape_cast %290 : vector<1x1x8x1xf32> to vector<8x1xf32>
    %292 = vector.broadcast %291 : vector<8x1xf32> to vector<8x256xf32>
    %293 = arith.addf %289, %292 : vector<8x256xf32>
    %cst_320 = arith.constant 0.000000e+00 : f32
    %294 = vector.broadcast %cst_320 : f32 to vector<8x256xf32>
    %295 = arith.maximumf %293, %294 : vector<8x256xf32>
    %c2_321 = arith.constant 2 : index
    %c1_322 = arith.constant 1 : index
    %c0_323 = arith.constant 0 : index
    %c0_324 = arith.constant 0 : index
    %296 = vector.load %arg6[%c2_321, %c1_322, %c0_323, %c0_324] : memref<3x3x8x8xf32, #tpu.memory_space<vmem>>, vector<1x1x8x8xf32>
    %297 = vector.shape_cast %296 : vector<1x1x8x8xf32> to vector<8x8xf32>
    %cst_325 = arith.constant dense<0.000000e+00> : vector<8x256xf32>
    %298 = tpu.matmul %297, %295, %cst_325 {dimension_numbers = #tpu.dot_dimension_numbers<[1], [0], [0], [1], [0, 0, 1, 1], [], []>} : vector<8x8xf32>, vector<8x256xf32>, vector<8x256xf32> -> vector<8x256xf32>
    %c2_326 = arith.constant 2 : index
    %c1_327 = arith.constant 1 : index
    %c0_328 = arith.constant 0 : index
    %c0_329 = arith.constant 0 : index
    %299 = vector.load %arg7[%c2_326, %c1_327, %c0_328, %c0_329] : memref<3x3x8x1xf32, #tpu.memory_space<vmem>>, vector<1x1x8x1xf32>
    %300 = vector.shape_cast %299 : vector<1x1x8x1xf32> to vector<8x1xf32>
    %301 = vector.broadcast %300 : vector<8x1xf32> to vector<8x256xf32>
    %302 = arith.addf %298, %301 : vector<8x256xf32>
    %303 = arith.addf %272, %302 : vector<8x256xf32>
    %c4_i32_330 = arith.constant 4 : i32
    %304 = tpu.dynamic_rotate %303 by %c4_i32_330 dim 1 : vector<8x256xf32>, i32 -> vector<8x256xf32>
    %cst_331 = arith.constant 0.000000e+00 : f32
    %305 = vector.broadcast %cst_331 : f32 to vector<8x256xf32>
    %306 = arith.select %6, %304, %305 : vector<8x256xi1>, vector<8x256xf32>
    %c252_i32_332 = arith.constant 252 : i32
    %307 = tpu.dynamic_rotate %303 by %c252_i32_332 dim 1 : vector<8x256xf32>, i32 -> vector<8x256xf32>
    %cst_333 = arith.constant 0.000000e+00 : f32
    %308 = vector.broadcast %cst_333 : f32 to vector<8x256xf32>
    %309 = arith.select %12, %307, %308 : vector<8x256xi1>, vector<8x256xf32>
    %c2_334 = arith.constant 2 : index
    %c2_335 = arith.constant 2 : index
    %c1_336 = arith.constant 1 : index
    %c0_337 = arith.constant 0 : index
    %c0_338 = arith.constant 0 : index
    %310 = vector.load %arg4[%c2_334, %c2_335, %c1_336, %c0_337, %c0_338] : memref<3x3x3x8x8xf32, #tpu.memory_space<vmem>>, vector<1x1x1x8x8xf32>
    %311 = vector.shape_cast %310 : vector<1x1x1x8x8xf32> to vector<8x8xf32>
    %cst_339 = arith.constant dense<0.000000e+00> : vector<8x256xf32>
    %312 = tpu.matmul %311, %303, %cst_339 {dimension_numbers = #tpu.dot_dimension_numbers<[1], [0], [0], [1], [0, 0, 1, 1], [], []>} : vector<8x8xf32>, vector<8x256xf32>, vector<8x256xf32> -> vector<8x256xf32>
    %c2_340 = arith.constant 2 : index
    %c2_341 = arith.constant 2 : index
    %c0_342 = arith.constant 0 : index
    %c0_343 = arith.constant 0 : index
    %c0_344 = arith.constant 0 : index
    %313 = vector.load %arg4[%c2_340, %c2_341, %c0_342, %c0_343, %c0_344] : memref<3x3x3x8x8xf32, #tpu.memory_space<vmem>>, vector<1x1x1x8x8xf32>
    %314 = vector.shape_cast %313 : vector<1x1x1x8x8xf32> to vector<8x8xf32>
    %cst_345 = arith.constant dense<0.000000e+00> : vector<8x256xf32>
    %315 = tpu.matmul %314, %306, %cst_345 {dimension_numbers = #tpu.dot_dimension_numbers<[1], [0], [0], [1], [0, 0, 1, 1], [], []>} : vector<8x8xf32>, vector<8x256xf32>, vector<8x256xf32> -> vector<8x256xf32>
    %316 = arith.addf %312, %315 : vector<8x256xf32>
    %c2_346 = arith.constant 2 : index
    %c2_347 = arith.constant 2 : index
    %c2_348 = arith.constant 2 : index
    %c0_349 = arith.constant 0 : index
    %c0_350 = arith.constant 0 : index
    %317 = vector.load %arg4[%c2_346, %c2_347, %c2_348, %c0_349, %c0_350] : memref<3x3x3x8x8xf32, #tpu.memory_space<vmem>>, vector<1x1x1x8x8xf32>
    %318 = vector.shape_cast %317 : vector<1x1x1x8x8xf32> to vector<8x8xf32>
    %cst_351 = arith.constant dense<0.000000e+00> : vector<8x256xf32>
    %319 = tpu.matmul %318, %309, %cst_351 {dimension_numbers = #tpu.dot_dimension_numbers<[1], [0], [0], [1], [0, 0, 1, 1], [], []>} : vector<8x8xf32>, vector<8x256xf32>, vector<8x256xf32> -> vector<8x256xf32>
    %320 = arith.addf %316, %319 : vector<8x256xf32>
    %c2_352 = arith.constant 2 : index
    %c2_353 = arith.constant 2 : index
    %c0_354 = arith.constant 0 : index
    %c0_355 = arith.constant 0 : index
    %321 = vector.load %arg5[%c2_352, %c2_353, %c0_354, %c0_355] : memref<3x3x8x1xf32, #tpu.memory_space<vmem>>, vector<1x1x8x1xf32>
    %322 = vector.shape_cast %321 : vector<1x1x8x1xf32> to vector<8x1xf32>
    %323 = vector.broadcast %322 : vector<8x1xf32> to vector<8x256xf32>
    %324 = arith.addf %320, %323 : vector<8x256xf32>
    %cst_356 = arith.constant 0.000000e+00 : f32
    %325 = vector.broadcast %cst_356 : f32 to vector<8x256xf32>
    %326 = arith.maximumf %324, %325 : vector<8x256xf32>
    %c2_357 = arith.constant 2 : index
    %c2_358 = arith.constant 2 : index
    %c0_359 = arith.constant 0 : index
    %c0_360 = arith.constant 0 : index
    %327 = vector.load %arg6[%c2_357, %c2_358, %c0_359, %c0_360] : memref<3x3x8x8xf32, #tpu.memory_space<vmem>>, vector<1x1x8x8xf32>
    %328 = vector.shape_cast %327 : vector<1x1x8x8xf32> to vector<8x8xf32>
    %cst_361 = arith.constant dense<0.000000e+00> : vector<8x256xf32>
    %329 = tpu.matmul %328, %326, %cst_361 {dimension_numbers = #tpu.dot_dimension_numbers<[1], [0], [0], [1], [0, 0, 1, 1], [], []>} : vector<8x8xf32>, vector<8x256xf32>, vector<8x256xf32> -> vector<8x256xf32>
    %c2_362 = arith.constant 2 : index
    %c2_363 = arith.constant 2 : index
    %c0_364 = arith.constant 0 : index
    %c0_365 = arith.constant 0 : index
    %330 = vector.load %arg7[%c2_362, %c2_363, %c0_364, %c0_365] : memref<3x3x8x1xf32, #tpu.memory_space<vmem>>, vector<1x1x8x1xf32>
    %331 = vector.shape_cast %330 : vector<1x1x8x1xf32> to vector<8x1xf32>
    %332 = vector.broadcast %331 : vector<8x1xf32> to vector<8x256xf32>
    %333 = arith.addf %329, %332 : vector<8x256xf32>
    %334 = arith.addf %303, %333 : vector<8x256xf32>
    %c2_366 = arith.constant 2 : index
    %c0_367 = arith.constant 0 : index
    %c0_368 = arith.constant 0 : index
    %335 = vector.load %arg8[%c2_366, %c0_367, %c0_368] : memref<3x8x8xf32, #tpu.memory_space<vmem>>, vector<1x8x8xf32>
    %336 = vector.shape_cast %335 : vector<1x8x8xf32> to vector<8x8xf32>
    %cst_369 = arith.constant dense<0.000000e+00> : vector<8x256xf32>
    %337 = tpu.matmul %336, %334, %cst_369 {dimension_numbers = #tpu.dot_dimension_numbers<[1], [0], [0], [1], [0, 0, 1, 1], [], []>} : vector<8x8xf32>, vector<8x256xf32>, vector<8x256xf32> -> vector<8x256xf32>
    %c2_370 = arith.constant 2 : index
    %c0_371 = arith.constant 0 : index
    %c0_372 = arith.constant 0 : index
    %338 = vector.load %arg9[%c2_370, %c0_371, %c0_372] : memref<3x8x1xf32, #tpu.memory_space<vmem>>, vector<1x8x1xf32>
    %339 = vector.shape_cast %338 : vector<1x8x1xf32> to vector<8x1xf32>
    %340 = vector.broadcast %339 : vector<8x1xf32> to vector<8x256xf32>
    %341 = arith.addf %337, %340 : vector<8x256xf32>
    %c2_373 = arith.constant 2 : index
    %c0_374 = arith.constant 0 : index
    %c0_375 = arith.constant 0 : index
    %c0_376 = arith.constant 0 : index
    %342 = vector.load %arg10[%c2_373, %c0_374, %c0_375, %c0_376] : memref<3x2x8x256xf32, #tpu.memory_space<vmem>>, vector<1x1x8x256xf32>
    %343 = vector.shape_cast %342 : vector<1x1x8x256xf32> to vector<8x256xf32>
    %344 = vector.shape_cast %341 : vector<8x256xf32> to vector<1x1x8x256xf32>
    tpu.vector_store %arg10[%c2_373, %c0_374, %c0_375, %c0_376], %344 {strides = array<i32>} : memref<3x2x8x256xf32, #tpu.memory_space<vmem>>, vector<1x1x8x256xf32>,
    %c1_377 = arith.constant 1 : index
    %c0_378 = arith.constant 0 : index
    %c0_379 = arith.constant 0 : index
    %345 = vector.load %arg1[%c1_377, %c0_378, %c0_379] : memref<2x8x256xf32, #tpu.memory_space<vmem>>, vector<1x8x256xf32>
    %346 = vector.shape_cast %345 : vector<1x8x256xf32> to vector<8x256xf32>
    %c0_380 = arith.constant 0 : index
    %c0_381 = arith.constant 0 : index
    %c0_382 = arith.constant 0 : index
    %347 = vector.load %arg2[%c0_380, %c0_381, %c0_382] : memref<3x8x8xf32, #tpu.memory_space<vmem>>, vector<1x8x8xf32>
    %348 = vector.shape_cast %347 : vector<1x8x8xf32> to vector<8x8xf32>
    %cst_383 = arith.constant dense<0.000000e+00> : vector<8x256xf32>
    %349 = tpu.matmul %348, %346, %cst_383 {dimension_numbers = #tpu.dot_dimension_numbers<[1], [0], [0], [1], [0, 0, 1, 1], [], []>} : vector<8x8xf32>, vector<8x256xf32>, vector<8x256xf32> -> vector<8x256xf32>
    %c0_384 = arith.constant 0 : index
    %c0_385 = arith.constant 0 : index
    %c0_386 = arith.constant 0 : index
    %350 = vector.load %arg3[%c0_384, %c0_385, %c0_386] : memref<3x8x1xf32, #tpu.memory_space<vmem>>, vector<1x8x1xf32>
    %351 = vector.shape_cast %350 : vector<1x8x1xf32> to vector<8x1xf32>
    %352 = vector.broadcast %351 : vector<8x1xf32> to vector<8x256xf32>
    %353 = arith.addf %349, %352 : vector<8x256xf32>
    %c1_i32_387 = arith.constant 1 : i32
    %354 = tpu.dynamic_rotate %353 by %c1_i32_387 dim 1 : vector<8x256xf32>, i32 -> vector<8x256xf32>
    %cst_388 = arith.constant 0.000000e+00 : f32
    %355 = vector.broadcast %cst_388 : f32 to vector<8x256xf32>
    %356 = arith.select %2, %354, %355 : vector<8x256xi1>, vector<8x256xf32>
    %c255_i32_389 = arith.constant 255 : i32
    %357 = tpu.dynamic_rotate %353 by %c255_i32_389 dim 1 : vector<8x256xf32>, i32 -> vector<8x256xf32>
    %cst_390 = arith.constant 0.000000e+00 : f32
    %358 = vector.broadcast %cst_390 : f32 to vector<8x256xf32>
    %359 = arith.select %8, %357, %358 : vector<8x256xi1>, vector<8x256xf32>
    %c0_391 = arith.constant 0 : index
    %c0_392 = arith.constant 0 : index
    %c1_393 = arith.constant 1 : index
    %c0_394 = arith.constant 0 : index
    %c0_395 = arith.constant 0 : index
    %360 = vector.load %arg4[%c0_391, %c0_392, %c1_393, %c0_394, %c0_395] : memref<3x3x3x8x8xf32, #tpu.memory_space<vmem>>, vector<1x1x1x8x8xf32>
    %361 = vector.shape_cast %360 : vector<1x1x1x8x8xf32> to vector<8x8xf32>
    %cst_396 = arith.constant dense<0.000000e+00> : vector<8x256xf32>
    %362 = tpu.matmul %361, %353, %cst_396 {dimension_numbers = #tpu.dot_dimension_numbers<[1], [0], [0], [1], [0, 0, 1, 1], [], []>} : vector<8x8xf32>, vector<8x256xf32>, vector<8x256xf32> -> vector<8x256xf32>
    %c0_397 = arith.constant 0 : index
    %c0_398 = arith.constant 0 : index
    %c0_399 = arith.constant 0 : index
    %c0_400 = arith.constant 0 : index
    %c0_401 = arith.constant 0 : index
    %363 = vector.load %arg4[%c0_397, %c0_398, %c0_399, %c0_400, %c0_401] : memref<3x3x3x8x8xf32, #tpu.memory_space<vmem>>, vector<1x1x1x8x8xf32>
    %364 = vector.shape_cast %363 : vector<1x1x1x8x8xf32> to vector<8x8xf32>
    %cst_402 = arith.constant dense<0.000000e+00> : vector<8x256xf32>
    %365 = tpu.matmul %364, %356, %cst_402 {dimension_numbers = #tpu.dot_dimension_numbers<[1], [0], [0], [1], [0, 0, 1, 1], [], []>} : vector<8x8xf32>, vector<8x256xf32>, vector<8x256xf32> -> vector<8x256xf32>
    %366 = arith.addf %362, %365 : vector<8x256xf32>
    %c0_403 = arith.constant 0 : index
    %c0_404 = arith.constant 0 : index
    %c2_405 = arith.constant 2 : index
    %c0_406 = arith.constant 0 : index
    %c0_407 = arith.constant 0 : index
    %367 = vector.load %arg4[%c0_403, %c0_404, %c2_405, %c0_406, %c0_407] : memref<3x3x3x8x8xf32, #tpu.memory_space<vmem>>, vector<1x1x1x8x8xf32>
    %368 = vector.shape_cast %367 : vector<1x1x1x8x8xf32> to vector<8x8xf32>
    %cst_408 = arith.constant dense<0.000000e+00> : vector<8x256xf32>
    %369 = tpu.matmul %368, %359, %cst_408 {dimension_numbers = #tpu.dot_dimension_numbers<[1], [0], [0], [1], [0, 0, 1, 1], [], []>} : vector<8x8xf32>, vector<8x256xf32>, vector<8x256xf32> -> vector<8x256xf32>
    %370 = arith.addf %366, %369 : vector<8x256xf32>
    %c0_409 = arith.constant 0 : index
    %c0_410 = arith.constant 0 : index
    %c0_411 = arith.constant 0 : index
    %c0_412 = arith.constant 0 : index
    %371 = vector.load %arg5[%c0_409, %c0_410, %c0_411, %c0_412] : memref<3x3x8x1xf32, #tpu.memory_space<vmem>>, vector<1x1x8x1xf32>
    %372 = vector.shape_cast %371 : vector<1x1x8x1xf32> to vector<8x1xf32>
    %373 = vector.broadcast %372 : vector<8x1xf32> to vector<8x256xf32>
    %374 = arith.addf %370, %373 : vector<8x256xf32>
    %cst_413 = arith.constant 0.000000e+00 : f32
    %375 = vector.broadcast %cst_413 : f32 to vector<8x256xf32>
    %376 = arith.maximumf %374, %375 : vector<8x256xf32>
    %c0_414 = arith.constant 0 : index
    %c0_415 = arith.constant 0 : index
    %c0_416 = arith.constant 0 : index
    %c0_417 = arith.constant 0 : index
    %377 = vector.load %arg6[%c0_414, %c0_415, %c0_416, %c0_417] : memref<3x3x8x8xf32, #tpu.memory_space<vmem>>, vector<1x1x8x8xf32>
    %378 = vector.shape_cast %377 : vector<1x1x8x8xf32> to vector<8x8xf32>
    %cst_418 = arith.constant dense<0.000000e+00> : vector<8x256xf32>
    %379 = tpu.matmul %378, %376, %cst_418 {dimension_numbers = #tpu.dot_dimension_numbers<[1], [0], [0], [1], [0, 0, 1, 1], [], []>} : vector<8x8xf32>, vector<8x256xf32>, vector<8x256xf32> -> vector<8x256xf32>
    %c0_419 = arith.constant 0 : index
    %c0_420 = arith.constant 0 : index
    %c0_421 = arith.constant 0 : index
    %c0_422 = arith.constant 0 : index
    %380 = vector.load %arg7[%c0_419, %c0_420, %c0_421, %c0_422] : memref<3x3x8x1xf32, #tpu.memory_space<vmem>>, vector<1x1x8x1xf32>
    %381 = vector.shape_cast %380 : vector<1x1x8x1xf32> to vector<8x1xf32>
    %382 = vector.broadcast %381 : vector<8x1xf32> to vector<8x256xf32>
    %383 = arith.addf %379, %382 : vector<8x256xf32>
    %384 = arith.addf %353, %383 : vector<8x256xf32>
    %c2_i32_423 = arith.constant 2 : i32
    %385 = tpu.dynamic_rotate %384 by %c2_i32_423 dim 1 : vector<8x256xf32>, i32 -> vector<8x256xf32>
    %cst_424 = arith.constant 0.000000e+00 : f32
    %386 = vector.broadcast %cst_424 : f32 to vector<8x256xf32>
    %387 = arith.select %4, %385, %386 : vector<8x256xi1>, vector<8x256xf32>
    %c254_i32_425 = arith.constant 254 : i32
    %388 = tpu.dynamic_rotate %384 by %c254_i32_425 dim 1 : vector<8x256xf32>, i32 -> vector<8x256xf32>
    %cst_426 = arith.constant 0.000000e+00 : f32
    %389 = vector.broadcast %cst_426 : f32 to vector<8x256xf32>
    %390 = arith.select %10, %388, %389 : vector<8x256xi1>, vector<8x256xf32>
    %c0_427 = arith.constant 0 : index
    %c1_428 = arith.constant 1 : index
    %c1_429 = arith.constant 1 : index
    %c0_430 = arith.constant 0 : index
    %c0_431 = arith.constant 0 : index
    %391 = vector.load %arg4[%c0_427, %c1_428, %c1_429, %c0_430, %c0_431] : memref<3x3x3x8x8xf32, #tpu.memory_space<vmem>>, vector<1x1x1x8x8xf32>
    %392 = vector.shape_cast %391 : vector<1x1x1x8x8xf32> to vector<8x8xf32>
    %cst_432 = arith.constant dense<0.000000e+00> : vector<8x256xf32>
    %393 = tpu.matmul %392, %384, %cst_432 {dimension_numbers = #tpu.dot_dimension_numbers<[1], [0], [0], [1], [0, 0, 1, 1], [], []>} : vector<8x8xf32>, vector<8x256xf32>, vector<8x256xf32> -> vector<8x256xf32>
    %c0_433 = arith.constant 0 : index
    %c1_434 = arith.constant 1 : index
    %c0_435 = arith.constant 0 : index
    %c0_436 = arith.constant 0 : index
    %c0_437 = arith.constant 0 : index
    %394 = vector.load %arg4[%c0_433, %c1_434, %c0_435, %c0_436, %c0_437] : memref<3x3x3x8x8xf32, #tpu.memory_space<vmem>>, vector<1x1x1x8x8xf32>
    %395 = vector.shape_cast %394 : vector<1x1x1x8x8xf32> to vector<8x8xf32>
    %cst_438 = arith.constant dense<0.000000e+00> : vector<8x256xf32>
    %396 = tpu.matmul %395, %387, %cst_438 {dimension_numbers = #tpu.dot_dimension_numbers<[1], [0], [0], [1], [0, 0, 1, 1], [], []>} : vector<8x8xf32>, vector<8x256xf32>, vector<8x256xf32> -> vector<8x256xf32>
    %397 = arith.addf %393, %396 : vector<8x256xf32>
    %c0_439 = arith.constant 0 : index
    %c1_440 = arith.constant 1 : index
    %c2_441 = arith.constant 2 : index
    %c0_442 = arith.constant 0 : index
    %c0_443 = arith.constant 0 : index
    %398 = vector.load %arg4[%c0_439, %c1_440, %c2_441, %c0_442, %c0_443] : memref<3x3x3x8x8xf32, #tpu.memory_space<vmem>>, vector<1x1x1x8x8xf32>
    %399 = vector.shape_cast %398 : vector<1x1x1x8x8xf32> to vector<8x8xf32>
    %cst_444 = arith.constant dense<0.000000e+00> : vector<8x256xf32>
    %400 = tpu.matmul %399, %390, %cst_444 {dimension_numbers = #tpu.dot_dimension_numbers<[1], [0], [0], [1], [0, 0, 1, 1], [], []>} : vector<8x8xf32>, vector<8x256xf32>, vector<8x256xf32> -> vector<8x256xf32>
    %401 = arith.addf %397, %400 : vector<8x256xf32>
    %c0_445 = arith.constant 0 : index
    %c1_446 = arith.constant 1 : index
    %c0_447 = arith.constant 0 : index
    %c0_448 = arith.constant 0 : index
    %402 = vector.load %arg5[%c0_445, %c1_446, %c0_447, %c0_448] : memref<3x3x8x1xf32, #tpu.memory_space<vmem>>, vector<1x1x8x1xf32>
    %403 = vector.shape_cast %402 : vector<1x1x8x1xf32> to vector<8x1xf32>
    %404 = vector.broadcast %403 : vector<8x1xf32> to vector<8x256xf32>
    %405 = arith.addf %401, %404 : vector<8x256xf32>
    %cst_449 = arith.constant 0.000000e+00 : f32
    %406 = vector.broadcast %cst_449 : f32 to vector<8x256xf32>
    %407 = arith.maximumf %405, %406 : vector<8x256xf32>
    %c0_450 = arith.constant 0 : index
    %c1_451 = arith.constant 1 : index
    %c0_452 = arith.constant 0 : index
    %c0_453 = arith.constant 0 : index
    %408 = vector.load %arg6[%c0_450, %c1_451, %c0_452, %c0_453] : memref<3x3x8x8xf32, #tpu.memory_space<vmem>>, vector<1x1x8x8xf32>
    %409 = vector.shape_cast %408 : vector<1x1x8x8xf32> to vector<8x8xf32>
    %cst_454 = arith.constant dense<0.000000e+00> : vector<8x256xf32>
    %410 = tpu.matmul %409, %407, %cst_454 {dimension_numbers = #tpu.dot_dimension_numbers<[1], [0], [0], [1], [0, 0, 1, 1], [], []>} : vector<8x8xf32>, vector<8x256xf32>, vector<8x256xf32> -> vector<8x256xf32>
    %c0_455 = arith.constant 0 : index
    %c1_456 = arith.constant 1 : index
    %c0_457 = arith.constant 0 : index
    %c0_458 = arith.constant 0 : index
    %411 = vector.load %arg7[%c0_455, %c1_456, %c0_457, %c0_458] : memref<3x3x8x1xf32, #tpu.memory_space<vmem>>, vector<1x1x8x1xf32>
    %412 = vector.shape_cast %411 : vector<1x1x8x1xf32> to vector<8x1xf32>
    %413 = vector.broadcast %412 : vector<8x1xf32> to vector<8x256xf32>
    %414 = arith.addf %410, %413 : vector<8x256xf32>
    %415 = arith.addf %384, %414 : vector<8x256xf32>
    %c4_i32_459 = arith.constant 4 : i32
    %416 = tpu.dynamic_rotate %415 by %c4_i32_459 dim 1 : vector<8x256xf32>, i32 -> vector<8x256xf32>
    %cst_460 = arith.constant 0.000000e+00 : f32
    %417 = vector.broadcast %cst_460 : f32 to vector<8x256xf32>
    %418 = arith.select %6, %416, %417 : vector<8x256xi1>, vector<8x256xf32>
    %c252_i32_461 = arith.constant 252 : i32
    %419 = tpu.dynamic_rotate %415 by %c252_i32_461 dim 1 : vector<8x256xf32>, i32 -> vector<8x256xf32>
    %cst_462 = arith.constant 0.000000e+00 : f32
    %420 = vector.broadcast %cst_462 : f32 to vector<8x256xf32>
    %421 = arith.select %12, %419, %420 : vector<8x256xi1>, vector<8x256xf32>
    %c0_463 = arith.constant 0 : index
    %c2_464 = arith.constant 2 : index
    %c1_465 = arith.constant 1 : index
    %c0_466 = arith.constant 0 : index
    %c0_467 = arith.constant 0 : index
    %422 = vector.load %arg4[%c0_463, %c2_464, %c1_465, %c0_466, %c0_467] : memref<3x3x3x8x8xf32, #tpu.memory_space<vmem>>, vector<1x1x1x8x8xf32>
    %423 = vector.shape_cast %422 : vector<1x1x1x8x8xf32> to vector<8x8xf32>
    %cst_468 = arith.constant dense<0.000000e+00> : vector<8x256xf32>
    %424 = tpu.matmul %423, %415, %cst_468 {dimension_numbers = #tpu.dot_dimension_numbers<[1], [0], [0], [1], [0, 0, 1, 1], [], []>} : vector<8x8xf32>, vector<8x256xf32>, vector<8x256xf32> -> vector<8x256xf32>
    %c0_469 = arith.constant 0 : index
    %c2_470 = arith.constant 2 : index
    %c0_471 = arith.constant 0 : index
    %c0_472 = arith.constant 0 : index
    %c0_473 = arith.constant 0 : index
    %425 = vector.load %arg4[%c0_469, %c2_470, %c0_471, %c0_472, %c0_473] : memref<3x3x3x8x8xf32, #tpu.memory_space<vmem>>, vector<1x1x1x8x8xf32>
    %426 = vector.shape_cast %425 : vector<1x1x1x8x8xf32> to vector<8x8xf32>
    %cst_474 = arith.constant dense<0.000000e+00> : vector<8x256xf32>
    %427 = tpu.matmul %426, %418, %cst_474 {dimension_numbers = #tpu.dot_dimension_numbers<[1], [0], [0], [1], [0, 0, 1, 1], [], []>} : vector<8x8xf32>, vector<8x256xf32>, vector<8x256xf32> -> vector<8x256xf32>
    %428 = arith.addf %424, %427 : vector<8x256xf32>
    %c0_475 = arith.constant 0 : index
    %c2_476 = arith.constant 2 : index
    %c2_477 = arith.constant 2 : index
    %c0_478 = arith.constant 0 : index
    %c0_479 = arith.constant 0 : index
    %429 = vector.load %arg4[%c0_475, %c2_476, %c2_477, %c0_478, %c0_479] : memref<3x3x3x8x8xf32, #tpu.memory_space<vmem>>, vector<1x1x1x8x8xf32>
    %430 = vector.shape_cast %429 : vector<1x1x1x8x8xf32> to vector<8x8xf32>
    %cst_480 = arith.constant dense<0.000000e+00> : vector<8x256xf32>
    %431 = tpu.matmul %430, %421, %cst_480 {dimension_numbers = #tpu.dot_dimension_numbers<[1], [0], [0], [1], [0, 0, 1, 1], [], []>} : vector<8x8xf32>, vector<8x256xf32>, vector<8x256xf32> -> vector<8x256xf32>
    %432 = arith.addf %428, %431 : vector<8x256xf32>
    %c0_481 = arith.constant 0 : index
    %c2_482 = arith.constant 2 : index
    %c0_483 = arith.constant 0 : index
    %c0_484 = arith.constant 0 : index
    %433 = vector.load %arg5[%c0_481, %c2_482, %c0_483, %c0_484] : memref<3x3x8x1xf32, #tpu.memory_space<vmem>>, vector<1x1x8x1xf32>
    %434 = vector.shape_cast %433 : vector<1x1x8x1xf32> to vector<8x1xf32>
    %435 = vector.broadcast %434 : vector<8x1xf32> to vector<8x256xf32>
    %436 = arith.addf %432, %435 : vector<8x256xf32>
    %cst_485 = arith.constant 0.000000e+00 : f32
    %437 = vector.broadcast %cst_485 : f32 to vector<8x256xf32>
    %438 = arith.maximumf %436, %437 : vector<8x256xf32>
    %c0_486 = arith.constant 0 : index
    %c2_487 = arith.constant 2 : index
    %c0_488 = arith.constant 0 : index
    %c0_489 = arith.constant 0 : index
    %439 = vector.load %arg6[%c0_486, %c2_487, %c0_488, %c0_489] : memref<3x3x8x8xf32, #tpu.memory_space<vmem>>, vector<1x1x8x8xf32>
    %440 = vector.shape_cast %439 : vector<1x1x8x8xf32> to vector<8x8xf32>
    %cst_490 = arith.constant dense<0.000000e+00> : vector<8x256xf32>
    %441 = tpu.matmul %440, %438, %cst_490 {dimension_numbers = #tpu.dot_dimension_numbers<[1], [0], [0], [1], [0, 0, 1, 1], [], []>} : vector<8x8xf32>, vector<8x256xf32>, vector<8x256xf32> -> vector<8x256xf32>
    %c0_491 = arith.constant 0 : index
    %c2_492 = arith.constant 2 : index
    %c0_493 = arith.constant 0 : index
    %c0_494 = arith.constant 0 : index
    %442 = vector.load %arg7[%c0_491, %c2_492, %c0_493, %c0_494] : memref<3x3x8x1xf32, #tpu.memory_space<vmem>>, vector<1x1x8x1xf32>
    %443 = vector.shape_cast %442 : vector<1x1x8x1xf32> to vector<8x1xf32>
    %444 = vector.broadcast %443 : vector<8x1xf32> to vector<8x256xf32>
    %445 = arith.addf %441, %444 : vector<8x256xf32>
    %446 = arith.addf %415, %445 : vector<8x256xf32>
    %c0_495 = arith.constant 0 : index
    %c0_496 = arith.constant 0 : index
    %c0_497 = arith.constant 0 : index
    %447 = vector.load %arg8[%c0_495, %c0_496, %c0_497] : memref<3x8x8xf32, #tpu.memory_space<vmem>>, vector<1x8x8xf32>
    %448 = vector.shape_cast %447 : vector<1x8x8xf32> to vector<8x8xf32>
    %cst_498 = arith.constant dense<0.000000e+00> : vector<8x256xf32>
    %449 = tpu.matmul %448, %446, %cst_498 {dimension_numbers = #tpu.dot_dimension_numbers<[1], [0], [0], [1], [0, 0, 1, 1], [], []>} : vector<8x8xf32>, vector<8x256xf32>, vector<8x256xf32> -> vector<8x256xf32>
    %c0_499 = arith.constant 0 : index
    %c0_500 = arith.constant 0 : index
    %c0_501 = arith.constant 0 : index
    %450 = vector.load %arg9[%c0_499, %c0_500, %c0_501] : memref<3x8x1xf32, #tpu.memory_space<vmem>>, vector<1x8x1xf32>
    %451 = vector.shape_cast %450 : vector<1x8x1xf32> to vector<8x1xf32>
    %452 = vector.broadcast %451 : vector<8x1xf32> to vector<8x256xf32>
    %453 = arith.addf %449, %452 : vector<8x256xf32>
    %c0_502 = arith.constant 0 : index
    %c1_503 = arith.constant 1 : index
    %c0_504 = arith.constant 0 : index
    %c0_505 = arith.constant 0 : index
    %454 = vector.load %arg10[%c0_502, %c1_503, %c0_504, %c0_505] : memref<3x2x8x256xf32, #tpu.memory_space<vmem>>, vector<1x1x8x256xf32>
    %455 = vector.shape_cast %454 : vector<1x1x8x256xf32> to vector<8x256xf32>
    %456 = vector.shape_cast %453 : vector<8x256xf32> to vector<1x1x8x256xf32>
    tpu.vector_store %arg10[%c0_502, %c1_503, %c0_504, %c0_505], %456 {strides = array<i32>} : memref<3x2x8x256xf32, #tpu.memory_space<vmem>>, vector<1x1x8x256xf32>,
    %c1_506 = arith.constant 1 : index
    %c0_507 = arith.constant 0 : index
    %c0_508 = arith.constant 0 : index
    %457 = vector.load %arg2[%c1_506, %c0_507, %c0_508] : memref<3x8x8xf32, #tpu.memory_space<vmem>>, vector<1x8x8xf32>
    %458 = vector.shape_cast %457 : vector<1x8x8xf32> to vector<8x8xf32>
    %cst_509 = arith.constant dense<0.000000e+00> : vector<8x256xf32>
    %459 = tpu.matmul %458, %453, %cst_509 {dimension_numbers = #tpu.dot_dimension_numbers<[1], [0], [0], [1], [0, 0, 1, 1], [], []>} : vector<8x8xf32>, vector<8x256xf32>, vector<8x256xf32> -> vector<8x256xf32>
    %c1_510 = arith.constant 1 : index
    %c0_511 = arith.constant 0 : index
    %c0_512 = arith.constant 0 : index
    %460 = vector.load %arg3[%c1_510, %c0_511, %c0_512] : memref<3x8x1xf32, #tpu.memory_space<vmem>>, vector<1x8x1xf32>
    %461 = vector.shape_cast %460 : vector<1x8x1xf32> to vector<8x1xf32>
    %462 = vector.broadcast %461 : vector<8x1xf32> to vector<8x256xf32>
    %463 = arith.addf %459, %462 : vector<8x256xf32>
    %c1_i32_513 = arith.constant 1 : i32
    %464 = tpu.dynamic_rotate %463 by %c1_i32_513 dim 1 : vector<8x256xf32>, i32 -> vector<8x256xf32>
    %cst_514 = arith.constant 0.000000e+00 : f32
    %465 = vector.broadcast %cst_514 : f32 to vector<8x256xf32>
    %466 = arith.select %2, %464, %465 : vector<8x256xi1>, vector<8x256xf32>
    %c255_i32_515 = arith.constant 255 : i32
    %467 = tpu.dynamic_rotate %463 by %c255_i32_515 dim 1 : vector<8x256xf32>, i32 -> vector<8x256xf32>
    %cst_516 = arith.constant 0.000000e+00 : f32
    %468 = vector.broadcast %cst_516 : f32 to vector<8x256xf32>
    %469 = arith.select %8, %467, %468 : vector<8x256xi1>, vector<8x256xf32>
    %c1_517 = arith.constant 1 : index
    %c0_518 = arith.constant 0 : index
    %c1_519 = arith.constant 1 : index
    %c0_520 = arith.constant 0 : index
    %c0_521 = arith.constant 0 : index
    %470 = vector.load %arg4[%c1_517, %c0_518, %c1_519, %c0_520, %c0_521] : memref<3x3x3x8x8xf32, #tpu.memory_space<vmem>>, vector<1x1x1x8x8xf32>
    %471 = vector.shape_cast %470 : vector<1x1x1x8x8xf32> to vector<8x8xf32>
    %cst_522 = arith.constant dense<0.000000e+00> : vector<8x256xf32>
    %472 = tpu.matmul %471, %463, %cst_522 {dimension_numbers = #tpu.dot_dimension_numbers<[1], [0], [0], [1], [0, 0, 1, 1], [], []>} : vector<8x8xf32>, vector<8x256xf32>, vector<8x256xf32> -> vector<8x256xf32>
    %c1_523 = arith.constant 1 : index
    %c0_524 = arith.constant 0 : index
    %c0_525 = arith.constant 0 : index
    %c0_526 = arith.constant 0 : index
    %c0_527 = arith.constant 0 : index
    %473 = vector.load %arg4[%c1_523, %c0_524, %c0_525, %c0_526, %c0_527] : memref<3x3x3x8x8xf32, #tpu.memory_space<vmem>>, vector<1x1x1x8x8xf32>
    %474 = vector.shape_cast %473 : vector<1x1x1x8x8xf32> to vector<8x8xf32>
    %cst_528 = arith.constant dense<0.000000e+00> : vector<8x256xf32>
    %475 = tpu.matmul %474, %466, %cst_528 {dimension_numbers = #tpu.dot_dimension_numbers<[1], [0], [0], [1], [0, 0, 1, 1], [], []>} : vector<8x8xf32>, vector<8x256xf32>, vector<8x256xf32> -> vector<8x256xf32>
    %476 = arith.addf %472, %475 : vector<8x256xf32>
    %c1_529 = arith.constant 1 : index
    %c0_530 = arith.constant 0 : index
    %c2_531 = arith.constant 2 : index
    %c0_532 = arith.constant 0 : index
    %c0_533 = arith.constant 0 : index
    %477 = vector.load %arg4[%c1_529, %c0_530, %c2_531, %c0_532, %c0_533] : memref<3x3x3x8x8xf32, #tpu.memory_space<vmem>>, vector<1x1x1x8x8xf32>
    %478 = vector.shape_cast %477 : vector<1x1x1x8x8xf32> to vector<8x8xf32>
    %cst_534 = arith.constant dense<0.000000e+00> : vector<8x256xf32>
    %479 = tpu.matmul %478, %469, %cst_534 {dimension_numbers = #tpu.dot_dimension_numbers<[1], [0], [0], [1], [0, 0, 1, 1], [], []>} : vector<8x8xf32>, vector<8x256xf32>, vector<8x256xf32> -> vector<8x256xf32>
    %480 = arith.addf %476, %479 : vector<8x256xf32>
    %c1_535 = arith.constant 1 : index
    %c0_536 = arith.constant 0 : index
    %c0_537 = arith.constant 0 : index
    %c0_538 = arith.constant 0 : index
    %481 = vector.load %arg5[%c1_535, %c0_536, %c0_537, %c0_538] : memref<3x3x8x1xf32, #tpu.memory_space<vmem>>, vector<1x1x8x1xf32>
    %482 = vector.shape_cast %481 : vector<1x1x8x1xf32> to vector<8x1xf32>
    %483 = vector.broadcast %482 : vector<8x1xf32> to vector<8x256xf32>
    %484 = arith.addf %480, %483 : vector<8x256xf32>
    %cst_539 = arith.constant 0.000000e+00 : f32
    %485 = vector.broadcast %cst_539 : f32 to vector<8x256xf32>
    %486 = arith.maximumf %484, %485 : vector<8x256xf32>
    %c1_540 = arith.constant 1 : index
    %c0_541 = arith.constant 0 : index
    %c0_542 = arith.constant 0 : index
    %c0_543 = arith.constant 0 : index
    %487 = vector.load %arg6[%c1_540, %c0_541, %c0_542, %c0_543] : memref<3x3x8x8xf32, #tpu.memory_space<vmem>>, vector<1x1x8x8xf32>
    %488 = vector.shape_cast %487 : vector<1x1x8x8xf32> to vector<8x8xf32>
    %cst_544 = arith.constant dense<0.000000e+00> : vector<8x256xf32>
    %489 = tpu.matmul %488, %486, %cst_544 {dimension_numbers = #tpu.dot_dimension_numbers<[1], [0], [0], [1], [0, 0, 1, 1], [], []>} : vector<8x8xf32>, vector<8x256xf32>, vector<8x256xf32> -> vector<8x256xf32>
    %c1_545 = arith.constant 1 : index
    %c0_546 = arith.constant 0 : index
    %c0_547 = arith.constant 0 : index
    %c0_548 = arith.constant 0 : index
    %490 = vector.load %arg7[%c1_545, %c0_546, %c0_547, %c0_548] : memref<3x3x8x1xf32, #tpu.memory_space<vmem>>, vector<1x1x8x1xf32>
    %491 = vector.shape_cast %490 : vector<1x1x8x1xf32> to vector<8x1xf32>
    %492 = vector.broadcast %491 : vector<8x1xf32> to vector<8x256xf32>
    %493 = arith.addf %489, %492 : vector<8x256xf32>
    %494 = arith.addf %463, %493 : vector<8x256xf32>
    %c2_i32_549 = arith.constant 2 : i32
    %495 = tpu.dynamic_rotate %494 by %c2_i32_549 dim 1 : vector<8x256xf32>, i32 -> vector<8x256xf32>
    %cst_550 = arith.constant 0.000000e+00 : f32
    %496 = vector.broadcast %cst_550 : f32 to vector<8x256xf32>
    %497 = arith.select %4, %495, %496 : vector<8x256xi1>, vector<8x256xf32>
    %c254_i32_551 = arith.constant 254 : i32
    %498 = tpu.dynamic_rotate %494 by %c254_i32_551 dim 1 : vector<8x256xf32>, i32 -> vector<8x256xf32>
    %cst_552 = arith.constant 0.000000e+00 : f32
    %499 = vector.broadcast %cst_552 : f32 to vector<8x256xf32>
    %500 = arith.select %10, %498, %499 : vector<8x256xi1>, vector<8x256xf32>
    %c1_553 = arith.constant 1 : index
    %c1_554 = arith.constant 1 : index
    %c1_555 = arith.constant 1 : index
    %c0_556 = arith.constant 0 : index
    %c0_557 = arith.constant 0 : index
    %501 = vector.load %arg4[%c1_553, %c1_554, %c1_555, %c0_556, %c0_557] : memref<3x3x3x8x8xf32, #tpu.memory_space<vmem>>, vector<1x1x1x8x8xf32>
    %502 = vector.shape_cast %501 : vector<1x1x1x8x8xf32> to vector<8x8xf32>
    %cst_558 = arith.constant dense<0.000000e+00> : vector<8x256xf32>
    %503 = tpu.matmul %502, %494, %cst_558 {dimension_numbers = #tpu.dot_dimension_numbers<[1], [0], [0], [1], [0, 0, 1, 1], [], []>} : vector<8x8xf32>, vector<8x256xf32>, vector<8x256xf32> -> vector<8x256xf32>
    %c1_559 = arith.constant 1 : index
    %c1_560 = arith.constant 1 : index
    %c0_561 = arith.constant 0 : index
    %c0_562 = arith.constant 0 : index
    %c0_563 = arith.constant 0 : index
    %504 = vector.load %arg4[%c1_559, %c1_560, %c0_561, %c0_562, %c0_563] : memref<3x3x3x8x8xf32, #tpu.memory_space<vmem>>, vector<1x1x1x8x8xf32>
    %505 = vector.shape_cast %504 : vector<1x1x1x8x8xf32> to vector<8x8xf32>
    %cst_564 = arith.constant dense<0.000000e+00> : vector<8x256xf32>
    %506 = tpu.matmul %505, %497, %cst_564 {dimension_numbers = #tpu.dot_dimension_numbers<[1], [0], [0], [1], [0, 0, 1, 1], [], []>} : vector<8x8xf32>, vector<8x256xf32>, vector<8x256xf32> -> vector<8x256xf32>
    %507 = arith.addf %503, %506 : vector<8x256xf32>
    %c1_565 = arith.constant 1 : index
    %c1_566 = arith.constant 1 : index
    %c2_567 = arith.constant 2 : index
    %c0_568 = arith.constant 0 : index
    %c0_569 = arith.constant 0 : index
    %508 = vector.load %arg4[%c1_565, %c1_566, %c2_567, %c0_568, %c0_569] : memref<3x3x3x8x8xf32, #tpu.memory_space<vmem>>, vector<1x1x1x8x8xf32>
    %509 = vector.shape_cast %508 : vector<1x1x1x8x8xf32> to vector<8x8xf32>
    %cst_570 = arith.constant dense<0.000000e+00> : vector<8x256xf32>
    %510 = tpu.matmul %509, %500, %cst_570 {dimension_numbers = #tpu.dot_dimension_numbers<[1], [0], [0], [1], [0, 0, 1, 1], [], []>} : vector<8x8xf32>, vector<8x256xf32>, vector<8x256xf32> -> vector<8x256xf32>
    %511 = arith.addf %507, %510 : vector<8x256xf32>
    %c1_571 = arith.constant 1 : index
    %c1_572 = arith.constant 1 : index
    %c0_573 = arith.constant 0 : index
    %c0_574 = arith.constant 0 : index
    %512 = vector.load %arg5[%c1_571, %c1_572, %c0_573, %c0_574] : memref<3x3x8x1xf32, #tpu.memory_space<vmem>>, vector<1x1x8x1xf32>
    %513 = vector.shape_cast %512 : vector<1x1x8x1xf32> to vector<8x1xf32>
    %514 = vector.broadcast %513 : vector<8x1xf32> to vector<8x256xf32>
    %515 = arith.addf %511, %514 : vector<8x256xf32>
    %cst_575 = arith.constant 0.000000e+00 : f32
    %516 = vector.broadcast %cst_575 : f32 to vector<8x256xf32>
    %517 = arith.maximumf %515, %516 : vector<8x256xf32>
    %c1_576 = arith.constant 1 : index
    %c1_577 = arith.constant 1 : index
    %c0_578 = arith.constant 0 : index
    %c0_579 = arith.constant 0 : index
    %518 = vector.load %arg6[%c1_576, %c1_577, %c0_578, %c0_579] : memref<3x3x8x8xf32, #tpu.memory_space<vmem>>, vector<1x1x8x8xf32>
    %519 = vector.shape_cast %518 : vector<1x1x8x8xf32> to vector<8x8xf32>
    %cst_580 = arith.constant dense<0.000000e+00> : vector<8x256xf32>
    %520 = tpu.matmul %519, %517, %cst_580 {dimension_numbers = #tpu.dot_dimension_numbers<[1], [0], [0], [1], [0, 0, 1, 1], [], []>} : vector<8x8xf32>, vector<8x256xf32>, vector<8x256xf32> -> vector<8x256xf32>
    %c1_581 = arith.constant 1 : index
    %c1_582 = arith.constant 1 : index
    %c0_583 = arith.constant 0 : index
    %c0_584 = arith.constant 0 : index
    %521 = vector.load %arg7[%c1_581, %c1_582, %c0_583, %c0_584] : memref<3x3x8x1xf32, #tpu.memory_space<vmem>>, vector<1x1x8x1xf32>
    %522 = vector.shape_cast %521 : vector<1x1x8x1xf32> to vector<8x1xf32>
    %523 = vector.broadcast %522 : vector<8x1xf32> to vector<8x256xf32>
    %524 = arith.addf %520, %523 : vector<8x256xf32>
    %525 = arith.addf %494, %524 : vector<8x256xf32>
    %c4_i32_585 = arith.constant 4 : i32
    %526 = tpu.dynamic_rotate %525 by %c4_i32_585 dim 1 : vector<8x256xf32>, i32 -> vector<8x256xf32>
    %cst_586 = arith.constant 0.000000e+00 : f32
    %527 = vector.broadcast %cst_586 : f32 to vector<8x256xf32>
    %528 = arith.select %6, %526, %527 : vector<8x256xi1>, vector<8x256xf32>
    %c252_i32_587 = arith.constant 252 : i32
    %529 = tpu.dynamic_rotate %525 by %c252_i32_587 dim 1 : vector<8x256xf32>, i32 -> vector<8x256xf32>
    %cst_588 = arith.constant 0.000000e+00 : f32
    %530 = vector.broadcast %cst_588 : f32 to vector<8x256xf32>
    %531 = arith.select %12, %529, %530 : vector<8x256xi1>, vector<8x256xf32>
    %c1_589 = arith.constant 1 : index
    %c2_590 = arith.constant 2 : index
    %c1_591 = arith.constant 1 : index
    %c0_592 = arith.constant 0 : index
    %c0_593 = arith.constant 0 : index
    %532 = vector.load %arg4[%c1_589, %c2_590, %c1_591, %c0_592, %c0_593] : memref<3x3x3x8x8xf32, #tpu.memory_space<vmem>>, vector<1x1x1x8x8xf32>
    %533 = vector.shape_cast %532 : vector<1x1x1x8x8xf32> to vector<8x8xf32>
    %cst_594 = arith.constant dense<0.000000e+00> : vector<8x256xf32>
    %534 = tpu.matmul %533, %525, %cst_594 {dimension_numbers = #tpu.dot_dimension_numbers<[1], [0], [0], [1], [0, 0, 1, 1], [], []>} : vector<8x8xf32>, vector<8x256xf32>, vector<8x256xf32> -> vector<8x256xf32>
    %c1_595 = arith.constant 1 : index
    %c2_596 = arith.constant 2 : index
    %c0_597 = arith.constant 0 : index
    %c0_598 = arith.constant 0 : index
    %c0_599 = arith.constant 0 : index
    %535 = vector.load %arg4[%c1_595, %c2_596, %c0_597, %c0_598, %c0_599] : memref<3x3x3x8x8xf32, #tpu.memory_space<vmem>>, vector<1x1x1x8x8xf32>
    %536 = vector.shape_cast %535 : vector<1x1x1x8x8xf32> to vector<8x8xf32>
    %cst_600 = arith.constant dense<0.000000e+00> : vector<8x256xf32>
    %537 = tpu.matmul %536, %528, %cst_600 {dimension_numbers = #tpu.dot_dimension_numbers<[1], [0], [0], [1], [0, 0, 1, 1], [], []>} : vector<8x8xf32>, vector<8x256xf32>, vector<8x256xf32> -> vector<8x256xf32>
    %538 = arith.addf %534, %537 : vector<8x256xf32>
    %c1_601 = arith.constant 1 : index
    %c2_602 = arith.constant 2 : index
    %c2_603 = arith.constant 2 : index
    %c0_604 = arith.constant 0 : index
    %c0_605 = arith.constant 0 : index
    %539 = vector.load %arg4[%c1_601, %c2_602, %c2_603, %c0_604, %c0_605] : memref<3x3x3x8x8xf32, #tpu.memory_space<vmem>>, vector<1x1x1x8x8xf32>
    %540 = vector.shape_cast %539 : vector<1x1x1x8x8xf32> to vector<8x8xf32>
    %cst_606 = arith.constant dense<0.000000e+00> : vector<8x256xf32>
    %541 = tpu.matmul %540, %531, %cst_606 {dimension_numbers = #tpu.dot_dimension_numbers<[1], [0], [0], [1], [0, 0, 1, 1], [], []>} : vector<8x8xf32>, vector<8x256xf32>, vector<8x256xf32> -> vector<8x256xf32>
    %542 = arith.addf %538, %541 : vector<8x256xf32>
    %c1_607 = arith.constant 1 : index
    %c2_608 = arith.constant 2 : index
    %c0_609 = arith.constant 0 : index
    %c0_610 = arith.constant 0 : index
    %543 = vector.load %arg5[%c1_607, %c2_608, %c0_609, %c0_610] : memref<3x3x8x1xf32, #tpu.memory_space<vmem>>, vector<1x1x8x1xf32>
    %544 = vector.shape_cast %543 : vector<1x1x8x1xf32> to vector<8x1xf32>
    %545 = vector.broadcast %544 : vector<8x1xf32> to vector<8x256xf32>
    %546 = arith.addf %542, %545 : vector<8x256xf32>
    %cst_611 = arith.constant 0.000000e+00 : f32
    %547 = vector.broadcast %cst_611 : f32 to vector<8x256xf32>
    %548 = arith.maximumf %546, %547 : vector<8x256xf32>
    %c1_612 = arith.constant 1 : index
    %c2_613 = arith.constant 2 : index
    %c0_614 = arith.constant 0 : index
    %c0_615 = arith.constant 0 : index
    %549 = vector.load %arg6[%c1_612, %c2_613, %c0_614, %c0_615] : memref<3x3x8x8xf32, #tpu.memory_space<vmem>>, vector<1x1x8x8xf32>
    %550 = vector.shape_cast %549 : vector<1x1x8x8xf32> to vector<8x8xf32>
    %cst_616 = arith.constant dense<0.000000e+00> : vector<8x256xf32>
    %551 = tpu.matmul %550, %548, %cst_616 {dimension_numbers = #tpu.dot_dimension_numbers<[1], [0], [0], [1], [0, 0, 1, 1], [], []>} : vector<8x8xf32>, vector<8x256xf32>, vector<8x256xf32> -> vector<8x256xf32>
    %c1_617 = arith.constant 1 : index
    %c2_618 = arith.constant 2 : index
    %c0_619 = arith.constant 0 : index
    %c0_620 = arith.constant 0 : index
    %552 = vector.load %arg7[%c1_617, %c2_618, %c0_619, %c0_620] : memref<3x3x8x1xf32, #tpu.memory_space<vmem>>, vector<1x1x8x1xf32>
    %553 = vector.shape_cast %552 : vector<1x1x8x1xf32> to vector<8x1xf32>
    %554 = vector.broadcast %553 : vector<8x1xf32> to vector<8x256xf32>
    %555 = arith.addf %551, %554 : vector<8x256xf32>
    %556 = arith.addf %525, %555 : vector<8x256xf32>
    %c1_621 = arith.constant 1 : index
    %c0_622 = arith.constant 0 : index
    %c0_623 = arith.constant 0 : index
    %557 = vector.load %arg8[%c1_621, %c0_622, %c0_623] : memref<3x8x8xf32, #tpu.memory_space<vmem>>, vector<1x8x8xf32>
    %558 = vector.shape_cast %557 : vector<1x8x8xf32> to vector<8x8xf32>
    %cst_624 = arith.constant dense<0.000000e+00> : vector<8x256xf32>
    %559 = tpu.matmul %558, %556, %cst_624 {dimension_numbers = #tpu.dot_dimension_numbers<[1], [0], [0], [1], [0, 0, 1, 1], [], []>} : vector<8x8xf32>, vector<8x256xf32>, vector<8x256xf32> -> vector<8x256xf32>
    %c1_625 = arith.constant 1 : index
    %c0_626 = arith.constant 0 : index
    %c0_627 = arith.constant 0 : index
    %560 = vector.load %arg9[%c1_625, %c0_626, %c0_627] : memref<3x8x1xf32, #tpu.memory_space<vmem>>, vector<1x8x1xf32>
    %561 = vector.shape_cast %560 : vector<1x8x1xf32> to vector<8x1xf32>
    %562 = vector.broadcast %561 : vector<8x1xf32> to vector<8x256xf32>
    %563 = arith.addf %559, %562 : vector<8x256xf32>
    %c1_628 = arith.constant 1 : index
    %c1_629 = arith.constant 1 : index
    %c0_630 = arith.constant 0 : index
    %c0_631 = arith.constant 0 : index
    %564 = vector.load %arg10[%c1_628, %c1_629, %c0_630, %c0_631] : memref<3x2x8x256xf32, #tpu.memory_space<vmem>>, vector<1x1x8x256xf32>
    %565 = vector.shape_cast %564 : vector<1x1x8x256xf32> to vector<8x256xf32>
    %566 = vector.shape_cast %563 : vector<8x256xf32> to vector<1x1x8x256xf32>
    tpu.vector_store %arg10[%c1_628, %c1_629, %c0_630, %c0_631], %566 {strides = array<i32>} : memref<3x2x8x256xf32, #tpu.memory_space<vmem>>, vector<1x1x8x256xf32>,
    %c2_632 = arith.constant 2 : index
    %c0_633 = arith.constant 0 : index
    %c0_634 = arith.constant 0 : index
    %567 = vector.load %arg2[%c2_632, %c0_633, %c0_634] : memref<3x8x8xf32, #tpu.memory_space<vmem>>, vector<1x8x8xf32>
    %568 = vector.shape_cast %567 : vector<1x8x8xf32> to vector<8x8xf32>
    %cst_635 = arith.constant dense<0.000000e+00> : vector<8x256xf32>
    %569 = tpu.matmul %568, %563, %cst_635 {dimension_numbers = #tpu.dot_dimension_numbers<[1], [0], [0], [1], [0, 0, 1, 1], [], []>} : vector<8x8xf32>, vector<8x256xf32>, vector<8x256xf32> -> vector<8x256xf32>
    %c2_636 = arith.constant 2 : index
    %c0_637 = arith.constant 0 : index
    %c0_638 = arith.constant 0 : index
    %570 = vector.load %arg3[%c2_636, %c0_637, %c0_638] : memref<3x8x1xf32, #tpu.memory_space<vmem>>, vector<1x8x1xf32>
    %571 = vector.shape_cast %570 : vector<1x8x1xf32> to vector<8x1xf32>
    %572 = vector.broadcast %571 : vector<8x1xf32> to vector<8x256xf32>
    %573 = arith.addf %569, %572 : vector<8x256xf32>
    %c1_i32_639 = arith.constant 1 : i32
    %574 = tpu.dynamic_rotate %573 by %c1_i32_639 dim 1 : vector<8x256xf32>, i32 -> vector<8x256xf32>
    %cst_640 = arith.constant 0.000000e+00 : f32
    %575 = vector.broadcast %cst_640 : f32 to vector<8x256xf32>
    %576 = arith.select %2, %574, %575 : vector<8x256xi1>, vector<8x256xf32>
    %c255_i32_641 = arith.constant 255 : i32
    %577 = tpu.dynamic_rotate %573 by %c255_i32_641 dim 1 : vector<8x256xf32>, i32 -> vector<8x256xf32>
    %cst_642 = arith.constant 0.000000e+00 : f32
    %578 = vector.broadcast %cst_642 : f32 to vector<8x256xf32>
    %579 = arith.select %8, %577, %578 : vector<8x256xi1>, vector<8x256xf32>
    %c2_643 = arith.constant 2 : index
    %c0_644 = arith.constant 0 : index
    %c1_645 = arith.constant 1 : index
    %c0_646 = arith.constant 0 : index
    %c0_647 = arith.constant 0 : index
    %580 = vector.load %arg4[%c2_643, %c0_644, %c1_645, %c0_646, %c0_647] : memref<3x3x3x8x8xf32, #tpu.memory_space<vmem>>, vector<1x1x1x8x8xf32>
    %581 = vector.shape_cast %580 : vector<1x1x1x8x8xf32> to vector<8x8xf32>
    %cst_648 = arith.constant dense<0.000000e+00> : vector<8x256xf32>
    %582 = tpu.matmul %581, %573, %cst_648 {dimension_numbers = #tpu.dot_dimension_numbers<[1], [0], [0], [1], [0, 0, 1, 1], [], []>} : vector<8x8xf32>, vector<8x256xf32>, vector<8x256xf32> -> vector<8x256xf32>
    %c2_649 = arith.constant 2 : index
    %c0_650 = arith.constant 0 : index
    %c0_651 = arith.constant 0 : index
    %c0_652 = arith.constant 0 : index
    %c0_653 = arith.constant 0 : index
    %583 = vector.load %arg4[%c2_649, %c0_650, %c0_651, %c0_652, %c0_653] : memref<3x3x3x8x8xf32, #tpu.memory_space<vmem>>, vector<1x1x1x8x8xf32>
    %584 = vector.shape_cast %583 : vector<1x1x1x8x8xf32> to vector<8x8xf32>
    %cst_654 = arith.constant dense<0.000000e+00> : vector<8x256xf32>
    %585 = tpu.matmul %584, %576, %cst_654 {dimension_numbers = #tpu.dot_dimension_numbers<[1], [0], [0], [1], [0, 0, 1, 1], [], []>} : vector<8x8xf32>, vector<8x256xf32>, vector<8x256xf32> -> vector<8x256xf32>
    %586 = arith.addf %582, %585 : vector<8x256xf32>
    %c2_655 = arith.constant 2 : index
    %c0_656 = arith.constant 0 : index
    %c2_657 = arith.constant 2 : index
    %c0_658 = arith.constant 0 : index
    %c0_659 = arith.constant 0 : index
    %587 = vector.load %arg4[%c2_655, %c0_656, %c2_657, %c0_658, %c0_659] : memref<3x3x3x8x8xf32, #tpu.memory_space<vmem>>, vector<1x1x1x8x8xf32>
    %588 = vector.shape_cast %587 : vector<1x1x1x8x8xf32> to vector<8x8xf32>
    %cst_660 = arith.constant dense<0.000000e+00> : vector<8x256xf32>
    %589 = tpu.matmul %588, %579, %cst_660 {dimension_numbers = #tpu.dot_dimension_numbers<[1], [0], [0], [1], [0, 0, 1, 1], [], []>} : vector<8x8xf32>, vector<8x256xf32>, vector<8x256xf32> -> vector<8x256xf32>
    %590 = arith.addf %586, %589 : vector<8x256xf32>
    %c2_661 = arith.constant 2 : index
    %c0_662 = arith.constant 0 : index
    %c0_663 = arith.constant 0 : index
    %c0_664 = arith.constant 0 : index
    %591 = vector.load %arg5[%c2_661, %c0_662, %c0_663, %c0_664] : memref<3x3x8x1xf32, #tpu.memory_space<vmem>>, vector<1x1x8x1xf32>
    %592 = vector.shape_cast %591 : vector<1x1x8x1xf32> to vector<8x1xf32>
    %593 = vector.broadcast %592 : vector<8x1xf32> to vector<8x256xf32>
    %594 = arith.addf %590, %593 : vector<8x256xf32>
    %cst_665 = arith.constant 0.000000e+00 : f32
    %595 = vector.broadcast %cst_665 : f32 to vector<8x256xf32>
    %596 = arith.maximumf %594, %595 : vector<8x256xf32>
    %c2_666 = arith.constant 2 : index
    %c0_667 = arith.constant 0 : index
    %c0_668 = arith.constant 0 : index
    %c0_669 = arith.constant 0 : index
    %597 = vector.load %arg6[%c2_666, %c0_667, %c0_668, %c0_669] : memref<3x3x8x8xf32, #tpu.memory_space<vmem>>, vector<1x1x8x8xf32>
    %598 = vector.shape_cast %597 : vector<1x1x8x8xf32> to vector<8x8xf32>
    %cst_670 = arith.constant dense<0.000000e+00> : vector<8x256xf32>
    %599 = tpu.matmul %598, %596, %cst_670 {dimension_numbers = #tpu.dot_dimension_numbers<[1], [0], [0], [1], [0, 0, 1, 1], [], []>} : vector<8x8xf32>, vector<8x256xf32>, vector<8x256xf32> -> vector<8x256xf32>
    %c2_671 = arith.constant 2 : index
    %c0_672 = arith.constant 0 : index
    %c0_673 = arith.constant 0 : index
    %c0_674 = arith.constant 0 : index
    %600 = vector.load %arg7[%c2_671, %c0_672, %c0_673, %c0_674] : memref<3x3x8x1xf32, #tpu.memory_space<vmem>>, vector<1x1x8x1xf32>
    %601 = vector.shape_cast %600 : vector<1x1x8x1xf32> to vector<8x1xf32>
    %602 = vector.broadcast %601 : vector<8x1xf32> to vector<8x256xf32>
    %603 = arith.addf %599, %602 : vector<8x256xf32>
    %604 = arith.addf %573, %603 : vector<8x256xf32>
    %c2_i32_675 = arith.constant 2 : i32
    %605 = tpu.dynamic_rotate %604 by %c2_i32_675 dim 1 : vector<8x256xf32>, i32 -> vector<8x256xf32>
    %cst_676 = arith.constant 0.000000e+00 : f32
    %606 = vector.broadcast %cst_676 : f32 to vector<8x256xf32>
    %607 = arith.select %4, %605, %606 : vector<8x256xi1>, vector<8x256xf32>
    %c254_i32_677 = arith.constant 254 : i32
    %608 = tpu.dynamic_rotate %604 by %c254_i32_677 dim 1 : vector<8x256xf32>, i32 -> vector<8x256xf32>
    %cst_678 = arith.constant 0.000000e+00 : f32
    %609 = vector.broadcast %cst_678 : f32 to vector<8x256xf32>
    %610 = arith.select %10, %608, %609 : vector<8x256xi1>, vector<8x256xf32>
    %c2_679 = arith.constant 2 : index
    %c1_680 = arith.constant 1 : index
    %c1_681 = arith.constant 1 : index
    %c0_682 = arith.constant 0 : index
    %c0_683 = arith.constant 0 : index
    %611 = vector.load %arg4[%c2_679, %c1_680, %c1_681, %c0_682, %c0_683] : memref<3x3x3x8x8xf32, #tpu.memory_space<vmem>>, vector<1x1x1x8x8xf32>
    %612 = vector.shape_cast %611 : vector<1x1x1x8x8xf32> to vector<8x8xf32>
    %cst_684 = arith.constant dense<0.000000e+00> : vector<8x256xf32>
    %613 = tpu.matmul %612, %604, %cst_684 {dimension_numbers = #tpu.dot_dimension_numbers<[1], [0], [0], [1], [0, 0, 1, 1], [], []>} : vector<8x8xf32>, vector<8x256xf32>, vector<8x256xf32> -> vector<8x256xf32>
    %c2_685 = arith.constant 2 : index
    %c1_686 = arith.constant 1 : index
    %c0_687 = arith.constant 0 : index
    %c0_688 = arith.constant 0 : index
    %c0_689 = arith.constant 0 : index
    %614 = vector.load %arg4[%c2_685, %c1_686, %c0_687, %c0_688, %c0_689] : memref<3x3x3x8x8xf32, #tpu.memory_space<vmem>>, vector<1x1x1x8x8xf32>
    %615 = vector.shape_cast %614 : vector<1x1x1x8x8xf32> to vector<8x8xf32>
    %cst_690 = arith.constant dense<0.000000e+00> : vector<8x256xf32>
    %616 = tpu.matmul %615, %607, %cst_690 {dimension_numbers = #tpu.dot_dimension_numbers<[1], [0], [0], [1], [0, 0, 1, 1], [], []>} : vector<8x8xf32>, vector<8x256xf32>, vector<8x256xf32> -> vector<8x256xf32>
    %617 = arith.addf %613, %616 : vector<8x256xf32>
    %c2_691 = arith.constant 2 : index
    %c1_692 = arith.constant 1 : index
    %c2_693 = arith.constant 2 : index
    %c0_694 = arith.constant 0 : index
    %c0_695 = arith.constant 0 : index
    %618 = vector.load %arg4[%c2_691, %c1_692, %c2_693, %c0_694, %c0_695] : memref<3x3x3x8x8xf32, #tpu.memory_space<vmem>>, vector<1x1x1x8x8xf32>
    %619 = vector.shape_cast %618 : vector<1x1x1x8x8xf32> to vector<8x8xf32>
    %cst_696 = arith.constant dense<0.000000e+00> : vector<8x256xf32>
    %620 = tpu.matmul %619, %610, %cst_696 {dimension_numbers = #tpu.dot_dimension_numbers<[1], [0], [0], [1], [0, 0, 1, 1], [], []>} : vector<8x8xf32>, vector<8x256xf32>, vector<8x256xf32> -> vector<8x256xf32>
    %621 = arith.addf %617, %620 : vector<8x256xf32>
    %c2_697 = arith.constant 2 : index
    %c1_698 = arith.constant 1 : index
    %c0_699 = arith.constant 0 : index
    %c0_700 = arith.constant 0 : index
    %622 = vector.load %arg5[%c2_697, %c1_698, %c0_699, %c0_700] : memref<3x3x8x1xf32, #tpu.memory_space<vmem>>, vector<1x1x8x1xf32>
    %623 = vector.shape_cast %622 : vector<1x1x8x1xf32> to vector<8x1xf32>
    %624 = vector.broadcast %623 : vector<8x1xf32> to vector<8x256xf32>
    %625 = arith.addf %621, %624 : vector<8x256xf32>
    %cst_701 = arith.constant 0.000000e+00 : f32
    %626 = vector.broadcast %cst_701 : f32 to vector<8x256xf32>
    %627 = arith.maximumf %625, %626 : vector<8x256xf32>
    %c2_702 = arith.constant 2 : index
    %c1_703 = arith.constant 1 : index
    %c0_704 = arith.constant 0 : index
    %c0_705 = arith.constant 0 : index
    %628 = vector.load %arg6[%c2_702, %c1_703, %c0_704, %c0_705] : memref<3x3x8x8xf32, #tpu.memory_space<vmem>>, vector<1x1x8x8xf32>
    %629 = vector.shape_cast %628 : vector<1x1x8x8xf32> to vector<8x8xf32>
    %cst_706 = arith.constant dense<0.000000e+00> : vector<8x256xf32>
    %630 = tpu.matmul %629, %627, %cst_706 {dimension_numbers = #tpu.dot_dimension_numbers<[1], [0], [0], [1], [0, 0, 1, 1], [], []>} : vector<8x8xf32>, vector<8x256xf32>, vector<8x256xf32> -> vector<8x256xf32>
    %c2_707 = arith.constant 2 : index
    %c1_708 = arith.constant 1 : index
    %c0_709 = arith.constant 0 : index
    %c0_710 = arith.constant 0 : index
    %631 = vector.load %arg7[%c2_707, %c1_708, %c0_709, %c0_710] : memref<3x3x8x1xf32, #tpu.memory_space<vmem>>, vector<1x1x8x1xf32>
    %632 = vector.shape_cast %631 : vector<1x1x8x1xf32> to vector<8x1xf32>
    %633 = vector.broadcast %632 : vector<8x1xf32> to vector<8x256xf32>
    %634 = arith.addf %630, %633 : vector<8x256xf32>
    %635 = arith.addf %604, %634 : vector<8x256xf32>
    %c4_i32_711 = arith.constant 4 : i32
    %636 = tpu.dynamic_rotate %635 by %c4_i32_711 dim 1 : vector<8x256xf32>, i32 -> vector<8x256xf32>
    %cst_712 = arith.constant 0.000000e+00 : f32
    %637 = vector.broadcast %cst_712 : f32 to vector<8x256xf32>
    %638 = arith.select %6, %636, %637 : vector<8x256xi1>, vector<8x256xf32>
    %c252_i32_713 = arith.constant 252 : i32
    %639 = tpu.dynamic_rotate %635 by %c252_i32_713 dim 1 : vector<8x256xf32>, i32 -> vector<8x256xf32>
    %cst_714 = arith.constant 0.000000e+00 : f32
    %640 = vector.broadcast %cst_714 : f32 to vector<8x256xf32>
    %641 = arith.select %12, %639, %640 : vector<8x256xi1>, vector<8x256xf32>
    %c2_715 = arith.constant 2 : index
    %c2_716 = arith.constant 2 : index
    %c1_717 = arith.constant 1 : index
    %c0_718 = arith.constant 0 : index
    %c0_719 = arith.constant 0 : index
    %642 = vector.load %arg4[%c2_715, %c2_716, %c1_717, %c0_718, %c0_719] : memref<3x3x3x8x8xf32, #tpu.memory_space<vmem>>, vector<1x1x1x8x8xf32>
    %643 = vector.shape_cast %642 : vector<1x1x1x8x8xf32> to vector<8x8xf32>
    %cst_720 = arith.constant dense<0.000000e+00> : vector<8x256xf32>
    %644 = tpu.matmul %643, %635, %cst_720 {dimension_numbers = #tpu.dot_dimension_numbers<[1], [0], [0], [1], [0, 0, 1, 1], [], []>} : vector<8x8xf32>, vector<8x256xf32>, vector<8x256xf32> -> vector<8x256xf32>
    %c2_721 = arith.constant 2 : index
    %c2_722 = arith.constant 2 : index
    %c0_723 = arith.constant 0 : index
    %c0_724 = arith.constant 0 : index
    %c0_725 = arith.constant 0 : index
    %645 = vector.load %arg4[%c2_721, %c2_722, %c0_723, %c0_724, %c0_725] : memref<3x3x3x8x8xf32, #tpu.memory_space<vmem>>, vector<1x1x1x8x8xf32>
    %646 = vector.shape_cast %645 : vector<1x1x1x8x8xf32> to vector<8x8xf32>
    %cst_726 = arith.constant dense<0.000000e+00> : vector<8x256xf32>
    %647 = tpu.matmul %646, %638, %cst_726 {dimension_numbers = #tpu.dot_dimension_numbers<[1], [0], [0], [1], [0, 0, 1, 1], [], []>} : vector<8x8xf32>, vector<8x256xf32>, vector<8x256xf32> -> vector<8x256xf32>
    %648 = arith.addf %644, %647 : vector<8x256xf32>
    %c2_727 = arith.constant 2 : index
    %c2_728 = arith.constant 2 : index
    %c2_729 = arith.constant 2 : index
    %c0_730 = arith.constant 0 : index
    %c0_731 = arith.constant 0 : index
    %649 = vector.load %arg4[%c2_727, %c2_728, %c2_729, %c0_730, %c0_731] : memref<3x3x3x8x8xf32, #tpu.memory_space<vmem>>, vector<1x1x1x8x8xf32>
    %650 = vector.shape_cast %649 : vector<1x1x1x8x8xf32> to vector<8x8xf32>
    %cst_732 = arith.constant dense<0.000000e+00> : vector<8x256xf32>
    %651 = tpu.matmul %650, %641, %cst_732 {dimension_numbers = #tpu.dot_dimension_numbers<[1], [0], [0], [1], [0, 0, 1, 1], [], []>} : vector<8x8xf32>, vector<8x256xf32>, vector<8x256xf32> -> vector<8x256xf32>
    %652 = arith.addf %648, %651 : vector<8x256xf32>
    %c2_733 = arith.constant 2 : index
    %c2_734 = arith.constant 2 : index
    %c0_735 = arith.constant 0 : index
    %c0_736 = arith.constant 0 : index
    %653 = vector.load %arg5[%c2_733, %c2_734, %c0_735, %c0_736] : memref<3x3x8x1xf32, #tpu.memory_space<vmem>>, vector<1x1x8x1xf32>
    %654 = vector.shape_cast %653 : vector<1x1x8x1xf32> to vector<8x1xf32>
    %655 = vector.broadcast %654 : vector<8x1xf32> to vector<8x256xf32>
    %656 = arith.addf %652, %655 : vector<8x256xf32>
    %cst_737 = arith.constant 0.000000e+00 : f32
    %657 = vector.broadcast %cst_737 : f32 to vector<8x256xf32>
    %658 = arith.maximumf %656, %657 : vector<8x256xf32>
    %c2_738 = arith.constant 2 : index
    %c2_739 = arith.constant 2 : index
    %c0_740 = arith.constant 0 : index
    %c0_741 = arith.constant 0 : index
    %659 = vector.load %arg6[%c2_738, %c2_739, %c0_740, %c0_741] : memref<3x3x8x8xf32, #tpu.memory_space<vmem>>, vector<1x1x8x8xf32>
    %660 = vector.shape_cast %659 : vector<1x1x8x8xf32> to vector<8x8xf32>
    %cst_742 = arith.constant dense<0.000000e+00> : vector<8x256xf32>
    %661 = tpu.matmul %660, %658, %cst_742 {dimension_numbers = #tpu.dot_dimension_numbers<[1], [0], [0], [1], [0, 0, 1, 1], [], []>} : vector<8x8xf32>, vector<8x256xf32>, vector<8x256xf32> -> vector<8x256xf32>
    %c2_743 = arith.constant 2 : index
    %c2_744 = arith.constant 2 : index
    %c0_745 = arith.constant 0 : index
    %c0_746 = arith.constant 0 : index
    %662 = vector.load %arg7[%c2_743, %c2_744, %c0_745, %c0_746] : memref<3x3x8x1xf32, #tpu.memory_space<vmem>>, vector<1x1x8x1xf32>
    %663 = vector.shape_cast %662 : vector<1x1x8x1xf32> to vector<8x1xf32>
    %664 = vector.broadcast %663 : vector<8x1xf32> to vector<8x256xf32>
    %665 = arith.addf %661, %664 : vector<8x256xf32>
    %666 = arith.addf %635, %665 : vector<8x256xf32>
    %c2_747 = arith.constant 2 : index
    %c0_748 = arith.constant 0 : index
    %c0_749 = arith.constant 0 : index
    %667 = vector.load %arg8[%c2_747, %c0_748, %c0_749] : memref<3x8x8xf32, #tpu.memory_space<vmem>>, vector<1x8x8xf32>
    %668 = vector.shape_cast %667 : vector<1x8x8xf32> to vector<8x8xf32>
    %cst_750 = arith.constant dense<0.000000e+00> : vector<8x256xf32>
    %669 = tpu.matmul %668, %666, %cst_750 {dimension_numbers = #tpu.dot_dimension_numbers<[1], [0], [0], [1], [0, 0, 1, 1], [], []>} : vector<8x8xf32>, vector<8x256xf32>, vector<8x256xf32> -> vector<8x256xf32>
    %c2_751 = arith.constant 2 : index
    %c0_752 = arith.constant 0 : index
    %c0_753 = arith.constant 0 : index
    %670 = vector.load %arg9[%c2_751, %c0_752, %c0_753] : memref<3x8x1xf32, #tpu.memory_space<vmem>>, vector<1x8x1xf32>
    %671 = vector.shape_cast %670 : vector<1x8x1xf32> to vector<8x1xf32>
    %672 = vector.broadcast %671 : vector<8x1xf32> to vector<8x256xf32>
    %673 = arith.addf %669, %672 : vector<8x256xf32>
    %c2_754 = arith.constant 2 : index
    %c1_755 = arith.constant 1 : index
    %c0_756 = arith.constant 0 : index
    %c0_757 = arith.constant 0 : index
    %674 = vector.load %arg10[%c2_754, %c1_755, %c0_756, %c0_757] : memref<3x2x8x256xf32, #tpu.memory_space<vmem>>, vector<1x1x8x256xf32>
    %675 = vector.shape_cast %674 : vector<1x1x8x256xf32> to vector<8x256xf32>
    %676 = vector.shape_cast %673 : vector<8x256xf32> to vector<1x1x8x256xf32>
    tpu.vector_store %arg10[%c2_754, %c1_755, %c0_756, %c0_757], %676 {strides = array<i32>} : memref<3x2x8x256xf32, #tpu.memory_space<vmem>>, vector<1x1x8x256xf32>,
    return
  }
  func.func @transform_0(%arg0: i32) -> (i32, i32, i32) {
    %c0_i32 = arith.constant 0 : i32
    %c0_i32_0 = arith.constant 0 : i32
    %c0_i32_1 = arith.constant 0 : i32
    return %arg0, %c0_i32, %c0_i32_0 : i32, i32, i32
  }
  func.func @transform_1(%arg0: i32) -> (i32, i32, i32) {
    %c0_i32 = arith.constant 0 : i32
    %c0_i32_0 = arith.constant 0 : i32
    %c0_i32_1 = arith.constant 0 : i32
    %c0_i32_2 = arith.constant 0 : i32
    return %c0_i32, %c0_i32_0, %c0_i32_1 : i32, i32, i32
  }
  func.func @transform_2(%arg0: i32) -> (i32, i32, i32) {
    %c0_i32 = arith.constant 0 : i32
    %c0_i32_0 = arith.constant 0 : i32
    %c0_i32_1 = arith.constant 0 : i32
    %c0_i32_2 = arith.constant 0 : i32
    return %c0_i32, %c0_i32_0, %c0_i32_1 : i32, i32, i32
  }
  func.func @transform_3(%arg0: i32) -> (i32, i32, i32, i32, i32) {
    %c0_i32 = arith.constant 0 : i32
    %c0_i32_0 = arith.constant 0 : i32
    %c0_i32_1 = arith.constant 0 : i32
    %c0_i32_2 = arith.constant 0 : i32
    %c0_i32_3 = arith.constant 0 : i32
    %c0_i32_4 = arith.constant 0 : i32
    return %c0_i32, %c0_i32_0, %c0_i32_1, %c0_i32_2, %c0_i32_3 : i32, i32, i32, i32, i32
  }
  func.func @transform_4(%arg0: i32) -> (i32, i32, i32, i32) {
    %c0_i32 = arith.constant 0 : i32
    %c0_i32_0 = arith.constant 0 : i32
    %c0_i32_1 = arith.constant 0 : i32
    %c0_i32_2 = arith.constant 0 : i32
    %c0_i32_3 = arith.constant 0 : i32
    return %c0_i32, %c0_i32_0, %c0_i32_1, %c0_i32_2 : i32, i32, i32, i32
  }
  func.func @transform_5(%arg0: i32) -> (i32, i32, i32, i32) {
    %c0_i32 = arith.constant 0 : i32
    %c0_i32_0 = arith.constant 0 : i32
    %c0_i32_1 = arith.constant 0 : i32
    %c0_i32_2 = arith.constant 0 : i32
    %c0_i32_3 = arith.constant 0 : i32
    return %c0_i32, %c0_i32_0, %c0_i32_1, %c0_i32_2 : i32, i32, i32, i32
  }
  func.func @transform_6(%arg0: i32) -> (i32, i32, i32, i32) {
    %c0_i32 = arith.constant 0 : i32
    %c0_i32_0 = arith.constant 0 : i32
    %c0_i32_1 = arith.constant 0 : i32
    %c0_i32_2 = arith.constant 0 : i32
    %c0_i32_3 = arith.constant 0 : i32
    return %c0_i32, %c0_i32_0, %c0_i32_1, %c0_i32_2 : i32, i32, i32, i32
  }
  func.func @transform_7(%arg0: i32) -> (i32, i32, i32) {
    %c0_i32 = arith.constant 0 : i32
    %c0_i32_0 = arith.constant 0 : i32
    %c0_i32_1 = arith.constant 0 : i32
    %c0_i32_2 = arith.constant 0 : i32
    return %c0_i32, %c0_i32_0, %c0_i32_1 : i32, i32, i32
  }
  func.func @transform_8(%arg0: i32) -> (i32, i32, i32) {
    %c0_i32 = arith.constant 0 : i32
    %c0_i32_0 = arith.constant 0 : i32
    %c0_i32_1 = arith.constant 0 : i32
    %c0_i32_2 = arith.constant 0 : i32
    return %c0_i32, %c0_i32_0, %c0_i32_1 : i32, i32, i32
  }
  func.func @transform_9(%arg0: i32) -> (i32, i32, i32, i32) {
    %c0_i32 = arith.constant 0 : i32
    %c0_i32_0 = arith.constant 0 : i32
    %c0_i32_1 = arith.constant 0 : i32
    %c0_i32_2 = arith.constant 0 : i32
    return %c0_i32, %arg0, %c0_i32_0, %c0_i32_1 : i32, i32, i32, i32
  }
}

</mosaic_0001>

<bundles_post_ra>
// kernel: tpu_custom_call.1
= control target key start
LH: loop header
LB: loop body
LE: loop exit
PB: predicated region body
PF: predicated region fallthrough
CT: control target
= control target key end

     0   :  { %14 = vsyncpa [#allocation3], 0  ;;  %s8537_s0 = inlined_call_operand.hbm [shape: f32[2,8,256], index: 0, kind: input, shape index: {}]   ;;  %s8538_s1 = inlined_call_operand.hbm [shape: f32[3,8,8], index: 1, kind: input, shape index: {}]   ;;  %s8539_s2 = inlined_call_operand.vmem [shape: f32[3,8,1], index: 2, kind: input, shape index: {}]   ;;  %s8540_s3 = inlined_call_operand.vmem [shape: f32[3,3,3,8,8], index: 3, kind: input, shape index: {}]   ;;  %s8541_s4 = inlined_call_operand.vmem [shape: f32[3,3,8,1], index: 4, kind: input, shape index: {}]   ;;  %s8542_s5 = inlined_call_operand.hbm [shape: f32[3,3,8,8], index: 5, kind: input, shape index: {}]   ;;  %s8543_s6 = inlined_call_operand.vmem [shape: f32[3,3,8,1], index: 6, kind: input, shape index: {}]   ;;  %s8544_s7 = inlined_call_operand.hbm [shape: f32[3,8,8], index: 7, kind: input, shape index: {}]   ;;  %s8545_s8 = inlined_call_operand.vmem [shape: f32[3,8,1], index: 8, kind: input, shape index: {}]   ;;  %s8546_s9 = inlined_call_operand.hbm [shape: f32[3,2,8,256], index: 9, kind: output, shape index: {}]  }
   0x1   :  { %15 = vsyncpa [#allocation6], 0 }
   0x2   :  { %16 = vsyncpa [#allocation9], 0 }
   0x3   :  { %17 = vsyncpa [#allocation4], 0  ;;  %s7568_s30 = smov [#allocation5]  }
   0x4   :  { %s35_s10 = sshll.u32 %s7568_s30, 4  ;;  %s36_s10 = int_to_ptr.vmem [resolvable:$true] %s35_s10 }
   0x5   :  { %s7468_s11 = scalar_lea.vmem %s36_s10, 384  ;;  %p7473_p1 = scmp.lt.s32.totalorder %s36_s10, %s36_s10 }
   0x6   :  { %p7469_p0 = scmp.ne.s32.totalorder %s36_s10, %s7468_s11  ;;  %p7474_p2 = scmp.lt.s32.totalorder %s7468_s11, %s7468_s11 }
   0x8   :  { %p7475_p3 = por %p7474_p2, %p7473_p1 }
   0xa   :  { %p7476_p4 = pnand %p7475_p3, %p7469_p0 }
   0xc   :  { %7479 = shalt.err (!%p7476_p4)
}
   0xd   :  { %s7569_s12 = smov 128   ;;  %s7570_s13 = smov 8  }
   0xe   :  { %41 = dma.hbm_to_vmem [thread:$0]  %s8538_s1, 384, %s36_s10, [#allocation6], %s7569_s12, %s7569_s12, %s7570_s13  }
   0xf   :  { %s7571_s16 = smov [#allocation2]  }
  0x10   :  { %s23_s17 = sshll.u32 %s7571_s16, 4  ;;  %s24_s17 = int_to_ptr.vmem [resolvable:$true] %s23_s17 }
  0x11   :  { %s7488_s18 = scalar_lea.vmem %s24_s17, 512  ;;  %p7493_p6 = scmp.lt.s32.totalorder %s24_s17, %s24_s17 }
  0x12   :  { %p7489_p5 = scmp.ne.s32.totalorder %s24_s17, %s7488_s18  ;;  %p7494_p7 = scmp.lt.s32.totalorder %s7488_s18, %s7488_s18 }
  0x14   :  { %p7495_p8 = por %p7494_p7, %p7493_p6 }
  0x16   :  { %p7496_p9 = pnand %p7495_p8, %p7489_p5 }
  0x18   :  { %7499 = shalt.err (!%p7496_p9)
}
  0x19   :  { %s7572_s19 = smov 256   ;;  %s7573_s20 = smov 16  }
  0x1a   :  { %29 = dma.hbm_to_vmem [thread:$0]  %s8537_s0, 512, %s24_s17, [#allocation3], %s7572_s19, %s7572_s19, %s7573_s20  }
  0x1b   :  { %s7574_s1 = smov [#allocation7]   ;;  %s7575_s24 = smov [#allocation8]  }
  0x1c   :  { %s53_s23 = sshll.u32 %s7574_s1, 4  ;;  %s67_s25 = sshll.u32 %s7575_s24, 4  ;;  %s54_s23 = int_to_ptr.vmem [resolvable:$true] %s53_s23  ;;  %s68_s25 = int_to_ptr.vmem [resolvable:$true] %s67_s25 }
  0x1d   :  { %s7508_s26 = scalar_lea.vmem %s54_s23, 1152  ;;  %p7513_p11 = scmp.lt.s32.totalorder %s54_s23, %s54_s23 }
  0x1e   :  { %p7509_p10 = scmp.ne.s32.totalorder %s54_s23, %s7508_s26  ;;  %p7514_p12 = scmp.lt.s32.totalorder %s7508_s26, %s7508_s26 }
  0x20   :  { %p7515_p13 = por %p7514_p12, %p7513_p11 }
  0x22   :  { %p7516_p0 = pnand %p7515_p13, %p7509_p10 }
  0x24   :  { %7519 = shalt.err (!%p7516_p0)
}
  0x25   :  { %59 = dma.hbm_to_vmem [thread:$0]  %s8542_s5, 1152, %s54_s23, [#allocation6], %s7569_s12, %s7569_s12, %s7570_s13  }
  0x26   :  { %s7528_s0 = scalar_lea.vmem %s68_s25, 384  ;;  %p7533_p2 = scmp.lt.s32.totalorder %s68_s25, %s68_s25 }
  0x27   :  { %p7529_p1 = scmp.ne.s32.totalorder %s68_s25, %s7528_s0  ;;  %p7534_p3 = scmp.lt.s32.totalorder %s7528_s0, %s7528_s0 }
  0x29   :  { %p7535_p4 = por %p7534_p3, %p7533_p2 }
  0x2b   :  { %p7536_p5 = pnand %p7535_p4, %p7529_p1 }
  0x2d   :  { %7539 = shalt.err (!%p7536_p5)
}
  0x2e   :  { %73 = dma.hbm_to_vmem [thread:$0]  %s8544_s7, 384, %s68_s25, [#allocation9], %s7569_s12, %s7569_s12, %s7570_s13  }
  0x2f   :  { %7560 = dma.done.wait [#allocation3], 512  }
  0x30   :  { %7561 = vsyncadd [#allocation3], 4294966784 }
  0x31   :  { %7562 = dma.done.wait [#allocation6], 1536  }
  0x32   :  { %7563 = vsyncadd [#allocation6], 4294965760 }
  0x33   :  { %7564 = dma.done.wait [#allocation9], 384  }
  0x34   :  { %7565 = vsyncadd [#allocation9], 4294966912  ;;  %v7576_v0 = vmov 0.0   ;;  %v7577_v1 = vmov 0   ;;  %v104_v2 = vld [vmem:[#allocation2 + $0x8] sm:$0xff]  ;;  %v103_v3 = vld [vmem:[#allocation2] sm:$0xff]  ;;  %v88_v14 = vlaneseq }
  0x35   :  { %180 = vmatprep.mubr.f32.mxu0 %v7576_v0  ;;  %7458 = vset.pattern.permute.xlu0 %v7577_v1  ;;  %v105_v4 = vld [vmem:[#allocation5] sm:$0xff]  ;;  %vm112_vm0 = vcmask 64512   ;;  %s7578_s10 = smov 1   ;;  %v7230_v11 = vld [vmem:[%s8540_s3 + $0x8] sm:$0xff]  ;;  %s7579_s13 = smov 127   ;;  %v7234_v26 = vld [vmem:[%s8540_s3 + $0x10] sm:$0xff] }
  0x36   :  { %275 = vmatprep.mubr.f32.mxu1 %v7576_v0  ;;  %7459 = vset.pattern.permute.xlu1 %v7577_v1  ;;  %v106_v5 = vld [vmem:[%s8539_s2] sm:$0xff]  ;;  %v7691_v15 = vand.u32 127, %v88_v14  ;;  %v444_v42 = vld [vmem:[#allocation7] sm:$0xff]  ;;  %s7580_s23 = smov 2   ;;  %s7581_s26 = smov 126   ;;  %v7246_v51 = vld [vmem:[%s8541_s4 + $0x8] sm:$0xff] }
  0x37   :  { %146 = vmatprep.subr.mxu0 %v104_v2  ;;  %109 = vperm.xlu0 %7458, %v106_v5   ;;  %v445_v12 = vld [vmem:[%s8543_s6] sm:$0xff]  ;;  %v7247_v52 = vld [vmem:[%s8543_s6 + $0x8] sm:$0xff]  ;;  %v7239_v57 = vld [vmem:[%s8540_s3 + $0x18] sm:$0xff]  ;;  %s7582_s12 = smov 4   ;;  %s7583_s16 = smov 124  }
  0x38   :  { %147 = vmatpush1.msra.mxu0 %v103_v3  ;;  %v434_v13 = vld [vmem:[%s8541_s4] sm:$0xff]  ;;  %vm191_vm1 = vcmp.lt.s32.totalorder %v7691_v15, 1  ;;  %v7695_v17 = vadd.s32 128, %v7691_v15  ;;  %vm91_vm2 = vcmp.ge.s32.totalorder %v7691_v15, 1  ;;  %vm200_vm3 = vcmp.lt.s32.totalorder %v7691_v15, 127  ;;  %v7243_v62 = vld [vmem:[%s8540_s3 + $0x28] sm:$0xff] }
  0x39   :  { %7229 = vmatmul.mubr.msk.f32.vlgmr.msra.gmra.mxu0 %vm112_vm0, %v105_v4  ;;  %v207_v21 = vld [vmem:[%s8540_s3] sm:$0xff]  ;;  %vm531_vm5 = vcmp.lt.s32.totalorder %v7691_v15, 2  ;;  %vm93_vm6 = vcmp.ge.s32.totalorder %v7691_v15, 2  ;;  %vm540_vm7 = vcmp.lt.s32.totalorder %v7691_v15, 126  ;;  %vm875_vm9 = vcmp.lt.s32.totalorder %v7691_v15, 4 }
  0x3a   :  { %349 = vmatprep.mubr.f32.mxu0 %v7576_v0  ;;  %vm98_vm4 = vcmp.lt.s32.totalorder %v7695_v17, 255  ;;  %v7238_v50 = vld [vmem:[%s8540_s3 + $0x20] sm:$0xff]  ;;  %vm100_vm8 = vcmp.lt.s32.totalorder %v7695_v17, 254  ;;  %vm95_vm10 = vcmp.ge.s32.totalorder %v7691_v15, 4  ;;  %vm884_vm11 = vcmp.lt.s32.totalorder %v7691_v15, 124 }
  0x3b   :  { %vm102_vm12 = vcmp.lt.s32.totalorder %v7695_v17, 252 }
  0xb2   :  { %v110_v6 = vpop.permute.xlu0 %109 }
  0xf9   :  { %v182_v7 = vpop.f32.mrf.mxu0 }
  0xfa   :  { %v7666_v8 = vadd.f32 %v182_v7, %v110_v6 }
  0xfb   :  { %v184_v9 = vpop.f32.mrf.mxu0 }
  0xfc   :  { %v7668_v10 = vadd.f32 %v184_v9, %v110_v6  ;;  %187 = vrot.lane.b32.xlu0 %v7666_v8, %s7578_s10 }
  0xfe   :  { %189 = vrot.lane.b32.xlu1 %v7668_v10, %s7578_s10  ;;  %315 = vmatprep.subr.mxu0 %v7668_v10 }
  0xff   :  { %316 = vmatpush1.msra.mxu0 %v7666_v8 }
 0x100   :  { %198 = vrot.lane.b32.xlu0 %v7668_v10, %s7579_s13  ;;  %7233 = vmatmul.mubr.msk.f32.vlgmr.msra.gmra.mxu0 %vm112_vm0, %v7230_v11 }
 0x101   :  { %518 = vmatprep.mubr.f32.mxu0 %v7576_v0 }
 0x102   :  { %196 = vrot.lane.b32.xlu1 %v7666_v8, %s7579_s13 }
 0x104   :  { %448 = vperm.xlu0 %7458, %v445_v12  }
 0x106   :  { %437 = vperm.xlu1 %7459, %v434_v13  }
 0x16e   :  { %v188_v16 = vpop.permute.xlu0 %187 }
 0x170   :  { %v190_v18 = vpop.permute.xlu1 %189 }
 0x171   :  { %v192_v19 = vsel %vm191_vm1, %v188_v16, %v190_v18  ;;  %v193_v20 = vsel %vm191_vm1, %v190_v18, %v188_v16  ;;  %v787_v16 = vld [vmem:[#allocation7 + $0x8] sm:$0xff] }
 0x172   :  { %241 = vmatprep.subr.mxu1 %v192_v19  ;;  %v199_v22 = vpop.permute.xlu0 %198 }
 0x173   :  { %7231 = vmatpush1.msk.msra.mxu1 %vm91_vm2, %v193_v20 }
 0x174   :  { %v197_v23 = vpop.permute.xlu1 %196  ;;  %7232 = vmatmul.mubr.msk.f32.vlgmr.msra.gmra.mxu1 %vm112_vm0, %v207_v21 }
 0x175   :  { %v202_v24 = vsel %vm200_vm3, %v199_v22, %v197_v23  ;;  %v201_v25 = vsel %vm200_vm3, %v197_v23, %v199_v22  ;;  %425 = vmatprep.mubr.f32.mxu1 %v7576_v0 }
 0x176   :  { %7235 = vmatprep.subr.msk.mxu1 %vm98_vm4, %v202_v24 }
 0x177   :  { %392 = vmatpush1.msra.mxu1 %v201_v25  ;;  %v7249_v25 = vld [vmem:[%s8540_s3 + $0x38] sm:$0xff] }
 0x178   :  { %7236 = vmatmul.mubr.msk.f32.vlgmr.msra.gmra.mxu1 %vm112_vm0, %v7234_v26  ;;  %v7257_v26 = vld [vmem:[%s8541_s4 + $0x10] sm:$0xff] }
 0x179   :  { %616 = vmatprep.mubr.f32.mxu1 %v7576_v0 }
 0x17f   :  { %v449_v43 = vpop.permute.xlu0 %448 }
 0x181   :  { %v438_v35 = vpop.permute.xlu1 %437 }
 0x1c0   :  { %v351_v27 = vpop.f32.mrf.mxu0 }
 0x1c2   :  { %v353_v30 = vpop.f32.mrf.mxu0 }
 0x234   :  { %v277_v28 = vpop.f32.mrf.mxu1 }
 0x235   :  { %v352_v31 = vadd.f32 %v351_v27, %v277_v28  ;;  %v7258_v27 = vld [vmem:[%s8543_s6 + $0x10] sm:$0xff]  ;;  %v1216_v28 = vld [vmem:[%s8545_s8] sm:$0xff] }
 0x236   :  { %v279_v29 = vpop.f32.mrf.mxu1 }
 0x237   :  { %v354_v33 = vadd.f32 %v353_v30, %v279_v29  ;;  %v7261_v29 = vld [vmem:[%s8539_s2 + $0x8] sm:$0xff] }
 0x238   :  { %v427_v32 = vpop.f32.mrf.mxu1 }
 0x239   :  { %v432_v34 = vadd.f32 %v427_v32, %v352_v31 }
 0x23a   :  { %v429_v36 = vpop.f32.mrf.mxu1 }
 0x23b   :  { %v433_v37 = vadd.f32 %v429_v36, %v354_v33  ;;  %v440_v38 = vadd.f32 %v438_v35, %v432_v34  ;;  %v7250_v34 = vld [vmem:[%s8540_s3 + $0x30] sm:$0xff] }
 0x23d   :  { %v441_v39 = vadd.f32 %v438_v35, %v433_v37  ;;  %v442_v41 = vmax.f32 %v440_v38, 0.0 }
 0x23f   :  { %v443_v40 = vmax.f32 %v441_v39, 0.0  ;;  %v7254_v39 = vld [vmem:[%s8540_s3 + $0x40] sm:$0xff] }
 0x241   :  { %484 = vmatprep.subr.mxu0 %v443_v40 }
 0x242   :  { %485 = vmatpush1.msra.mxu0 %v442_v41 }
 0x243   :  { %7237 = vmatmul.mubr.msk.f32.vlgmr.msra.gmra.mxu0 %vm112_vm0, %v444_v42 }
 0x244   :  { %690 = vmatprep.mubr.f32.mxu0 %v7576_v0 }
 0x303   :  { %v520_v44 = vpop.f32.mrf.mxu0 }
 0x304   :  { %v521_v45 = vadd.f32 %v520_v44, %v449_v43 }
 0x305   :  { %v522_v46 = vpop.f32.mrf.mxu0 }
 0x306   :  { %v7725_v47 = vadd.f32 %v521_v45, %v7666_v8  ;;  %v523_v48 = vadd.f32 %v522_v46, %v449_v43 }
 0x308   :  { %v7728_v49 = vadd.f32 %v523_v48, %v7668_v10  ;;  %527 = vrot.lane.b32.xlu1 %v7725_v47, %s7580_s23 }
 0x30a   :  { %529 = vrot.lane.b32.xlu0 %v7728_v49, %s7580_s23  ;;  %656 = vmatprep.subr.mxu0 %v7728_v49 }
 0x30b   :  { %657 = vmatpush1.msra.mxu0 %v7725_v47 }
 0x30c   :  { %536 = vrot.lane.b32.xlu1 %v7725_v47, %s7581_s26  ;;  %7242 = vmatmul.mubr.msk.f32.vlgmr.msra.gmra.mxu0 %vm112_vm0, %v7238_v50 }
 0x30d   :  { %862 = vmatprep.mubr.f32.mxu0 %v7576_v0 }
 0x30e   :  { %538 = vrot.lane.b32.xlu0 %v7728_v49, %s7581_s26 }
 0x310   :  { %779 = vperm.xlu1 %7459, %v7246_v51  }
 0x312   :  { %792 = vperm.xlu0 %7458, %v7247_v52  }
 0x37a   :  { %v528_v53 = vpop.permute.xlu1 %527 }
 0x37c   :  { %v530_v54 = vpop.permute.xlu0 %529 }
 0x37d   :  { %v533_v55 = vsel %vm531_vm5, %v530_v54, %v528_v53  ;;  %v532_v56 = vsel %vm531_vm5, %v528_v53, %v530_v54 }
 0x37e   :  { %582 = vmatprep.subr.mxu1 %v532_v56  ;;  %v537_v58 = vpop.permute.xlu1 %536 }
 0x37f   :  { %7240 = vmatpush1.msk.msra.mxu1 %vm93_vm6, %v533_v55  ;;  %v1131_v55 = vld [vmem:[#allocation7 + $0x10] sm:$0xff] }
 0x380   :  { %v539_v59 = vpop.permute.xlu0 %538  ;;  %7241 = vmatmul.mubr.msk.f32.vlgmr.msra.gmra.mxu1 %vm112_vm0, %v7239_v57 }
 0x381   :  { %v542_v60 = vsel %vm540_vm7, %v539_v59, %v537_v58  ;;  %v541_v61 = vsel %vm540_vm7, %v537_v58, %v539_v59  ;;  %766 = vmatprep.mubr.f32.mxu1 %v7576_v0 }
 0x382   :  { %7244 = vmatprep.subr.msk.mxu1 %vm100_vm8, %v542_v60 }
 0x383   :  { %733 = vmatpush1.msra.mxu1 %v541_v61 }
 0x384   :  { %7245 = vmatmul.mubr.msk.f32.vlgmr.msra.gmra.mxu1 %vm112_vm0, %v7243_v62 }
 0x385   :  { %960 = vmatprep.mubr.f32.mxu1 %v7576_v0 }
 0x38b   :  { %v780_v9 = vpop.permute.xlu1 %779 }
 0x38d   :  { %v793_v18 = vpop.permute.xlu0 %792 }
 0x3cc   :  { %v692_v63 = vpop.f32.mrf.mxu0 }
 0x3ce   :  { %v694_v3 = vpop.f32.mrf.mxu0 }
 0x440   :  { %v618_v1 = vpop.f32.mrf.mxu1 }
 0x441   :  { %v693_v4 = vadd.f32 %v692_v63, %v618_v1  ;;  %v1215_v63 = vld [vmem:[#allocation8] sm:$0xff] }
 0x442   :  { %v620_v2 = vpop.f32.mrf.mxu1 }
 0x443   :  { %v695_v6 = vadd.f32 %v694_v3, %v620_v2 }
 0x444   :  { %v768_v5 = vpop.f32.mrf.mxu1 }
 0x445   :  { %v773_v7 = vadd.f32 %v768_v5, %v693_v4 }
 0x446   :  { %v770_v8 = vpop.f32.mrf.mxu1 }
 0x447   :  { %v774_v10 = vadd.f32 %v770_v8, %v695_v6  ;;  %v782_v11 = vadd.f32 %v780_v9, %v773_v7  ;;  %v1299_v6 = vld [vmem:[#allocation5 + $0x8] sm:$0xff] }
 0x449   :  { %v783_v12 = vadd.f32 %v780_v9, %v774_v10  ;;  %v784_v14 = vmax.f32 %v782_v11, 0.0 }
 0x44b   :  { %v785_v13 = vmax.f32 %v783_v12, 0.0  ;;  %v7263_v12 = vld [vmem:[%s8540_s3 + $0x50] sm:$0xff] }
 0x44d   :  { %828 = vmatprep.subr.mxu0 %v785_v13  ;;  %v7271_v13 = vld [vmem:[%s8541_s4 + $0x18] sm:$0xff] }
 0x44e   :  { %829 = vmatpush1.msra.mxu0 %v784_v14  ;;  %v7272_v14 = vld [vmem:[%s8543_s6 + $0x18] sm:$0xff] }
 0x44f   :  { %7248 = vmatmul.mubr.msk.f32.vlgmr.msra.gmra.mxu0 %vm112_vm0, %v787_v16 }
 0x450   :  { %1034 = vmatprep.mubr.f32.mxu0 %v7576_v0 }
 0x50f   :  { %v864_v19 = vpop.f32.mrf.mxu0 }
 0x510   :  { %v865_v20 = vadd.f32 %v864_v19, %v793_v18 }
 0x511   :  { %v866_v21 = vpop.f32.mrf.mxu0 }
 0x512   :  { %v7780_v22 = vadd.f32 %v865_v20, %v7725_v47  ;;  %v867_v23 = vadd.f32 %v866_v21, %v793_v18  ;;  %v7264_v21 = vld [vmem:[%s8540_s3 + $0x48] sm:$0xff] }
 0x514   :  { %v7783_v24 = vadd.f32 %v867_v23, %v7728_v49  ;;  %871 = vrot.lane.b32.xlu1 %v7780_v22, %s7582_s12 }
 0x516   :  { %873 = vrot.lane.b32.xlu0 %v7783_v24, %s7582_s12  ;;  %1000 = vmatprep.subr.mxu0 %v7783_v24 }
 0x517   :  { %1001 = vmatpush1.msra.mxu0 %v7780_v22 }
 0x518   :  { %880 = vrot.lane.b32.xlu1 %v7780_v22, %s7583_s16  ;;  %7253 = vmatmul.mubr.msk.f32.vlgmr.msra.gmra.mxu0 %vm112_vm0, %v7249_v25 }
 0x519   :  { %1206 = vmatprep.mubr.f32.mxu0 %v7576_v0 }
 0x51a   :  { %882 = vrot.lane.b32.xlu0 %v7783_v24, %s7583_s16 }
 0x51c   :  { %1123 = vperm.xlu1 %7459, %v7257_v26   ;;  %v7268_v26 = vld [vmem:[%s8540_s3 + $0x58] sm:$0xff] }
 0x51e   :  { %1136 = vperm.xlu0 %7458, %v7258_v27  }
 0x520   :  { %1219 = vperm.xlu1 %7459, %v1216_v28  }
 0x522   :  { %1304 = vperm.xlu0 %7458, %v7261_v29  }
 0x586   :  { %v872_v30 = vpop.permute.xlu1 %871 }
 0x588   :  { %v874_v31 = vpop.permute.xlu0 %873 }
 0x589   :  { %v877_v32 = vsel %vm875_vm9, %v874_v31, %v872_v30  ;;  %v876_v33 = vsel %vm875_vm9, %v872_v30, %v874_v31 }
 0x58a   :  { %926 = vmatprep.subr.mxu1 %v876_v33  ;;  %v881_v35 = vpop.permute.xlu1 %880 }
 0x58b   :  { %7251 = vmatpush1.msk.msra.mxu1 %vm95_vm10, %v877_v32 }
 0x58c   :  { %v883_v36 = vpop.permute.xlu0 %882  ;;  %7252 = vmatmul.mubr.msk.f32.vlgmr.msra.gmra.mxu1 %vm112_vm0, %v7250_v34 }
 0x58d   :  { %v886_v37 = vsel %vm884_vm11, %v883_v36, %v881_v35  ;;  %v885_v38 = vsel %vm884_vm11, %v881_v35, %v883_v36  ;;  %1110 = vmatprep.mubr.f32.mxu1 %v7576_v0 }
 0x58e   :  { %7255 = vmatprep.subr.msk.mxu1 %vm102_vm12, %v886_v37 }
 0x58f   :  { %1077 = vmatpush1.msra.mxu1 %v885_v38 }
 0x590   :  { %7256 = vmatmul.mubr.msk.f32.vlgmr.msra.gmra.mxu1 %vm112_vm0, %v7254_v39 }
 0x591   :  { %1289 = vmatprep.mubr.f32.mxu1 %v7576_v0 }
 0x597   :  { %v1124_v49 = vpop.permute.xlu1 %1123 }
 0x599   :  { %v1137_v57 = vpop.permute.xlu0 %1136 }
 0x59b   :  { %v1220_v1 = vpop.permute.xlu1 %1219 }
 0x59d   :  { %v1305_v7 = vpop.permute.xlu0 %1304 }
 0x5d8   :  { %v1036_v40 = vpop.f32.mrf.mxu0 }
 0x5da   :  { %v1038_v43 = vpop.f32.mrf.mxu0 }
 0x64c   :  { %v962_v41 = vpop.f32.mrf.mxu1 }
 0x64d   :  { %v1037_v44 = vadd.f32 %v1036_v40, %v962_v41 }
 0x64e   :  { %v964_v42 = vpop.f32.mrf.mxu1 }
 0x64f   :  { %v1039_v46 = vadd.f32 %v1038_v43, %v964_v42  ;;  %v1639_v42 = vld [vmem:[#allocation7 + $0x18] sm:$0xff] }
 0x650   :  { %v1112_v45 = vpop.f32.mrf.mxu1 }
 0x651   :  { %v1117_v47 = vadd.f32 %v1112_v45, %v1037_v44 }
 0x652   :  { %v1114_v48 = vpop.f32.mrf.mxu1 }
 0x653   :  { %v1118_v50 = vadd.f32 %v1114_v48, %v1039_v46  ;;  %v1126_v51 = vadd.f32 %v1124_v49, %v1117_v47 }
 0x655   :  { %v1127_v52 = vadd.f32 %v1124_v49, %v1118_v50  ;;  %v1128_v54 = vmax.f32 %v1126_v51, 0.0  ;;  %v7274_v50 = vld [vmem:[%s8540_s3 + $0x68] sm:$0xff]  ;;  %v7282_v51 = vld [vmem:[%s8541_s4 + $0x20] sm:$0xff] }
 0x657   :  { %v1129_v53 = vmax.f32 %v1127_v52, 0.0  ;;  %v7283_v52 = vld [vmem:[%s8543_s6 + $0x20] sm:$0xff] }
 0x659   :  { %1172 = vmatprep.subr.mxu0 %v1129_v53 }
 0x65a   :  { %1173 = vmatpush1.msra.mxu0 %v1128_v54 }
 0x65b   :  { %7259 = vmatmul.mubr.msk.f32.vlgmr.msra.gmra.mxu0 %vm112_vm0, %v1131_v55 }
 0x65c   :  { %1374 = vmatprep.mubr.f32.mxu0 %v7576_v0 }
 0x71b   :  { %v1208_v56 = vpop.f32.mrf.mxu0 }
 0x71c   :  { %v1209_v58 = vadd.f32 %v1208_v56, %v1137_v57 }
 0x71d   :  { %v1210_v59 = vpop.f32.mrf.mxu0 }
 0x71e   :  { %v1211_v60 = vadd.f32 %v1210_v59, %v1137_v57  ;;  %v1213_v62 = vadd.f32 %v1209_v58, %v7780_v22  ;;  %v7275_v57 = vld [vmem:[%s8540_s3 + $0x60] sm:$0xff] }
 0x720   :  { %v1214_v61 = vadd.f32 %v1211_v60, %v7783_v24 }
 0x722   :  { %1255 = vmatprep.subr.mxu1 %v1214_v61 }
 0x723   :  { %1256 = vmatpush1.msra.mxu1 %v1213_v62  ;;  %v7279_v62 = vld [vmem:[%s8540_s3 + $0x70] sm:$0xff] }
 0x724   :  { %7260 = vmatmul.mubr.msk.f32.vlgmr.msra.gmra.mxu1 %vm112_vm0, %v1215_v63 }
 0x725   :  { %1468 = vmatprep.mubr.f32.mxu1 %v7576_v0 }
 0x7e4   :  { %v1291_v2 = vpop.f32.mrf.mxu1 }
 0x7e5   :  { %v1292_v3 = vadd.f32 %v1291_v2, %v1220_v1 }
 0x7e6   :  { %v1293_v4 = vpop.f32.mrf.mxu1 }
 0x7e7   :  { %1296 = vst [vmem:[#allocation10] sm:$0xff] %v1292_v3  ;;  %v1294_v5 = vadd.f32 %v1293_v4, %v1220_v1 }
 0x7e9   :  { %1297 = vst [vmem:[#allocation10 + $0x8] sm:$0xff] %v1294_v5  ;;  %1340 = vmatprep.subr.mxu0 %v1294_v5 }
 0x7ea   :  { %1341 = vmatpush1.msra.mxu0 %v1292_v3 }
 0x7eb   :  { %7262 = vmatmul.mubr.msk.f32.vlgmr.msra.gmra.mxu0 %vm112_vm0, %v1299_v6 }
 0x7ec   :  { %1542 = vmatprep.mubr.f32.mxu0 %v7576_v0 }
 0x8ab   :  { %v1376_v8 = vpop.f32.mrf.mxu0 }
 0x8ac   :  { %v1377_v9 = vadd.f32 %v1376_v8, %v1305_v7 }
 0x8ad   :  { %v1378_v10 = vpop.f32.mrf.mxu0 }
 0x8ae   :  { %v1379_v11 = vadd.f32 %v1378_v10, %v1305_v7  ;;  %1381 = vrot.lane.b32.xlu1 %v1377_v9, %s7578_s10 }
 0x8b0   :  { %1383 = vrot.lane.b32.xlu0 %v1379_v11, %s7578_s10  ;;  %1508 = vmatprep.subr.mxu0 %v1379_v11 }
 0x8b1   :  { %1509 = vmatpush1.msra.mxu0 %v1377_v9 }
 0x8b2   :  { %1389 = vrot.lane.b32.xlu1 %v1377_v9, %s7579_s13  ;;  %7267 = vmatmul.mubr.msk.f32.vlgmr.msra.gmra.mxu0 %vm112_vm0, %v7263_v12 }
 0x8b3   :  { %1714 = vmatprep.mubr.f32.mxu0 %v7576_v0 }
 0x8b4   :  { %1391 = vrot.lane.b32.xlu0 %v1379_v11, %s7579_s13 }
 0x8b6   :  { %1631 = vperm.xlu1 %7459, %v7271_v13  }
 0x8b8   :  { %1644 = vperm.xlu0 %7458, %v7272_v14  }
 0x920   :  { %v1382_v16 = vpop.permute.xlu1 %1381 }
 0x922   :  { %v1384_v18 = vpop.permute.xlu0 %1383 }
 0x923   :  { %v1386_v19 = vsel %vm191_vm1, %v1384_v18, %v1382_v16  ;;  %v1385_v20 = vsel %vm191_vm1, %v1382_v16, %v1384_v18  ;;  %v1981_v16 = vld [vmem:[#allocation7 + $0x20] sm:$0xff] }
 0x924   :  { %1434 = vmatprep.subr.mxu1 %v1385_v20  ;;  %v1390_v22 = vpop.permute.xlu1 %1389 }
 0x925   :  { %7265 = vmatpush1.msk.msra.mxu1 %vm91_vm2, %v1386_v19 }
 0x926   :  { %v1392_v23 = vpop.permute.xlu0 %1391  ;;  %7266 = vmatmul.mubr.msk.f32.vlgmr.msra.gmra.mxu1 %vm112_vm0, %v7264_v21 }
 0x927   :  { %v1393_v24 = vsel %vm200_vm3, %v1390_v22, %v1392_v23  ;;  %v1394_v25 = vsel %vm200_vm3, %v1392_v23, %v1390_v22  ;;  %1618 = vmatprep.mubr.f32.mxu1 %v7576_v0 }
 0x928   :  { %7269 = vmatprep.subr.msk.mxu1 %vm98_vm4, %v1394_v25  ;;  %v7285_v25 = vld [vmem:[%s8540_s3 + $0x80] sm:$0xff] }
 0x929   :  { %1585 = vmatpush1.msra.mxu1 %v1393_v24 }
 0x92a   :  { %7270 = vmatmul.mubr.msk.f32.vlgmr.msra.gmra.mxu1 %vm112_vm0, %v7268_v26  ;;  %v7293_v26 = vld [vmem:[%s8541_s4 + $0x28] sm:$0xff] }
 0x92b   :  { %1810 = vmatprep.mubr.f32.mxu1 %v7576_v0 }
 0x931   :  { %v1632_v36 = vpop.permute.xlu1 %1631 }
 0x933   :  { %v1645_v43 = vpop.permute.xlu0 %1644 }
 0x972   :  { %v1544_v27 = vpop.f32.mrf.mxu0 }
 0x974   :  { %v1546_v30 = vpop.f32.mrf.mxu0 }
 0x9e6   :  { %v1470_v28 = vpop.f32.mrf.mxu1 }
 0x9e7   :  { %v1545_v31 = vadd.f32 %v1544_v27, %v1470_v28  ;;  %v7294_v27 = vld [vmem:[%s8543_s6 + $0x28] sm:$0xff] }
 0x9e8   :  { %v1472_v29 = vpop.f32.mrf.mxu1  ;;  %v7296_v28 = vld [vmem:[%s8545_s8 + $0x8] sm:$0xff] }
 0x9e9   :  { %v1547_v33 = vadd.f32 %v1546_v30, %v1472_v29  ;;  %v7298_v29 = vld [vmem:[%s8539_s2 + $0x10] sm:$0xff] }
 0x9ea   :  { %v1620_v32 = vpop.f32.mrf.mxu1 }
 0x9eb   :  { %v1625_v34 = vadd.f32 %v1620_v32, %v1545_v31 }
 0x9ec   :  { %v1622_v35 = vpop.f32.mrf.mxu1 }
 0x9ed   :  { %v1626_v37 = vadd.f32 %v1622_v35, %v1547_v33  ;;  %v1634_v38 = vadd.f32 %v1632_v36, %v1625_v34  ;;  %v7286_v34 = vld [vmem:[%s8540_s3 + $0x78] sm:$0xff] }
 0x9ef   :  { %v1635_v39 = vadd.f32 %v1632_v36, %v1626_v37  ;;  %v1636_v41 = vmax.f32 %v1634_v38, 0.0 }
 0x9f1   :  { %v1637_v40 = vmax.f32 %v1635_v39, 0.0  ;;  %v7290_v39 = vld [vmem:[%s8540_s3 + $0x88] sm:$0xff] }
 0x9f3   :  { %1680 = vmatprep.subr.mxu0 %v1637_v40 }
 0x9f4   :  { %1681 = vmatpush1.msra.mxu0 %v1636_v41 }
 0x9f5   :  { %7273 = vmatmul.mubr.msk.f32.vlgmr.msra.gmra.mxu0 %vm112_vm0, %v1639_v42 }
 0x9f6   :  { %1884 = vmatprep.mubr.f32.mxu0 %v7576_v0 }
 0xab5   :  { %v1716_v44 = vpop.f32.mrf.mxu0 }
 0xab6   :  { %v1717_v45 = vadd.f32 %v1716_v44, %v1645_v43 }
 0xab7   :  { %v1718_v46 = vpop.f32.mrf.mxu0 }
 0xab8   :  { %v1721_v47 = vadd.f32 %v1717_v45, %v1377_v9  ;;  %v1719_v48 = vadd.f32 %v1718_v46, %v1645_v43 }
 0xaba   :  { %v1722_v49 = vadd.f32 %v1719_v48, %v1379_v11  ;;  %1723 = vrot.lane.b32.xlu1 %v1721_v47, %s7580_s23 }
 0xabc   :  { %1725 = vrot.lane.b32.xlu0 %v1722_v49, %s7580_s23  ;;  %1850 = vmatprep.subr.mxu0 %v1722_v49 }
 0xabd   :  { %1851 = vmatpush1.msra.mxu0 %v1721_v47 }
 0xabe   :  { %1731 = vrot.lane.b32.xlu1 %v1721_v47, %s7581_s26  ;;  %7278 = vmatmul.mubr.msk.f32.vlgmr.msra.gmra.mxu0 %vm112_vm0, %v7274_v50 }
 0xabf   :  { %2056 = vmatprep.mubr.f32.mxu0 %v7576_v0 }
 0xac0   :  { %1733 = vrot.lane.b32.xlu0 %v1722_v49, %s7581_s26 }
 0xac2   :  { %1973 = vperm.xlu1 %7459, %v7282_v51  }
 0xac4   :  { %1986 = vperm.xlu0 %7458, %v7283_v52  }
 0xb2c   :  { %v1724_v53 = vpop.permute.xlu1 %1723 }
 0xb2e   :  { %v1726_v54 = vpop.permute.xlu0 %1725 }
 0xb2f   :  { %v1728_v55 = vsel %vm531_vm5, %v1726_v54, %v1724_v53  ;;  %v1727_v56 = vsel %vm531_vm5, %v1724_v53, %v1726_v54 }
 0xb30   :  { %1776 = vmatprep.subr.mxu1 %v1727_v56  ;;  %v1732_v58 = vpop.permute.xlu1 %1731 }
 0xb31   :  { %7276 = vmatpush1.msk.msra.mxu1 %vm93_vm6, %v1728_v55  ;;  %v2323_v55 = vld [vmem:[#allocation7 + $0x28] sm:$0xff] }
 0xb32   :  { %v1734_v59 = vpop.permute.xlu0 %1733  ;;  %7277 = vmatmul.mubr.msk.f32.vlgmr.msra.gmra.mxu1 %vm112_vm0, %v7275_v57 }
 0xb33   :  { %v1735_v60 = vsel %vm540_vm7, %v1732_v58, %v1734_v59  ;;  %v1736_v61 = vsel %vm540_vm7, %v1734_v59, %v1732_v58  ;;  %1960 = vmatprep.mubr.f32.mxu1 %v7576_v0 }
 0xb34   :  { %7280 = vmatprep.subr.msk.mxu1 %vm100_vm8, %v1736_v61 }
 0xb35   :  { %1927 = vmatpush1.msra.mxu1 %v1735_v60 }
 0xb36   :  { %7281 = vmatmul.mubr.msk.f32.vlgmr.msra.gmra.mxu1 %vm112_vm0, %v7279_v62 }
 0xb37   :  { %2152 = vmatprep.mubr.f32.mxu1 %v7576_v0 }
 0xb3d   :  { %v1974_v9 = vpop.permute.xlu1 %1973 }
 0xb3f   :  { %v1987_v18 = vpop.permute.xlu0 %1986 }
 0xb7e   :  { %v1886_v63 = vpop.f32.mrf.mxu0 }
 0xb80   :  { %v1888_v3 = vpop.f32.mrf.mxu0 }
 0xbf2   :  { %v1812_v1 = vpop.f32.mrf.mxu1 }
 0xbf3   :  { %v1887_v4 = vadd.f32 %v1886_v63, %v1812_v1  ;;  %v2408_v63 = vld [vmem:[#allocation8 + $0x8] sm:$0xff] }
 0xbf4   :  { %v1814_v2 = vpop.f32.mrf.mxu1 }
 0xbf5   :  { %v1889_v6 = vadd.f32 %v1888_v3, %v1814_v2 }
 0xbf6   :  { %v1962_v5 = vpop.f32.mrf.mxu1 }
 0xbf7   :  { %v1967_v7 = vadd.f32 %v1962_v5, %v1887_v4 }
 0xbf8   :  { %v1964_v8 = vpop.f32.mrf.mxu1 }
 0xbf9   :  { %v1968_v10 = vadd.f32 %v1964_v8, %v1889_v6  ;;  %v1976_v11 = vadd.f32 %v1974_v9, %v1967_v7  ;;  %v2494_v6 = vld [vmem:[#allocation5 + $0x10] sm:$0xff] }
 0xbfb   :  { %v1977_v12 = vadd.f32 %v1974_v9, %v1968_v10  ;;  %v1978_v14 = vmax.f32 %v1976_v11, 0.0 }
 0xbfd   :  { %v1979_v13 = vmax.f32 %v1977_v12, 0.0  ;;  %v7300_v12 = vld [vmem:[%s8540_s3 + $0x98] sm:$0xff] }
 0xbff   :  { %2022 = vmatprep.subr.mxu0 %v1979_v13  ;;  %v7308_v13 = vld [vmem:[%s8541_s4 + $0x30] sm:$0xff] }
 0xc00   :  { %2023 = vmatpush1.msra.mxu0 %v1978_v14  ;;  %v7309_v14 = vld [vmem:[%s8543_s6 + $0x30] sm:$0xff] }
 0xc01   :  { %7284 = vmatmul.mubr.msk.f32.vlgmr.msra.gmra.mxu0 %vm112_vm0, %v1981_v16 }
 0xc02   :  { %2226 = vmatprep.mubr.f32.mxu0 %v7576_v0 }
 0xcc1   :  { %v2058_v19 = vpop.f32.mrf.mxu0 }
 0xcc2   :  { %v2059_v20 = vadd.f32 %v2058_v19, %v1987_v18 }
 0xcc3   :  { %v2060_v21 = vpop.f32.mrf.mxu0 }
 0xcc4   :  { %v7924_v22 = vadd.f32 %v2059_v20, %v1721_v47  ;;  %v2061_v23 = vadd.f32 %v2060_v21, %v1987_v18  ;;  %v7301_v21 = vld [vmem:[%s8540_s3 + $0x90] sm:$0xff] }
 0xcc6   :  { %v2064_v24 = vadd.f32 %v2061_v23, %v1722_v49  ;;  %2065 = vrot.lane.b32.xlu1 %v7924_v22, %s7582_s12 }
 0xcc8   :  { %2067 = vrot.lane.b32.xlu0 %v2064_v24, %s7582_s12  ;;  %2192 = vmatprep.subr.mxu0 %v2064_v24 }
 0xcc9   :  { %2193 = vmatpush1.msra.mxu0 %v7924_v22 }
 0xcca   :  { %2073 = vrot.lane.b32.xlu1 %v7924_v22, %s7583_s16  ;;  %7289 = vmatmul.mubr.msk.f32.vlgmr.msra.gmra.mxu0 %vm112_vm0, %v7285_v25 }
 0xccb   :  { %2398 = vmatprep.mubr.f32.mxu0 %v7576_v0 }
 0xccc   :  { %2075 = vrot.lane.b32.xlu0 %v2064_v24, %s7583_s16 }
 0xcce   :  { %2315 = vperm.xlu1 %7459, %v7293_v26   ;;  %v7305_v26 = vld [vmem:[%s8540_s3 + $0xa0] sm:$0xff] }
 0xcd0   :  { %2328 = vperm.xlu0 %7458, %v7294_v27  }
 0xcd2   :  { %2413 = vperm.xlu1 %7459, %v7296_v28  }
 0xcd4   :  { %2499 = vperm.xlu0 %7458, %v7298_v29  }
 0xd38   :  { %v2066_v30 = vpop.permute.xlu1 %2065 }
 0xd3a   :  { %v2068_v31 = vpop.permute.xlu0 %2067 }
 0xd3b   :  { %v2070_v32 = vsel %vm875_vm9, %v2068_v31, %v2066_v30  ;;  %v2069_v33 = vsel %vm875_vm9, %v2066_v30, %v2068_v31 }
 0xd3c   :  { %2118 = vmatprep.subr.mxu1 %v2069_v33  ;;  %v2074_v35 = vpop.permute.xlu1 %2073 }
 0xd3d   :  { %7287 = vmatpush1.msk.msra.mxu1 %vm95_vm10, %v2070_v32 }
 0xd3e   :  { %v2076_v36 = vpop.permute.xlu0 %2075  ;;  %7288 = vmatmul.mubr.msk.f32.vlgmr.msra.gmra.mxu1 %vm112_vm0, %v7286_v34 }
 0xd3f   :  { %v2077_v37 = vsel %vm884_vm11, %v2074_v35, %v2076_v36  ;;  %v2078_v38 = vsel %vm884_vm11, %v2076_v36, %v2074_v35  ;;  %2302 = vmatprep.mubr.f32.mxu1 %v7576_v0 }
 0xd40   :  { %7291 = vmatprep.subr.msk.mxu1 %vm102_vm12, %v2078_v38 }
 0xd41   :  { %2269 = vmatpush1.msra.mxu1 %v2077_v37 }
 0xd42   :  { %7292 = vmatmul.mubr.msk.f32.vlgmr.msra.gmra.mxu1 %vm112_vm0, %v7290_v39 }
 0xd43   :  { %2483 = vmatprep.mubr.f32.mxu1 %v7576_v0 }
 0xd49   :  { %v2316_v49 = vpop.permute.xlu1 %2315 }
 0xd4b   :  { %v2329_v57 = vpop.permute.xlu0 %2328 }
 0xd4d   :  { %v2414_v1 = vpop.permute.xlu1 %2413 }
 0xd4f   :  { %v2500_v7 = vpop.permute.xlu0 %2499 }
 0xd8a   :  { %v2228_v40 = vpop.f32.mrf.mxu0 }
 0xd8c   :  { %v2230_v43 = vpop.f32.mrf.mxu0 }
 0xdfe   :  { %v2154_v41 = vpop.f32.mrf.mxu1 }
 0xdff   :  { %v2229_v44 = vadd.f32 %v2228_v40, %v2154_v41 }
 0xe00   :  { %v2156_v42 = vpop.f32.mrf.mxu1 }
 0xe01   :  { %v2231_v46 = vadd.f32 %v2230_v43, %v2156_v42  ;;  %v2834_v42 = vld [vmem:[#allocation7 + $0x30] sm:$0xff] }
 0xe02   :  { %v2304_v45 = vpop.f32.mrf.mxu1 }
 0xe03   :  { %v2309_v47 = vadd.f32 %v2304_v45, %v2229_v44 }
 0xe04   :  { %v2306_v48 = vpop.f32.mrf.mxu1 }
 0xe05   :  { %v2310_v50 = vadd.f32 %v2306_v48, %v2231_v46  ;;  %v2318_v51 = vadd.f32 %v2316_v49, %v2309_v47 }
 0xe07   :  { %v2319_v52 = vadd.f32 %v2316_v49, %v2310_v50  ;;  %v2320_v54 = vmax.f32 %v2318_v51, 0.0  ;;  %v7311_v50 = vld [vmem:[%s8540_s3 + $0xb0] sm:$0xff]  ;;  %v7319_v51 = vld [vmem:[%s8541_s4 + $0x38] sm:$0xff] }
 0xe09   :  { %v2321_v53 = vmax.f32 %v2319_v52, 0.0  ;;  %v7320_v52 = vld [vmem:[%s8543_s6 + $0x38] sm:$0xff] }
 0xe0b   :  { %2364 = vmatprep.subr.mxu0 %v2321_v53 }
 0xe0c   :  { %2365 = vmatpush1.msra.mxu0 %v2320_v54 }
 0xe0d   :  { %7295 = vmatmul.mubr.msk.f32.vlgmr.msra.gmra.mxu0 %vm112_vm0, %v2323_v55 }
 0xe0e   :  { %2569 = vmatprep.mubr.f32.mxu0 %v7576_v0 }
 0xecd   :  { %v2400_v56 = vpop.f32.mrf.mxu0 }
 0xece   :  { %v2401_v58 = vadd.f32 %v2400_v56, %v2329_v57 }
 0xecf   :  { %v2402_v59 = vpop.f32.mrf.mxu0 }
 0xed0   :  { %v2403_v60 = vadd.f32 %v2402_v59, %v2329_v57  ;;  %v2405_v62 = vadd.f32 %v2401_v58, %v7924_v22  ;;  %v7312_v57 = vld [vmem:[%s8540_s3 + $0xa8] sm:$0xff] }
 0xed2   :  { %v2406_v61 = vadd.f32 %v2403_v60, %v2064_v24 }
 0xed4   :  { %2449 = vmatprep.subr.mxu1 %v2406_v61 }
 0xed5   :  { %2450 = vmatpush1.msra.mxu1 %v2405_v62  ;;  %v7316_v62 = vld [vmem:[%s8540_s3 + $0xb8] sm:$0xff] }
 0xed6   :  { %7297 = vmatmul.mubr.msk.f32.vlgmr.msra.gmra.mxu1 %vm112_vm0, %v2408_v63 }
 0xed7   :  { %2663 = vmatprep.mubr.f32.mxu1 %v7576_v0 }
 0xf96   :  { %v2485_v2 = vpop.f32.mrf.mxu1 }
 0xf97   :  { %v2486_v3 = vadd.f32 %v2485_v2, %v2414_v1 }
 0xf98   :  { %v2487_v4 = vpop.f32.mrf.mxu1 }
 0xf99   :  { %2491 = vst [vmem:[#allocation10 + $0x20] sm:$0xff] %v2486_v3  ;;  %v2488_v5 = vadd.f32 %v2487_v4, %v2414_v1 }
 0xf9b   :  { %2492 = vst [vmem:[#allocation10 + $0x28] sm:$0xff] %v2488_v5  ;;  %2535 = vmatprep.subr.mxu0 %v2488_v5 }
 0xf9c   :  { %2536 = vmatpush1.msra.mxu0 %v2486_v3 }
 0xf9d   :  { %7299 = vmatmul.mubr.msk.f32.vlgmr.msra.gmra.mxu0 %vm112_vm0, %v2494_v6 }
 0xf9e   :  { %2737 = vmatprep.mubr.f32.mxu0 %v7576_v0 }
0x105d   :  { %v2571_v8 = vpop.f32.mrf.mxu0 }
0x105e   :  { %v2572_v9 = vadd.f32 %v2571_v8, %v2500_v7 }
0x105f   :  { %v2573_v10 = vpop.f32.mrf.mxu0 }
0x1060   :  { %v2574_v11 = vadd.f32 %v2573_v10, %v2500_v7  ;;  %2576 = vrot.lane.b32.xlu1 %v2572_v9, %s7578_s10 }
0x1062   :  { %2578 = vrot.lane.b32.xlu0 %v2574_v11, %s7578_s10  ;;  %2703 = vmatprep.subr.mxu0 %v2574_v11 }
0x1063   :  { %2704 = vmatpush1.msra.mxu0 %v2572_v9 }
0x1064   :  { %2584 = vrot.lane.b32.xlu1 %v2572_v9, %s7579_s13  ;;  %7304 = vmatmul.mubr.msk.f32.vlgmr.msra.gmra.mxu0 %vm112_vm0, %v7300_v12 }
0x1065   :  { %2909 = vmatprep.mubr.f32.mxu0 %v7576_v0 }
0x1066   :  { %2586 = vrot.lane.b32.xlu0 %v2574_v11, %s7579_s13 }
0x1068   :  { %2826 = vperm.xlu1 %7459, %v7308_v13  }
0x106a   :  { %2839 = vperm.xlu0 %7458, %v7309_v14  }
0x10d2   :  { %v2577_v16 = vpop.permute.xlu1 %2576 }
0x10d4   :  { %v2579_v18 = vpop.permute.xlu0 %2578 }
0x10d5   :  { %v2581_v19 = vsel %vm191_vm1, %v2579_v18, %v2577_v16  ;;  %v2580_v20 = vsel %vm191_vm1, %v2577_v16, %v2579_v18  ;;  %v3176_v16 = vld [vmem:[#allocation7 + $0x38] sm:$0xff] }
0x10d6   :  { %2629 = vmatprep.subr.mxu1 %v2580_v20  ;;  %v2585_v22 = vpop.permute.xlu1 %2584 }
0x10d7   :  { %7302 = vmatpush1.msk.msra.mxu1 %vm91_vm2, %v2581_v19 }
0x10d8   :  { %v2587_v23 = vpop.permute.xlu0 %2586  ;;  %7303 = vmatmul.mubr.msk.f32.vlgmr.msra.gmra.mxu1 %vm112_vm0, %v7301_v21 }
0x10d9   :  { %v2588_v24 = vsel %vm200_vm3, %v2585_v22, %v2587_v23  ;;  %v2589_v25 = vsel %vm200_vm3, %v2587_v23, %v2585_v22  ;;  %2813 = vmatprep.mubr.f32.mxu1 %v7576_v0 }
0x10da   :  { %7306 = vmatprep.subr.msk.mxu1 %vm98_vm4, %v2589_v25  ;;  %v7322_v25 = vld [vmem:[%s8540_s3 + $0xc8] sm:$0xff] }
0x10db   :  { %2780 = vmatpush1.msra.mxu1 %v2588_v24 }
0x10dc   :  { %7307 = vmatmul.mubr.msk.f32.vlgmr.msra.gmra.mxu1 %vm112_vm0, %v7305_v26  ;;  %v7330_v26 = vld [vmem:[%s8541_s4 + $0x40] sm:$0xff] }
0x10dd   :  { %3005 = vmatprep.mubr.f32.mxu1 %v7576_v0 }
0x10e3   :  { %v2827_v36 = vpop.permute.xlu1 %2826 }
0x10e5   :  { %v2840_v43 = vpop.permute.xlu0 %2839 }
0x1124   :  { %v2739_v27 = vpop.f32.mrf.mxu0 }
0x1126   :  { %v2741_v30 = vpop.f32.mrf.mxu0 }
0x1198   :  { %v2665_v28 = vpop.f32.mrf.mxu1 }
0x1199   :  { %v2740_v31 = vadd.f32 %v2739_v27, %v2665_v28  ;;  %v3692_v27 = vld [vmem:[%s8539_s2] sm:$0xff] }
0x119a   :  { %v2667_v29 = vpop.f32.mrf.mxu1  ;;  %v7331_v28 = vld [vmem:[%s8543_s6 + $0x40] sm:$0xff] }
0x119b   :  { %v2742_v33 = vadd.f32 %v2741_v30, %v2667_v29 }
0x119c   :  { %v2815_v32 = vpop.f32.mrf.mxu1 }
0x119d   :  { %v2820_v34 = vadd.f32 %v2815_v32, %v2740_v31 }
0x119e   :  { %v2817_v35 = vpop.f32.mrf.mxu1 }
0x119f   :  { %v2821_v37 = vadd.f32 %v2817_v35, %v2742_v33  ;;  %v2829_v38 = vadd.f32 %v2827_v36, %v2820_v34  ;;  %v7323_v33 = vld [vmem:[%s8540_s3 + $0xc0] sm:$0xff] }
0x11a1   :  { %v2830_v39 = vadd.f32 %v2827_v36, %v2821_v37  ;;  %v2831_v41 = vmax.f32 %v2829_v38, 0.0  ;;  %v7327_v38 = vld [vmem:[%s8540_s3 + $0xd0] sm:$0xff] }
0x11a3   :  { %v2832_v40 = vmax.f32 %v2830_v39, 0.0 }
0x11a5   :  { %2875 = vmatprep.subr.mxu0 %v2832_v40 }
0x11a6   :  { %2876 = vmatpush1.msra.mxu0 %v2831_v41 }
0x11a7   :  { %7310 = vmatmul.mubr.msk.f32.vlgmr.msra.gmra.mxu0 %vm112_vm0, %v2834_v42 }
0x11a8   :  { %3079 = vmatprep.mubr.f32.mxu0 %v7576_v0 }
0x1267   :  { %v2911_v44 = vpop.f32.mrf.mxu0 }
0x1268   :  { %v2912_v45 = vadd.f32 %v2911_v44, %v2840_v43 }
0x1269   :  { %v2913_v46 = vpop.f32.mrf.mxu0 }
0x126a   :  { %v2916_v47 = vadd.f32 %v2912_v45, %v2572_v9  ;;  %v2914_v48 = vadd.f32 %v2913_v46, %v2840_v43 }
0x126c   :  { %v2917_v49 = vadd.f32 %v2914_v48, %v2574_v11  ;;  %2918 = vrot.lane.b32.xlu1 %v2916_v47, %s7580_s23 }
0x126e   :  { %2920 = vrot.lane.b32.xlu0 %v2917_v49, %s7580_s23  ;;  %3045 = vmatprep.subr.mxu0 %v2917_v49 }
0x126f   :  { %3046 = vmatpush1.msra.mxu0 %v2916_v47 }
0x1270   :  { %2926 = vrot.lane.b32.xlu1 %v2916_v47, %s7581_s26  ;;  %7315 = vmatmul.mubr.msk.f32.vlgmr.msra.gmra.mxu0 %vm112_vm0, %v7311_v50 }
0x1271   :  { %3251 = vmatprep.mubr.f32.mxu0 %v7576_v0 }
0x1272   :  { %2928 = vrot.lane.b32.xlu0 %v2917_v49, %s7581_s26 }
0x1274   :  { %3168 = vperm.xlu1 %7459, %v7319_v51  }
0x1276   :  { %3181 = vperm.xlu0 %7458, %v7320_v52  }
0x12de   :  { %v2919_v53 = vpop.permute.xlu1 %2918 }
0x12e0   :  { %v2921_v54 = vpop.permute.xlu0 %2920 }
0x12e1   :  { %v2923_v55 = vsel %vm531_vm5, %v2921_v54, %v2919_v53  ;;  %v2922_v56 = vsel %vm531_vm5, %v2919_v53, %v2921_v54  ;;  %v3518_v54 = vld [vmem:[#allocation7 + $0x40] sm:$0xff] }
0x12e2   :  { %2971 = vmatprep.subr.mxu1 %v2922_v56  ;;  %v2927_v58 = vpop.permute.xlu1 %2926  ;;  %v3689_v56 = vld [vmem:[#allocation2 + $0x10] sm:$0xff] }
0x12e3   :  { %7313 = vmatpush1.msk.msra.mxu1 %vm93_vm6, %v2923_v55  ;;  %v3690_v55 = vld [vmem:[#allocation2 + $0x18] sm:$0xff] }
0x12e4   :  { %v2929_v59 = vpop.permute.xlu0 %2928  ;;  %7314 = vmatmul.mubr.msk.f32.vlgmr.msra.gmra.mxu1 %vm112_vm0, %v7312_v57  ;;  %v3691_v57 = vld [vmem:[#allocation5] sm:$0xff] }
0x12e5   :  { %v2930_v60 = vsel %vm540_vm7, %v2927_v58, %v2929_v59  ;;  %v2931_v61 = vsel %vm540_vm7, %v2929_v59, %v2927_v58  ;;  %3155 = vmatprep.mubr.f32.mxu1 %v7576_v0 }
0x12e6   :  { %7317 = vmatprep.subr.msk.mxu1 %vm100_vm8, %v2931_v61 }
0x12e7   :  { %3122 = vmatpush1.msra.mxu1 %v2930_v60 }
0x12e8   :  { %7318 = vmatmul.mubr.msk.f32.vlgmr.msra.gmra.mxu1 %vm112_vm0, %v7316_v62 }
0x12e9   :  { %3347 = vmatprep.mubr.f32.mxu1 %v7576_v0 }
0x12ef   :  { %v3169_v9 = vpop.permute.xlu1 %3168 }
0x12f1   :  { %v3182_v18 = vpop.permute.xlu0 %3181 }
0x1330   :  { %v3081_v63 = vpop.f32.mrf.mxu0 }
0x1332   :  { %v3083_v3 = vpop.f32.mrf.mxu0 }
0x13a4   :  { %v3007_v1 = vpop.f32.mrf.mxu1 }
0x13a5   :  { %v3082_v4 = vadd.f32 %v3081_v63, %v3007_v1 }
0x13a6   :  { %v3009_v2 = vpop.f32.mrf.mxu1 }
0x13a7   :  { %v3084_v6 = vadd.f32 %v3083_v3, %v3009_v2 }
0x13a8   :  { %v3157_v5 = vpop.f32.mrf.mxu1 }
0x13a9   :  { %v3162_v7 = vadd.f32 %v3157_v5, %v3082_v4 }
0x13aa   :  { %v3159_v8 = vpop.f32.mrf.mxu1 }
0x13ab   :  { %v3163_v10 = vadd.f32 %v3159_v8, %v3084_v6  ;;  %v3171_v11 = vadd.f32 %v3169_v9, %v3162_v7  ;;  %v3603_v7 = vld [vmem:[#allocation8 + $0x10] sm:$0xff]  ;;  %v7336_v8 = vld [vmem:[%s8540_s3 + $0x8] sm:$0xff] }
0x13ad   :  { %v3172_v12 = vadd.f32 %v3169_v9, %v3163_v10  ;;  %v3173_v14 = vmax.f32 %v3171_v11, 0.0  ;;  %v4015_v9 = vld [vmem:[%s8541_s4] sm:$0xff] }
0x13ae   :  { %v4026_v10 = vld [vmem:[%s8543_s6] sm:$0xff] }
0x13af   :  { %v3174_v13 = vmax.f32 %v3172_v12, 0.0 }
0x13b1   :  { %3217 = vmatprep.subr.mxu0 %v3174_v13 }
0x13b2   :  { %3218 = vmatpush1.msra.mxu0 %v3173_v14 }
0x13b3   :  { %7321 = vmatmul.mubr.msk.f32.vlgmr.msra.gmra.mxu0 %vm112_vm0, %v3176_v16  ;;  %v3789_v16 = vld [vmem:[%s8540_s3] sm:$0xff] }
0x13b4   :  { %3421 = vmatprep.mubr.f32.mxu0 %v7576_v0 }
0x1473   :  { %v3253_v19 = vpop.f32.mrf.mxu0 }
0x1474   :  { %v3254_v20 = vadd.f32 %v3253_v19, %v3182_v18 }
0x1475   :  { %v3255_v21 = vpop.f32.mrf.mxu0 }
0x1476   :  { %v8057_v22 = vadd.f32 %v3254_v20, %v2916_v47  ;;  %v3256_v23 = vadd.f32 %v3255_v21, %v3182_v18 }
0x1478   :  { %v8059_v24 = vadd.f32 %v3256_v23, %v2917_v49  ;;  %3260 = vrot.lane.b32.xlu1 %v8057_v22, %s7582_s12 }
0x147a   :  { %3262 = vrot.lane.b32.xlu0 %v8059_v24, %s7582_s12  ;;  %3387 = vmatprep.subr.mxu0 %v8059_v24 }
0x147b   :  { %3388 = vmatpush1.msra.mxu0 %v8057_v22 }
0x147c   :  { %3268 = vrot.lane.b32.xlu1 %v8057_v22, %s7583_s16  ;;  %7326 = vmatmul.mubr.msk.f32.vlgmr.msra.gmra.mxu0 %vm112_vm0, %v7322_v25 }
0x147d   :  { %3593 = vmatprep.mubr.f32.mxu0 %v7576_v0 }
0x147e   :  { %3270 = vrot.lane.b32.xlu0 %v8059_v24, %s7583_s16 }
0x1480   :  { %3510 = vperm.xlu1 %7459, %v7330_v26  }
0x1482   :  { %3695 = vperm.xlu0 %7458, %v3692_v27  }
0x1484   :  { %3523 = vperm.xlu1 %7459, %v7331_v28  }
0x14ea   :  { %v3261_v29 = vpop.permute.xlu1 %3260 }
0x14ec   :  { %v3263_v30 = vpop.permute.xlu0 %3262 }
0x14ed   :  { %v3265_v31 = vsel %vm875_vm9, %v3263_v30, %v3261_v29  ;;  %v3264_v32 = vsel %vm875_vm9, %v3261_v29, %v3263_v30 }
0x14ee   :  { %3313 = vmatprep.subr.mxu1 %v3264_v32  ;;  %v3269_v34 = vpop.permute.xlu1 %3268 }
0x14ef   :  { %7324 = vmatpush1.msk.msra.mxu1 %vm95_vm10, %v3265_v31 }
0x14f0   :  { %v3271_v35 = vpop.permute.xlu0 %3270  ;;  %7325 = vmatmul.mubr.msk.f32.vlgmr.msra.gmra.mxu1 %vm112_vm0, %v7323_v33 }
0x14f1   :  { %v3272_v36 = vsel %vm884_vm11, %v3269_v34, %v3271_v35  ;;  %v3273_v37 = vsel %vm884_vm11, %v3271_v35, %v3269_v34  ;;  %3497 = vmatprep.mubr.f32.mxu1 %v7576_v0 }
0x14f2   :  { %7328 = vmatprep.subr.msk.mxu1 %vm102_vm12, %v3273_v37 }
0x14f3   :  { %3464 = vmatpush1.msra.mxu1 %v3272_v36 }
0x14f4   :  { %7329 = vmatmul.mubr.msk.f32.vlgmr.msra.gmra.mxu1 %vm112_vm0, %v7327_v38 }
0x14f5   :  { %3678 = vmatprep.mubr.f32.mxu1 %v7576_v0 }
0x14fb   :  { %v3511_v48 = vpop.permute.xlu1 %3510 }
0x14fd   :  { %v3696_v63 = vpop.permute.xlu0 %3695 }
0x14ff   :  { %v3524_v59 = vpop.permute.xlu1 %3523 }
0x153c   :  { %v3423_v39 = vpop.f32.mrf.mxu0 }
0x153e   :  { %v3425_v42 = vpop.f32.mrf.mxu0 }
0x15b0   :  { %v3349_v40 = vpop.f32.mrf.mxu1 }
0x15b1   :  { %v3424_v43 = vadd.f32 %v3423_v39, %v3349_v40  ;;  %v4025_v40 = vld [vmem:[#allocation7] sm:$0xff] }
0x15b2   :  { %v3351_v41 = vpop.f32.mrf.mxu1 }
0x15b3   :  { %v3426_v45 = vadd.f32 %v3425_v42, %v3351_v41 }
0x15b4   :  { %v3499_v44 = vpop.f32.mrf.mxu1 }
0x15b5   :  { %v3504_v46 = vadd.f32 %v3499_v44, %v3424_v43 }
0x15b6   :  { %v3501_v47 = vpop.f32.mrf.mxu1 }
0x15b7   :  { %v3505_v49 = vadd.f32 %v3501_v47, %v3426_v45  ;;  %v3513_v50 = vadd.f32 %v3511_v48, %v3504_v46 }
0x15b9   :  { %v3514_v51 = vadd.f32 %v3511_v48, %v3505_v49  ;;  %v3515_v53 = vmax.f32 %v3513_v50, 0.0  ;;  %v7344_v48 = vld [vmem:[%s8540_s3 + $0x20] sm:$0xff]  ;;  %v7352_v49 = vld [vmem:[%s8541_s4 + $0x8] sm:$0xff] }
0x15ba   :  { %v7353_v50 = vld [vmem:[%s8543_s6 + $0x8] sm:$0xff] }
0x15bb   :  { %v3516_v52 = vmax.f32 %v3514_v51, 0.0 }
0x15bd   :  { %3559 = vmatprep.subr.mxu0 %v3516_v52 }
0x15be   :  { %3560 = vmatpush1.msra.mxu0 %v3515_v53 }
0x15bf   :  { %7332 = vmatmul.mubr.msk.f32.vlgmr.msra.gmra.mxu0 %vm112_vm0, %v3518_v54  ;;  %3731 = vmatprep.subr.mxu0 %v3690_v55  ;;  %v7345_v55 = vld [vmem:[%s8540_s3 + $0x18] sm:$0xff] }
0x15c0   :  { %3732 = vmatpush1.msra.mxu0 %v3689_v56  ;;  %3765 = vmatprep.mubr.f32.mxu0 %v7576_v0 }
0x15c3   :  { %7335 = vmatmul.mubr.msk.f32.vlgmr.msra.gmra.mxu0 %vm112_vm0, %v3691_v57 }
0x15c4   :  { %3931 = vmatprep.mubr.f32.mxu0 %v7576_v0 }
0x167f   :  { %v3595_v58 = vpop.f32.mrf.mxu0 }
0x1680   :  { %v3596_v60 = vadd.f32 %v3595_v58, %v3524_v59 }
0x1681   :  { %v3597_v61 = vpop.f32.mrf.mxu0 }
0x1682   :  { %v3598_v62 = vadd.f32 %v3597_v61, %v3524_v59  ;;  %v3600_v4 = vadd.f32 %v3596_v60, %v8057_v22  ;;  %v7340_v22 = vld [vmem:[%s8540_s3 + $0x10] sm:$0xff]  ;;  %v7349_v60 = vld [vmem:[%s8540_s3 + $0x28] sm:$0xff] }
0x1683   :  { %v3767_v1 = vpop.f32.mrf.mxu0 }
0x1684   :  { %v3601_v2 = vadd.f32 %v3598_v62, %v8059_v24  ;;  %v8112_v3 = vadd.f32 %v3767_v1, %v3696_v63 }
0x1685   :  { %v3769_v5 = vpop.f32.mrf.mxu0 }
0x1686   :  { %v8115_v6 = vadd.f32 %v3769_v5, %v3696_v63  ;;  %3772 = vrot.lane.b32.xlu0 %v8112_v3, %s7578_s10  ;;  %3644 = vmatprep.subr.mxu1 %v3601_v2 }
0x1687   :  { %3645 = vmatpush1.msra.mxu1 %v3600_v4 }
0x1688   :  { %3774 = vrot.lane.b32.xlu1 %v8115_v6, %s7578_s10  ;;  %3897 = vmatprep.subr.mxu0 %v8115_v6 }
0x1689   :  { %3898 = vmatpush1.msra.mxu0 %v8112_v3  ;;  %7334 = vmatmul.mubr.msk.f32.vlgmr.msra.gmra.mxu1 %vm112_vm0, %v3603_v7 }
0x168a   :  { %3780 = vrot.lane.b32.xlu0 %v8112_v3, %s7579_s13  ;;  %3857 = vmatprep.mubr.f32.mxu1 %v7576_v0 }
0x168b   :  { %7339 = vmatmul.mubr.msk.f32.vlgmr.msra.gmra.mxu0 %vm112_vm0, %v7336_v8 }
0x168c   :  { %3782 = vrot.lane.b32.xlu1 %v8115_v6, %s7579_s13  ;;  %4099 = vmatprep.mubr.f32.mxu0 %v7576_v0 }
0x168e   :  { %4018 = vperm.xlu0 %7458, %v4015_v9  }
0x1690   :  { %4029 = vperm.xlu1 %7459, %v4026_v10  }
0x16f8   :  { %v3773_v11 = vpop.permute.xlu0 %3772 }
0x16fa   :  { %v3775_v12 = vpop.permute.xlu1 %3774 }
0x16fb   :  { %v3777_v13 = vsel %vm191_vm1, %v3775_v12, %v3773_v11  ;;  %v3776_v14 = vsel %vm191_vm1, %v3773_v11, %v3775_v12 }
0x16fc   :  { %3823 = vmatprep.subr.mxu1 %v3776_v14  ;;  %v3781_v18 = vpop.permute.xlu0 %3780 }
0x16fd   :  { %7337 = vmatpush1.msk.msra.mxu1 %vm91_vm2, %v3777_v13  ;;  %v4361_v13 = vld [vmem:[#allocation7 + $0x8] sm:$0xff] }
0x16fe   :  { %v3783_v19 = vpop.permute.xlu1 %3782  ;;  %7338 = vmatmul.mubr.msk.f32.vlgmr.msra.gmra.mxu1 %vm112_vm0, %v3789_v16 }
0x16ff   :  { %v3784_v20 = vsel %vm200_vm3, %v3781_v18, %v3783_v19  ;;  %v3785_v21 = vsel %vm200_vm3, %v3783_v19, %v3781_v18  ;;  %4006 = vmatprep.mubr.f32.mxu1 %v7576_v0 }
0x1700   :  { %7341 = vmatprep.subr.msk.mxu1 %vm98_vm4, %v3785_v21 }
0x1701   :  { %3973 = vmatpush1.msra.mxu1 %v3784_v20 }
0x1702   :  { %7342 = vmatmul.mubr.msk.f32.vlgmr.msra.gmra.mxu1 %vm112_vm0, %v7340_v22 }
0x1703   :  { %4193 = vmatprep.mubr.f32.mxu1 %v7576_v0 }
0x1709   :  { %v4019_v34 = vpop.permute.xlu0 %4018 }
0x170b   :  { %v4030_v41 = vpop.permute.xlu1 %4029 }
0x1749   :  { %v8162_v23 = vpop.f32.mrf.mxu1 }
0x174b   :  { %v8164_v24 = vpop.f32.mrf.mxu1  ;;  %v3933_v25 = vpop.f32.mrf.mxu0 }
0x174d   :  { %v3935_v28 = vpop.f32.mrf.mxu0 }
0x17be   :  { %v3859_v26 = vpop.f32.mrf.mxu1 }
0x17bf   :  { %v3934_v29 = vadd.f32 %v3933_v25, %v3859_v26  ;;  %v7355_v25 = vld [vmem:[%s8540_s3 + $0x38] sm:$0xff]  ;;  %v7363_v26 = vld [vmem:[%s8541_s4 + $0x10] sm:$0xff] }
0x17c0   :  { %v3861_v27 = vpop.f32.mrf.mxu1 }
0x17c1   :  { %v3936_v31 = vadd.f32 %v3935_v28, %v3861_v27  ;;  %v7364_v27 = vld [vmem:[%s8543_s6 + $0x10] sm:$0xff]  ;;  %v4781_v28 = vld [vmem:[%s8545_s8] sm:$0xff] }
0x17c2   :  { %v4008_v30 = vpop.f32.mrf.mxu1 }
0x17c3   :  { %v4013_v32 = vadd.f32 %v4008_v30, %v3934_v29  ;;  %v7367_v29 = vld [vmem:[%s8539_s2 + $0x8] sm:$0xff] }
0x17c4   :  { %v4010_v33 = vpop.f32.mrf.mxu1 }
0x17c5   :  { %v4014_v35 = vadd.f32 %v4010_v33, %v3936_v31  ;;  %v4021_v36 = vadd.f32 %v4019_v34, %v4013_v32 }
0x17c7   :  { %v4022_v37 = vadd.f32 %v4019_v34, %v4014_v35  ;;  %v4023_v39 = vmax.f32 %v4021_v36, 0.0  ;;  %v7356_v34 = vld [vmem:[%s8540_s3 + $0x30] sm:$0xff] }
0x17c9   :  { %v4024_v38 = vmax.f32 %v4022_v37, 0.0 }
0x17cb   :  { %4065 = vmatprep.subr.mxu0 %v4024_v38 }
0x17cc   :  { %4066 = vmatpush1.msra.mxu0 %v4023_v39  ;;  %v7360_v39 = vld [vmem:[%s8540_s3 + $0x40] sm:$0xff] }
0x17cd   :  { %7343 = vmatmul.mubr.msk.f32.vlgmr.msra.gmra.mxu0 %vm112_vm0, %v4025_v40 }
0x17ce   :  { %4267 = vmatprep.mubr.f32.mxu0 %v7576_v0 }
0x188d   :  { %v4101_v42 = vpop.f32.mrf.mxu0 }
0x188e   :  { %v4102_v43 = vadd.f32 %v4101_v42, %v4030_v41 }
0x188f   :  { %v4103_v44 = vpop.f32.mrf.mxu0 }
0x1890   :  { %v4106_v45 = vadd.f32 %v4102_v43, %v8112_v3  ;;  %v4104_v46 = vadd.f32 %v4103_v44, %v4030_v41 }
0x1892   :  { %v4107_v47 = vadd.f32 %v4104_v46, %v8115_v6  ;;  %4108 = vrot.lane.b32.xlu0 %v4106_v45, %s7580_s23 }
0x1894   :  { %4110 = vrot.lane.b32.xlu1 %v4107_v47, %s7580_s23  ;;  %4233 = vmatprep.subr.mxu0 %v4107_v47 }
0x1895   :  { %4234 = vmatpush1.msra.mxu0 %v4106_v45 }
0x1896   :  { %4116 = vrot.lane.b32.xlu0 %v4106_v45, %s7581_s26  ;;  %7348 = vmatmul.mubr.msk.f32.vlgmr.msra.gmra.mxu0 %vm112_vm0, %v7344_v48 }
0x1897   :  { %4435 = vmatprep.mubr.f32.mxu0 %v7576_v0 }
0x1898   :  { %4118 = vrot.lane.b32.xlu1 %v4107_v47, %s7581_s26 }
0x189a   :  { %4354 = vperm.xlu0 %7458, %v7352_v49  }
0x189c   :  { %4365 = vperm.xlu1 %7459, %v7353_v50  }
0x1904   :  { %v4109_v51 = vpop.permute.xlu0 %4108 }
0x1906   :  { %v4111_v52 = vpop.permute.xlu1 %4110 }
0x1907   :  { %v4113_v53 = vsel %vm531_vm5, %v4111_v52, %v4109_v51  ;;  %v4112_v54 = vsel %vm531_vm5, %v4109_v51, %v4111_v52 }
0x1908   :  { %4159 = vmatprep.subr.mxu1 %v4112_v54  ;;  %v4117_v56 = vpop.permute.xlu0 %4116 }
0x1909   :  { %7346 = vmatpush1.msk.msra.mxu1 %vm93_vm6, %v4113_v53 }
0x190a   :  { %v4119_v57 = vpop.permute.xlu1 %4118  ;;  %7347 = vmatmul.mubr.msk.f32.vlgmr.msra.gmra.mxu1 %vm112_vm0, %v7345_v55  ;;  %v4697_v55 = vld [vmem:[#allocation7 + $0x10] sm:$0xff] }
0x190b   :  { %v4120_v58 = vsel %vm540_vm7, %v4117_v56, %v4119_v57  ;;  %v4121_v59 = vsel %vm540_vm7, %v4119_v57, %v4117_v56  ;;  %4342 = vmatprep.mubr.f32.mxu1 %v7576_v0 }
0x190c   :  { %7350 = vmatprep.subr.msk.mxu1 %vm100_vm8, %v4121_v59 }
0x190d   :  { %4309 = vmatpush1.msra.mxu1 %v4120_v58 }
0x190e   :  { %7351 = vmatmul.mubr.msk.f32.vlgmr.msra.gmra.mxu1 %vm112_vm0, %v7349_v60 }
0x190f   :  { %4529 = vmatprep.mubr.f32.mxu1 %v7576_v0 }
0x1915   :  { %v4355_v7 = vpop.permute.xlu0 %4354 }
0x1917   :  { %v4366_v14 = vpop.permute.xlu1 %4365 }
0x1956   :  { %v4269_v61 = vpop.f32.mrf.mxu0 }
0x1958   :  { %v4271_v1 = vpop.f32.mrf.mxu0 }
0x19ca   :  { %v4195_v62 = vpop.f32.mrf.mxu1 }
0x19cb   :  { %v4270_v2 = vadd.f32 %v4269_v61, %v4195_v62 }
0x19cc   :  { %v4197_v63 = vpop.f32.mrf.mxu1 }
0x19cd   :  { %v4272_v4 = vadd.f32 %v4271_v1, %v4197_v63  ;;  %v4780_v63 = vld [vmem:[#allocation8] sm:$0xff] }
0x19ce   :  { %v4344_v3 = vpop.f32.mrf.mxu1 }
0x19cf   :  { %v4349_v5 = vadd.f32 %v4344_v3, %v4270_v2 }
0x19d0   :  { %v4346_v6 = vpop.f32.mrf.mxu1 }
0x19d1   :  { %v4350_v8 = vadd.f32 %v4346_v6, %v4272_v4  ;;  %v4357_v9 = vadd.f32 %v4355_v7, %v4349_v5  ;;  %v4864_v6 = vld [vmem:[#allocation5 + $0x8] sm:$0xff] }
0x19d3   :  { %v4358_v10 = vadd.f32 %v4355_v7, %v4350_v8  ;;  %v4359_v12 = vmax.f32 %v4357_v9, 0.0 }
0x19d5   :  { %v4360_v11 = vmax.f32 %v4358_v10, 0.0 }
0x19d7   :  { %4401 = vmatprep.subr.mxu0 %v4360_v11 }
0x19d8   :  { %4402 = vmatpush1.msra.mxu0 %v4359_v12  ;;  %v7369_v12 = vld [vmem:[%s8540_s3 + $0x50] sm:$0xff] }
0x19d9   :  { %7354 = vmatmul.mubr.msk.f32.vlgmr.msra.gmra.mxu0 %vm112_vm0, %v4361_v13  ;;  %v7377_v13 = vld [vmem:[%s8541_s4 + $0x18] sm:$0xff] }
0x19da   :  { %4603 = vmatprep.mubr.f32.mxu0 %v7576_v0 }
0x1a99   :  { %v4437_v16 = vpop.f32.mrf.mxu0 }
0x1a9a   :  { %v4438_v18 = vadd.f32 %v4437_v16, %v4366_v14 }
0x1a9b   :  { %v4439_v19 = vpop.f32.mrf.mxu0 }
0x1a9c   :  { %v8209_v20 = vadd.f32 %v4438_v18, %v4106_v45  ;;  %v4440_v21 = vadd.f32 %v4439_v19, %v4366_v14  ;;  %v7378_v14 = vld [vmem:[%s8543_s6 + $0x18] sm:$0xff] }
0x1a9e   :  { %v4443_v22 = vadd.f32 %v4440_v21, %v4107_v47  ;;  %4444 = vrot.lane.b32.xlu0 %v8209_v20, %s7582_s12  ;;  %v7370_v21 = vld [vmem:[%s8540_s3 + $0x48] sm:$0xff] }
0x1aa0   :  { %4446 = vrot.lane.b32.xlu1 %v4443_v22, %s7582_s12  ;;  %4569 = vmatprep.subr.mxu0 %v4443_v22 }
0x1aa1   :  { %4570 = vmatpush1.msra.mxu0 %v8209_v20 }
0x1aa2   :  { %4452 = vrot.lane.b32.xlu0 %v8209_v20, %s7583_s16  ;;  %7359 = vmatmul.mubr.msk.f32.vlgmr.msra.gmra.mxu0 %vm112_vm0, %v7355_v25 }
0x1aa3   :  { %4771 = vmatprep.mubr.f32.mxu0 %v7576_v0 }
0x1aa4   :  { %4454 = vrot.lane.b32.xlu1 %v4443_v22, %s7583_s16 }
0x1aa6   :  { %4690 = vperm.xlu0 %7458, %v7363_v26  }
0x1aa8   :  { %4701 = vperm.xlu1 %7459, %v7364_v27  }
0x1aaa   :  { %4784 = vperm.xlu0 %7458, %v4781_v28   ;;  %v7374_v28 = vld [vmem:[%s8540_s3 + $0x58] sm:$0xff] }
0x1aac   :  { %4868 = vperm.xlu1 %7459, %v7367_v29  }
0x1b10   :  { %v4445_v30 = vpop.permute.xlu0 %4444 }
0x1b12   :  { %v4447_v31 = vpop.permute.xlu1 %4446 }
0x1b13   :  { %v4449_v32 = vsel %vm875_vm9, %v4447_v31, %v4445_v30  ;;  %v4448_v33 = vsel %vm875_vm9, %v4445_v30, %v4447_v31 }
0x1b14   :  { %4495 = vmatprep.subr.mxu1 %v4448_v33  ;;  %v4453_v35 = vpop.permute.xlu0 %4452 }
0x1b15   :  { %7357 = vmatpush1.msk.msra.mxu1 %vm95_vm10, %v4449_v32 }
0x1b16   :  { %v4455_v36 = vpop.permute.xlu1 %4454  ;;  %7358 = vmatmul.mubr.msk.f32.vlgmr.msra.gmra.mxu1 %vm112_vm0, %v7356_v34 }
0x1b17   :  { %v4456_v37 = vsel %vm884_vm11, %v4453_v35, %v4455_v36  ;;  %v4457_v38 = vsel %vm884_vm11, %v4455_v36, %v4453_v35  ;;  %4678 = vmatprep.mubr.f32.mxu1 %v7576_v0 }
0x1b18   :  { %7361 = vmatprep.subr.msk.mxu1 %vm102_vm12, %v4457_v38 }
0x1b19   :  { %4645 = vmatpush1.msra.mxu1 %v4456_v37 }
0x1b1a   :  { %7362 = vmatmul.mubr.msk.f32.vlgmr.msra.gmra.mxu1 %vm112_vm0, %v7360_v39 }
0x1b1b   :  { %4854 = vmatprep.mubr.f32.mxu1 %v7576_v0 }
0x1b21   :  { %v4691_v49 = vpop.permute.xlu0 %4690 }
0x1b23   :  { %v4702_v57 = vpop.permute.xlu1 %4701 }
0x1b25   :  { %v4785_v1 = vpop.permute.xlu0 %4784 }
0x1b27   :  { %v4869_v7 = vpop.permute.xlu1 %4868 }
0x1b62   :  { %v4605_v40 = vpop.f32.mrf.mxu0 }
0x1b64   :  { %v4607_v43 = vpop.f32.mrf.mxu0 }
0x1bd6   :  { %v4531_v41 = vpop.f32.mrf.mxu1 }
0x1bd7   :  { %v4606_v44 = vadd.f32 %v4605_v40, %v4531_v41 }
0x1bd8   :  { %v4533_v42 = vpop.f32.mrf.mxu1 }
0x1bd9   :  { %v4608_v46 = vadd.f32 %v4607_v43, %v4533_v42 }
0x1bda   :  { %v4680_v45 = vpop.f32.mrf.mxu1 }
0x1bdb   :  { %v4685_v47 = vadd.f32 %v4680_v45, %v4606_v44  ;;  %v5198_v44 = vld [vmem:[#allocation7 + $0x18] sm:$0xff] }
0x1bdc   :  { %v4682_v48 = vpop.f32.mrf.mxu1 }
0x1bdd   :  { %v4686_v50 = vadd.f32 %v4682_v48, %v4608_v46  ;;  %v4693_v51 = vadd.f32 %v4691_v49, %v4685_v47 }
0x1bdf   :  { %v4694_v52 = vadd.f32 %v4691_v49, %v4686_v50  ;;  %v4695_v54 = vmax.f32 %v4693_v51, 0.0 }
0x1be1   :  { %v4696_v53 = vmax.f32 %v4694_v52, 0.0  ;;  %v7380_v52 = vld [vmem:[%s8540_s3 + $0x68] sm:$0xff] }
0x1be3   :  { %4737 = vmatprep.subr.mxu0 %v4696_v53  ;;  %v7388_v53 = vld [vmem:[%s8541_s4 + $0x20] sm:$0xff] }
0x1be4   :  { %4738 = vmatpush1.msra.mxu0 %v4695_v54  ;;  %v7389_v54 = vld [vmem:[%s8543_s6 + $0x20] sm:$0xff] }
0x1be5   :  { %7365 = vmatmul.mubr.msk.f32.vlgmr.msra.gmra.mxu0 %vm112_vm0, %v4697_v55 }
0x1be6   :  { %4938 = vmatprep.mubr.f32.mxu0 %v7576_v0 }
0x1ca5   :  { %v4773_v56 = vpop.f32.mrf.mxu0 }
0x1ca6   :  { %v4774_v58 = vadd.f32 %v4773_v56, %v4702_v57 }
0x1ca7   :  { %v4775_v59 = vpop.f32.mrf.mxu0 }
0x1ca8   :  { %v4776_v60 = vadd.f32 %v4775_v59, %v4702_v57  ;;  %v4778_v62 = vadd.f32 %v4774_v58, %v8209_v20  ;;  %v7381_v59 = vld [vmem:[%s8540_s3 + $0x60] sm:$0xff] }
0x1caa   :  { %v4779_v61 = vadd.f32 %v4776_v60, %v4443_v22 }
0x1cac   :  { %4820 = vmatprep.subr.mxu1 %v4779_v61 }
0x1cad   :  { %4821 = vmatpush1.msra.mxu1 %v4778_v62 }
0x1cae   :  { %7366 = vmatmul.mubr.msk.f32.vlgmr.msra.gmra.mxu1 %vm112_vm0, %v4780_v63 }
0x1caf   :  { %5030 = vmatprep.mubr.f32.mxu1 %v7576_v0 }
0x1d6e   :  { %v4856_v2 = vpop.f32.mrf.mxu1 }
0x1d6f   :  { %v4857_v3 = vadd.f32 %v4856_v2, %v4785_v1 }
0x1d70   :  { %v4858_v4 = vpop.f32.mrf.mxu1 }
0x1d71   :  { %4862 = vst [vmem:[#allocation10 + $0x10] sm:$0xff] %v4857_v3  ;;  %v4859_v5 = vadd.f32 %v4858_v4, %v4785_v1  ;;  %v7385_v1 = vld [vmem:[%s8540_s3 + $0x70] sm:$0xff] }
0x1d73   :  { %4863 = vst [vmem:[#allocation10 + $0x18] sm:$0xff] %v4859_v5  ;;  %4904 = vmatprep.subr.mxu0 %v4859_v5 }
0x1d74   :  { %4905 = vmatpush1.msra.mxu0 %v4857_v3 }
0x1d75   :  { %7368 = vmatmul.mubr.msk.f32.vlgmr.msra.gmra.mxu0 %vm112_vm0, %v4864_v6 }
0x1d76   :  { %5104 = vmatprep.mubr.f32.mxu0 %v7576_v0 }
0x1e35   :  { %v4940_v8 = vpop.f32.mrf.mxu0 }
0x1e36   :  { %v4941_v9 = vadd.f32 %v4940_v8, %v4869_v7 }
0x1e37   :  { %v4942_v10 = vpop.f32.mrf.mxu0 }
0x1e38   :  { %v4943_v11 = vadd.f32 %v4942_v10, %v4869_v7  ;;  %4945 = vrot.lane.b32.xlu0 %v4941_v9, %s7578_s10 }
0x1e3a   :  { %4947 = vrot.lane.b32.xlu1 %v4943_v11, %s7578_s10  ;;  %5070 = vmatprep.subr.mxu0 %v4943_v11 }
0x1e3b   :  { %5071 = vmatpush1.msra.mxu0 %v4941_v9 }
0x1e3c   :  { %4953 = vrot.lane.b32.xlu0 %v4941_v9, %s7579_s13  ;;  %7373 = vmatmul.mubr.msk.f32.vlgmr.msra.gmra.mxu0 %vm112_vm0, %v7369_v12 }
0x1e3d   :  { %5272 = vmatprep.mubr.f32.mxu0 %v7576_v0 }
0x1e3e   :  { %4955 = vrot.lane.b32.xlu1 %v4943_v11, %s7579_s13 }
0x1e40   :  { %5191 = vperm.xlu0 %7458, %v7377_v13  }
0x1e42   :  { %5202 = vperm.xlu1 %7459, %v7378_v14  }
0x1eaa   :  { %v4946_v16 = vpop.permute.xlu0 %4945 }
0x1eac   :  { %v4948_v18 = vpop.permute.xlu1 %4947 }
0x1ead   :  { %v4950_v19 = vsel %vm191_vm1, %v4948_v18, %v4946_v16  ;;  %v4949_v20 = vsel %vm191_vm1, %v4946_v16, %v4948_v18 }
0x1eae   :  { %4996 = vmatprep.subr.mxu1 %v4949_v20  ;;  %v4954_v22 = vpop.permute.xlu0 %4953 }
0x1eaf   :  { %7371 = vmatpush1.msk.msra.mxu1 %vm91_vm2, %v4950_v19  ;;  %v5534_v19 = vld [vmem:[#allocation7 + $0x20] sm:$0xff] }
0x1eb0   :  { %v4956_v25 = vpop.permute.xlu1 %4955  ;;  %7372 = vmatmul.mubr.msk.f32.vlgmr.msra.gmra.mxu1 %vm112_vm0, %v7370_v21 }
0x1eb1   :  { %v4957_v26 = vsel %vm200_vm3, %v4954_v22, %v4956_v25  ;;  %v4958_v27 = vsel %vm200_vm3, %v4956_v25, %v4954_v22  ;;  %5179 = vmatprep.mubr.f32.mxu1 %v7576_v0 }
0x1eb2   :  { %7375 = vmatprep.subr.msk.mxu1 %vm98_vm4, %v4958_v27 }
0x1eb3   :  { %5146 = vmatpush1.msra.mxu1 %v4957_v26 }
0x1eb4   :  { %7376 = vmatmul.mubr.msk.f32.vlgmr.msra.gmra.mxu1 %vm112_vm0, %v7374_v28 }
0x1eb5   :  { %5366 = vmatprep.mubr.f32.mxu1 %v7576_v0 }
0x1ebb   :  { %v5192_v38 = vpop.permute.xlu0 %5191 }
0x1ebd   :  { %v5203_v45 = vpop.permute.xlu1 %5202 }
0x1efc   :  { %v5106_v29 = vpop.f32.mrf.mxu0 }
0x1efe   :  { %v5108_v32 = vpop.f32.mrf.mxu0 }
0x1f70   :  { %v5032_v30 = vpop.f32.mrf.mxu1 }
0x1f71   :  { %v5107_v33 = vadd.f32 %v5106_v29, %v5032_v30  ;;  %v7391_v29 = vld [vmem:[%s8540_s3 + $0x80] sm:$0xff]  ;;  %v7399_v30 = vld [vmem:[%s8541_s4 + $0x28] sm:$0xff] }
0x1f72   :  { %v5034_v31 = vpop.f32.mrf.mxu1 }
0x1f73   :  { %v5109_v35 = vadd.f32 %v5108_v32, %v5034_v31  ;;  %v7400_v31 = vld [vmem:[%s8543_s6 + $0x28] sm:$0xff] }
0x1f74   :  { %v5181_v34 = vpop.f32.mrf.mxu1  ;;  %v7402_v32 = vld [vmem:[%s8545_s8 + $0x8] sm:$0xff] }
0x1f75   :  { %v5186_v36 = vadd.f32 %v5181_v34, %v5107_v33  ;;  %v7404_v33 = vld [vmem:[%s8539_s2 + $0x10] sm:$0xff] }
0x1f76   :  { %v5183_v37 = vpop.f32.mrf.mxu1 }
0x1f77   :  { %v5187_v39 = vadd.f32 %v5183_v37, %v5109_v35  ;;  %v5194_v40 = vadd.f32 %v5192_v38, %v5186_v36 }
0x1f79   :  { %v5195_v41 = vadd.f32 %v5192_v38, %v5187_v39  ;;  %v5196_v43 = vmax.f32 %v5194_v40, 0.0  ;;  %v7392_v38 = vld [vmem:[%s8540_s3 + $0x78] sm:$0xff] }
0x1f7b   :  { %v5197_v42 = vmax.f32 %v5195_v41, 0.0 }
0x1f7d   :  { %5238 = vmatprep.subr.mxu0 %v5197_v42 }
0x1f7e   :  { %5239 = vmatpush1.msra.mxu0 %v5196_v43  ;;  %v7396_v43 = vld [vmem:[%s8540_s3 + $0x88] sm:$0xff] }
0x1f7f   :  { %7379 = vmatmul.mubr.msk.f32.vlgmr.msra.gmra.mxu0 %vm112_vm0, %v5198_v44 }
0x1f80   :  { %5440 = vmatprep.mubr.f32.mxu0 %v7576_v0 }
0x203f   :  { %v5274_v46 = vpop.f32.mrf.mxu0 }
0x2040   :  { %v5275_v47 = vadd.f32 %v5274_v46, %v5203_v45 }
0x2041   :  { %v5276_v48 = vpop.f32.mrf.mxu0 }
0x2042   :  { %v5279_v49 = vadd.f32 %v5275_v47, %v4941_v9  ;;  %v5277_v50 = vadd.f32 %v5276_v48, %v5203_v45 }
0x2044   :  { %v5280_v51 = vadd.f32 %v5277_v50, %v4943_v11  ;;  %5281 = vrot.lane.b32.xlu0 %v5279_v49, %s7580_s23 }
0x2046   :  { %5283 = vrot.lane.b32.xlu1 %v5280_v51, %s7580_s23  ;;  %5406 = vmatprep.subr.mxu0 %v5280_v51 }
0x2047   :  { %5407 = vmatpush1.msra.mxu0 %v5279_v49 }
0x2048   :  { %5289 = vrot.lane.b32.xlu0 %v5279_v49, %s7581_s26  ;;  %7384 = vmatmul.mubr.msk.f32.vlgmr.msra.gmra.mxu0 %vm112_vm0, %v7380_v52 }
0x2049   :  { %5608 = vmatprep.mubr.f32.mxu0 %v7576_v0 }
0x204a   :  { %5291 = vrot.lane.b32.xlu1 %v5280_v51, %s7581_s26 }
0x204c   :  { %5527 = vperm.xlu0 %7458, %v7388_v53  }
0x204e   :  { %5538 = vperm.xlu1 %7459, %v7389_v54  }
0x20b6   :  { %v5282_v55 = vpop.permute.xlu0 %5281 }
0x20b8   :  { %v5284_v56 = vpop.permute.xlu1 %5283 }
0x20b9   :  { %v5286_v57 = vsel %vm531_vm5, %v5284_v56, %v5282_v55  ;;  %v5285_v58 = vsel %vm531_vm5, %v5282_v55, %v5284_v56 }
0x20ba   :  { %5332 = vmatprep.subr.mxu1 %v5285_v58  ;;  %v5290_v60 = vpop.permute.xlu0 %5289 }
0x20bb   :  { %7382 = vmatpush1.msk.msra.mxu1 %vm93_vm6, %v5286_v57 }
0x20bc   :  { %v5292_v61 = vpop.permute.xlu1 %5291  ;;  %7383 = vmatmul.mubr.msk.f32.vlgmr.msra.gmra.mxu1 %vm112_vm0, %v7381_v59  ;;  %v5870_v59 = vld [vmem:[#allocation7 + $0x28] sm:$0xff] }
0x20bd   :  { %v5293_v62 = vsel %vm540_vm7, %v5290_v60, %v5292_v61  ;;  %v5294_v63 = vsel %vm540_vm7, %v5292_v61, %v5290_v60  ;;  %5515 = vmatprep.mubr.f32.mxu1 %v7576_v0 }
0x20be   :  { %7386 = vmatprep.subr.msk.mxu1 %vm100_vm8, %v5294_v63 }
0x20bf   :  { %5482 = vmatpush1.msra.mxu1 %v5293_v62 }
0x20c0   :  { %7387 = vmatmul.mubr.msk.f32.vlgmr.msra.gmra.mxu1 %vm112_vm0, %v7385_v1 }
0x20c1   :  { %5702 = vmatprep.mubr.f32.mxu1 %v7576_v0 }
0x20c7   :  { %v5528_v11 = vpop.permute.xlu0 %5527 }
0x20c9   :  { %v5539_v20 = vpop.permute.xlu1 %5538 }
0x2108   :  { %v5442_v2 = vpop.f32.mrf.mxu0 }
0x210a   :  { %v5444_v5 = vpop.f32.mrf.mxu0 }
0x217c   :  { %v5368_v3 = vpop.f32.mrf.mxu1 }
0x217d   :  { %v5443_v6 = vadd.f32 %v5442_v2, %v5368_v3 }
0x217e   :  { %v5370_v4 = vpop.f32.mrf.mxu1 }
0x217f   :  { %v5445_v8 = vadd.f32 %v5444_v5, %v5370_v4  ;;  %v5953_v4 = vld [vmem:[#allocation8 + $0x8] sm:$0xff] }
0x2180   :  { %v5517_v7 = vpop.f32.mrf.mxu1 }
0x2181   :  { %v5522_v9 = vadd.f32 %v5517_v7, %v5443_v6 }
0x2182   :  { %v5519_v10 = vpop.f32.mrf.mxu1 }
0x2183   :  { %v5523_v12 = vadd.f32 %v5519_v10, %v5445_v8  ;;  %v5530_v13 = vadd.f32 %v5528_v11, %v5522_v9  ;;  %v6037_v10 = vld [vmem:[#allocation5 + $0x10] sm:$0xff] }
0x2185   :  { %v5531_v14 = vadd.f32 %v5528_v11, %v5523_v12  ;;  %v5532_v18 = vmax.f32 %v5530_v13, 0.0 }
0x2187   :  { %v5533_v16 = vmax.f32 %v5531_v14, 0.0 }
0x2189   :  { %5574 = vmatprep.subr.mxu0 %v5533_v16 }
0x218a   :  { %5575 = vmatpush1.msra.mxu0 %v5532_v18  ;;  %v7406_v18 = vld [vmem:[%s8540_s3 + $0x98] sm:$0xff] }
0x218b   :  { %7390 = vmatmul.mubr.msk.f32.vlgmr.msra.gmra.mxu0 %vm112_vm0, %v5534_v19  ;;  %v7414_v19 = vld [vmem:[%s8541_s4 + $0x30] sm:$0xff] }
0x218c   :  { %5776 = vmatprep.mubr.f32.mxu0 %v7576_v0 }
0x224b   :  { %v5610_v21 = vpop.f32.mrf.mxu0 }
0x224c   :  { %v5611_v22 = vadd.f32 %v5610_v21, %v5539_v20 }
0x224d   :  { %v5612_v25 = vpop.f32.mrf.mxu0 }
0x224e   :  { %v8342_v26 = vadd.f32 %v5611_v22, %v5279_v49  ;;  %v5613_v27 = vadd.f32 %v5612_v25, %v5539_v20  ;;  %v7415_v20 = vld [vmem:[%s8543_s6 + $0x30] sm:$0xff] }
0x2250   :  { %v5616_v28 = vadd.f32 %v5613_v27, %v5280_v51  ;;  %5617 = vrot.lane.b32.xlu0 %v8342_v26, %s7582_s12  ;;  %v7407_v27 = vld [vmem:[%s8540_s3 + $0x90] sm:$0xff] }
0x2252   :  { %5619 = vrot.lane.b32.xlu1 %v5616_v28, %s7582_s12  ;;  %5742 = vmatprep.subr.mxu0 %v5616_v28 }
0x2253   :  { %5743 = vmatpush1.msra.mxu0 %v8342_v26 }
0x2254   :  { %5625 = vrot.lane.b32.xlu0 %v8342_v26, %s7583_s16  ;;  %7395 = vmatmul.mubr.msk.f32.vlgmr.msra.gmra.mxu0 %vm112_vm0, %v7391_v29 }
0x2255   :  { %5944 = vmatprep.mubr.f32.mxu0 %v7576_v0 }
0x2256   :  { %5627 = vrot.lane.b32.xlu1 %v5616_v28, %s7583_s16 }
0x2258   :  { %5863 = vperm.xlu0 %7458, %v7399_v30  }
0x225a   :  { %5874 = vperm.xlu1 %7459, %v7400_v31  }
0x225c   :  { %5957 = vperm.xlu0 %7458, %v7402_v32   ;;  %v7411_v32 = vld [vmem:[%s8540_s3 + $0xa0] sm:$0xff] }
0x225e   :  { %6041 = vperm.xlu1 %7459, %v7404_v33  }
0x22c2   :  { %v5618_v34 = vpop.permute.xlu0 %5617 }
0x22c4   :  { %v5620_v35 = vpop.permute.xlu1 %5619 }
0x22c5   :  { %v5622_v36 = vsel %vm875_vm9, %v5620_v35, %v5618_v34  ;;  %v5621_v37 = vsel %vm875_vm9, %v5618_v34, %v5620_v35 }
0x22c6   :  { %5668 = vmatprep.subr.mxu1 %v5621_v37  ;;  %v5626_v39 = vpop.permute.xlu0 %5625 }
0x22c7   :  { %7393 = vmatpush1.msk.msra.mxu1 %vm95_vm10, %v5622_v36 }
0x22c8   :  { %v5628_v40 = vpop.permute.xlu1 %5627  ;;  %7394 = vmatmul.mubr.msk.f32.vlgmr.msra.gmra.mxu1 %vm112_vm0, %v7392_v38 }
0x22c9   :  { %v5629_v41 = vsel %vm884_vm11, %v5626_v39, %v5628_v40  ;;  %v5630_v42 = vsel %vm884_vm11, %v5628_v40, %v5626_v39  ;;  %5851 = vmatprep.mubr.f32.mxu1 %v7576_v0 }
0x22ca   :  { %7397 = vmatprep.subr.msk.mxu1 %vm102_vm12, %v5630_v42 }
0x22cb   :  { %5818 = vmatpush1.msra.mxu1 %v5629_v41 }
0x22cc   :  { %7398 = vmatmul.mubr.msk.f32.vlgmr.msra.gmra.mxu1 %vm112_vm0, %v7396_v43 }
0x22cd   :  { %6027 = vmatprep.mubr.f32.mxu1 %v7576_v0 }
0x22d3   :  { %v5864_v53 = vpop.permute.xlu0 %5863 }
0x22d5   :  { %v5875_v61 = vpop.permute.xlu1 %5874 }
0x22d7   :  { %v5958_v5 = vpop.permute.xlu0 %5957 }
0x22d9   :  { %v6042_v11 = vpop.permute.xlu1 %6041 }
0x2314   :  { %v5778_v44 = vpop.f32.mrf.mxu0 }
0x2316   :  { %v5780_v47 = vpop.f32.mrf.mxu0 }
0x2388   :  { %v5704_v45 = vpop.f32.mrf.mxu1 }
0x2389   :  { %v5779_v48 = vadd.f32 %v5778_v44, %v5704_v45 }
0x238a   :  { %v5706_v46 = vpop.f32.mrf.mxu1 }
0x238b   :  { %v5781_v50 = vadd.f32 %v5780_v47, %v5706_v46 }
0x238c   :  { %v5853_v49 = vpop.f32.mrf.mxu1 }
0x238d   :  { %v5858_v51 = vadd.f32 %v5853_v49, %v5779_v48  ;;  %v6371_v48 = vld [vmem:[#allocation7 + $0x30] sm:$0xff] }
0x238e   :  { %v5855_v52 = vpop.f32.mrf.mxu1 }
0x238f   :  { %v5859_v54 = vadd.f32 %v5855_v52, %v5781_v50  ;;  %v5866_v55 = vadd.f32 %v5864_v53, %v5858_v51 }
0x2391   :  { %v5867_v56 = vadd.f32 %v5864_v53, %v5859_v54  ;;  %v5868_v58 = vmax.f32 %v5866_v55, 0.0 }
0x2393   :  { %v5869_v57 = vmax.f32 %v5867_v56, 0.0  ;;  %v7417_v56 = vld [vmem:[%s8540_s3 + $0xb0] sm:$0xff] }
0x2395   :  { %5910 = vmatprep.subr.mxu0 %v5869_v57  ;;  %v7425_v57 = vld [vmem:[%s8541_s4 + $0x38] sm:$0xff] }
0x2396   :  { %5911 = vmatpush1.msra.mxu0 %v5868_v58  ;;  %v7426_v58 = vld [vmem:[%s8543_s6 + $0x38] sm:$0xff] }
0x2397   :  { %7401 = vmatmul.mubr.msk.f32.vlgmr.msra.gmra.mxu0 %vm112_vm0, %v5870_v59 }
0x2398   :  { %6111 = vmatprep.mubr.f32.mxu0 %v7576_v0 }
0x2457   :  { %v5946_v60 = vpop.f32.mrf.mxu0 }
0x2458   :  { %v5947_v62 = vadd.f32 %v5946_v60, %v5875_v61 }
0x2459   :  { %v5948_v63 = vpop.f32.mrf.mxu0 }
0x245a   :  { %v5949_v1 = vadd.f32 %v5948_v63, %v5875_v61  ;;  %v5951_v3 = vadd.f32 %v5947_v62, %v8342_v26  ;;  %v7418_v63 = vld [vmem:[%s8540_s3 + $0xa8] sm:$0xff] }
0x245c   :  { %v5952_v2 = vadd.f32 %v5949_v1, %v5616_v28 }
0x245e   :  { %5993 = vmatprep.subr.mxu1 %v5952_v2 }
0x245f   :  { %5994 = vmatpush1.msra.mxu1 %v5951_v3 }
0x2460   :  { %7403 = vmatmul.mubr.msk.f32.vlgmr.msra.gmra.mxu1 %vm112_vm0, %v5953_v4 }
0x2461   :  { %6203 = vmatprep.mubr.f32.mxu1 %v7576_v0 }
0x2520   :  { %v6029_v6 = vpop.f32.mrf.mxu1 }
0x2521   :  { %v6030_v7 = vadd.f32 %v6029_v6, %v5958_v5 }
0x2522   :  { %v6031_v8 = vpop.f32.mrf.mxu1 }
0x2523   :  { %6035 = vst [vmem:[#allocation10 + $0x30] sm:$0xff] %v6030_v7  ;;  %v6032_v9 = vadd.f32 %v6031_v8, %v5958_v5  ;;  %v7422_v5 = vld [vmem:[%s8540_s3 + $0xb8] sm:$0xff] }
0x2525   :  { %6036 = vst [vmem:[#allocation10 + $0x38] sm:$0xff] %v6032_v9  ;;  %6077 = vmatprep.subr.mxu0 %v6032_v9 }
0x2526   :  { %6078 = vmatpush1.msra.mxu0 %v6030_v7 }
0x2527   :  { %7405 = vmatmul.mubr.msk.f32.vlgmr.msra.gmra.mxu0 %vm112_vm0, %v6037_v10 }
0x2528   :  { %6277 = vmatprep.mubr.f32.mxu0 %v7576_v0 }
0x25e7   :  { %v6113_v12 = vpop.f32.mrf.mxu0 }
0x25e8   :  { %v6114_v13 = vadd.f32 %v6113_v12, %v6042_v11 }
0x25e9   :  { %v6115_v14 = vpop.f32.mrf.mxu0 }
0x25ea   :  { %v6116_v16 = vadd.f32 %v6115_v14, %v6042_v11  ;;  %6118 = vrot.lane.b32.xlu0 %v6114_v13, %s7578_s10 }
0x25ec   :  { %6120 = vrot.lane.b32.xlu1 %v6116_v16, %s7578_s10  ;;  %6243 = vmatprep.subr.mxu0 %v6116_v16 }
0x25ed   :  { %6244 = vmatpush1.msra.mxu0 %v6114_v13 }
0x25ee   :  { %6126 = vrot.lane.b32.xlu0 %v6114_v13, %s7579_s13  ;;  %7410 = vmatmul.mubr.msk.f32.vlgmr.msra.gmra.mxu0 %vm112_vm0, %v7406_v18 }
0x25ef   :  { %6445 = vmatprep.mubr.f32.mxu0 %v7576_v0 }
0x25f0   :  { %6128 = vrot.lane.b32.xlu1 %v6116_v16, %s7579_s13 }
0x25f2   :  { %6364 = vperm.xlu0 %7458, %v7414_v19  }
0x25f4   :  { %6375 = vperm.xlu1 %7459, %v7415_v20  }
0x265c   :  { %v6119_v21 = vpop.permute.xlu0 %6118 }
0x265e   :  { %v6121_v22 = vpop.permute.xlu1 %6120 }
0x265f   :  { %v6123_v25 = vsel %vm191_vm1, %v6121_v22, %v6119_v21  ;;  %v6122_v26 = vsel %vm191_vm1, %v6119_v21, %v6121_v22 }
0x2660   :  { %6169 = vmatprep.subr.mxu1 %v6122_v26  ;;  %v6127_v28 = vpop.permute.xlu0 %6126 }
0x2661   :  { %7408 = vmatpush1.msk.msra.mxu1 %vm91_vm2, %v6123_v25  ;;  %v6707_v25 = vld [vmem:[#allocation7 + $0x38] sm:$0xff] }
0x2662   :  { %v6129_v29 = vpop.permute.xlu1 %6128  ;;  %7409 = vmatmul.mubr.msk.f32.vlgmr.msra.gmra.mxu1 %vm112_vm0, %v7407_v27 }
0x2663   :  { %v6130_v30 = vsel %vm200_vm3, %v6127_v28, %v6129_v29  ;;  %v6131_v31 = vsel %vm200_vm3, %v6129_v29, %v6127_v28  ;;  %6352 = vmatprep.mubr.f32.mxu1 %v7576_v0 }
0x2664   :  { %7412 = vmatprep.subr.msk.mxu1 %vm98_vm4, %v6131_v31 }
0x2665   :  { %6319 = vmatpush1.msra.mxu1 %v6130_v30 }
0x2666   :  { %7413 = vmatmul.mubr.msk.f32.vlgmr.msra.gmra.mxu1 %vm112_vm0, %v7411_v32 }
0x2667   :  { %6539 = vmatprep.mubr.f32.mxu1 %v7576_v0 }
0x266d   :  { %v6365_v42 = vpop.permute.xlu0 %6364 }
0x266f   :  { %v6376_v49 = vpop.permute.xlu1 %6375 }
0x26ae   :  { %v6279_v33 = vpop.f32.mrf.mxu0 }
0x26b0   :  { %v6281_v36 = vpop.f32.mrf.mxu0 }
0x2722   :  { %v6205_v34 = vpop.f32.mrf.mxu1 }
0x2723   :  { %v6280_v37 = vadd.f32 %v6279_v33, %v6205_v34  ;;  %v7428_v33 = vld [vmem:[%s8540_s3 + $0xc8] sm:$0xff]  ;;  %v7436_v34 = vld [vmem:[%s8541_s4 + $0x40] sm:$0xff] }
0x2724   :  { %v6207_v35 = vpop.f32.mrf.mxu1 }
0x2725   :  { %v6282_v39 = vadd.f32 %v6281_v36, %v6207_v35  ;;  %v7437_v35 = vld [vmem:[%s8543_s6 + $0x40] sm:$0xff]  ;;  %v7333_v36 = vld [vmem:[%s8545_s8 + $0x10] sm:$0xff] }
0x2726   :  { %v6354_v38 = vpop.f32.mrf.mxu1 }
0x2727   :  { %v6359_v40 = vadd.f32 %v6354_v38, %v6280_v37 }
0x2728   :  { %v6356_v41 = vpop.f32.mrf.mxu1 }
0x2729   :  { %v6360_v43 = vadd.f32 %v6356_v41, %v6282_v39  ;;  %v6367_v44 = vadd.f32 %v6365_v42, %v6359_v40  ;;  %v7429_v41 = vld [vmem:[%s8540_s3 + $0xc0] sm:$0xff] }
0x272b   :  { %v6368_v45 = vadd.f32 %v6365_v42, %v6360_v43  ;;  %v6369_v47 = vmax.f32 %v6367_v44, 0.0 }
0x272d   :  { %v6370_v46 = vmax.f32 %v6368_v45, 0.0 }
0x272f   :  { %6411 = vmatprep.subr.mxu0 %v6370_v46  ;;  %v7433_v46 = vld [vmem:[%s8540_s3 + $0xd0] sm:$0xff]  ;;  %s7584_s3 = smov [#allocation10]  }
0x2730   :  { %6412 = vmatpush1.msra.mxu0 %v6369_v47  ;;  %s7215_s11 = sshll.u32 %s7584_s3, 4  ;;  %s7216_s11 = int_to_ptr.vmem [resolvable:$true] %s7215_s11 }
0x2731   :  { %7416 = vmatmul.mubr.msk.f32.vlgmr.msra.gmra.mxu0 %vm112_vm0, %v6371_v48  ;;  %s7540_s10 = scalar_lea.vmem %s7216_s11, 1536  ;;  %p7545_p7 = scmp.lt.s32.totalorder %s7216_s11, %s7216_s11 }
0x2732   :  { %6613 = vmatprep.mubr.f32.mxu0 %v7576_v0  ;;  %p7541_p6 = scmp.ne.s32.totalorder %s7216_s11, %s7540_s10  ;;  %p7546_p8 = scmp.lt.s32.totalorder %s7540_s10, %s7540_s10 }
0x2734   :  { %p7547_p9 = por %p7546_p8, %p7545_p7 }
0x2736   :  { %p7548_p10 = pnand %p7547_p9, %p7541_p6 }
0x27f1   :  { %v6447_v50 = vpop.f32.mrf.mxu0 }
0x27f2   :  { %v6448_v51 = vadd.f32 %v6447_v50, %v6376_v49 }
0x27f3   :  { %v6449_v52 = vpop.f32.mrf.mxu0 }
0x27f4   :  { %v6452_v53 = vadd.f32 %v6448_v51, %v6114_v13  ;;  %v6450_v54 = vadd.f32 %v6449_v52, %v6376_v49 }
0x27f6   :  { %v6453_v55 = vadd.f32 %v6450_v54, %v6116_v16  ;;  %6454 = vrot.lane.b32.xlu0 %v6452_v53, %s7580_s23 }
0x27f8   :  { %6456 = vrot.lane.b32.xlu1 %v6453_v55, %s7580_s23  ;;  %6579 = vmatprep.subr.mxu0 %v6453_v55 }
0x27f9   :  { %6580 = vmatpush1.msra.mxu0 %v6452_v53 }
0x27fa   :  { %6462 = vrot.lane.b32.xlu0 %v6452_v53, %s7581_s26  ;;  %7421 = vmatmul.mubr.msk.f32.vlgmr.msra.gmra.mxu0 %vm112_vm0, %v7417_v56 }
0x27fb   :  { %6781 = vmatprep.mubr.f32.mxu0 %v7576_v0 }
0x27fc   :  { %6464 = vrot.lane.b32.xlu1 %v6453_v55, %s7581_s26 }
0x27fe   :  { %6700 = vperm.xlu0 %7458, %v7425_v57  }
0x2800   :  { %6711 = vperm.xlu1 %7459, %v7426_v58  }
0x2868   :  { %v6455_v59 = vpop.permute.xlu0 %6454 }
0x286a   :  { %v6457_v60 = vpop.permute.xlu1 %6456 }
0x286b   :  { %v6459_v61 = vsel %vm531_vm5, %v6457_v60, %v6455_v59  ;;  %v6458_v62 = vsel %vm531_vm5, %v6455_v59, %v6457_v60 }
0x286c   :  { %6505 = vmatprep.subr.mxu1 %v6458_v62  ;;  %v6463_v1 = vpop.permute.xlu0 %6462  ;;  %v7043_v62 = vld [vmem:[#allocation7 + $0x40] sm:$0xff] }
0x286d   :  { %7419 = vmatpush1.msk.msra.mxu1 %vm93_vm6, %v6459_v61 }
0x286e   :  { %v6465_v2 = vpop.permute.xlu1 %6464  ;;  %7420 = vmatmul.mubr.msk.f32.vlgmr.msra.gmra.mxu1 %vm112_vm0, %v7418_v63 }
0x286f   :  { %v6466_v3 = vsel %vm540_vm7, %v6463_v1, %v6465_v2  ;;  %v6467_v4 = vsel %vm540_vm7, %v6465_v2, %v6463_v1  ;;  %6688 = vmatprep.mubr.f32.mxu1 %v7576_v0 }
0x2870   :  { %7423 = vmatprep.subr.msk.mxu1 %vm100_vm8, %v6467_v4 }
0x2871   :  { %6655 = vmatpush1.msra.mxu1 %v6466_v3 }
0x2872   :  { %7424 = vmatmul.mubr.msk.f32.vlgmr.msra.gmra.mxu1 %vm112_vm0, %v7422_v5  ;;  %v7126_v5 = vld [vmem:[#allocation8 + $0x10] sm:$0xff] }
0x2873   :  { %6875 = vmatprep.mubr.f32.mxu1 %v7576_v0 }
0x2879   :  { %v6701_v16 = vpop.permute.xlu0 %6700 }
0x287b   :  { %v6712_v26 = vpop.permute.xlu1 %6711 }
0x28ba   :  { %v6615_v6 = vpop.f32.mrf.mxu0 }
0x28bc   :  { %v6617_v9 = vpop.f32.mrf.mxu0 }
0x292e   :  { %v6541_v7 = vpop.f32.mrf.mxu1 }
0x292f   :  { %v6616_v10 = vadd.f32 %v6615_v6, %v6541_v7 }
0x2930   :  { %v6543_v8 = vpop.f32.mrf.mxu1 }
0x2931   :  { %v6618_v12 = vadd.f32 %v6617_v9, %v6543_v8 }
0x2932   :  { %v6690_v11 = vpop.f32.mrf.mxu1 }
0x2933   :  { %v6695_v13 = vadd.f32 %v6690_v11, %v6616_v10 }
0x2934   :  { %v6692_v14 = vpop.f32.mrf.mxu1 }
0x2935   :  { %v6696_v18 = vadd.f32 %v6692_v14, %v6618_v12  ;;  %v6703_v19 = vadd.f32 %v6701_v16, %v6695_v13 }
0x2937   :  { %v6704_v20 = vadd.f32 %v6701_v16, %v6696_v18  ;;  %v6705_v22 = vmax.f32 %v6703_v19, 0.0 }
0x2939   :  { %v6706_v21 = vmax.f32 %v6704_v20, 0.0 }
0x293b   :  { %6747 = vmatprep.subr.mxu0 %v6706_v21 }
0x293c   :  { %6748 = vmatpush1.msra.mxu0 %v6705_v22 }
0x293d   :  { %7427 = vmatmul.mubr.msk.f32.vlgmr.msra.gmra.mxu0 %vm112_vm0, %v6707_v25 }
0x293e   :  { %6949 = vmatprep.mubr.f32.mxu0 %v7576_v0 }
0x29fd   :  { %v6783_v27 = vpop.f32.mrf.mxu0 }
0x29fe   :  { %v6784_v28 = vadd.f32 %v6783_v27, %v6712_v26 }
0x29ff   :  { %v6785_v29 = vpop.f32.mrf.mxu0 }
0x2a00   :  { %v8475_v30 = vadd.f32 %v6784_v28, %v6452_v53  ;;  %v6786_v31 = vadd.f32 %v6785_v29, %v6712_v26 }
0x2a02   :  { %v8477_v32 = vadd.f32 %v6786_v31, %v6453_v55  ;;  %6790 = vrot.lane.b32.xlu0 %v8475_v30, %s7582_s12 }
0x2a04   :  { %6792 = vrot.lane.b32.xlu1 %v8477_v32, %s7582_s12  ;;  %6915 = vmatprep.subr.mxu0 %v8477_v32 }
0x2a05   :  { %6916 = vmatpush1.msra.mxu0 %v8475_v30 }
0x2a06   :  { %6798 = vrot.lane.b32.xlu0 %v8475_v30, %s7583_s16  ;;  %7432 = vmatmul.mubr.msk.f32.vlgmr.msra.gmra.mxu0 %vm112_vm0, %v7428_v33 }
0x2a07   :  { %7117 = vmatprep.mubr.f32.mxu0 %v7576_v0 }
0x2a08   :  { %6800 = vrot.lane.b32.xlu1 %v8477_v32, %s7583_s16 }
0x2a0a   :  { %7036 = vperm.xlu0 %7458, %v7436_v34  }
0x2a0c   :  { %7047 = vperm.xlu1 %7459, %v7437_v35  }
0x2a0e   :  { %3608 = vperm.xlu0 %7458, %v7333_v36  }
0x2a10   :  { %7130 = vperm.xlu1 %7459, %v7333_v36  }
0x2a74   :  { %v6791_v37 = vpop.permute.xlu0 %6790 }
0x2a76   :  { %v6793_v38 = vpop.permute.xlu1 %6792 }
0x2a77   :  { %v6795_v39 = vsel %vm875_vm9, %v6793_v38, %v6791_v37  ;;  %v6794_v40 = vsel %vm875_vm9, %v6791_v37, %v6793_v38 }
0x2a78   :  { %6841 = vmatprep.subr.mxu1 %v6794_v40  ;;  %v6799_v42 = vpop.permute.xlu0 %6798 }
0x2a79   :  { %7430 = vmatpush1.msk.msra.mxu1 %vm95_vm10, %v6795_v39 }
0x2a7a   :  { %v6801_v43 = vpop.permute.xlu1 %6800  ;;  %7431 = vmatmul.mubr.msk.f32.vlgmr.msra.gmra.mxu1 %vm112_vm0, %v7429_v41 }
0x2a7b   :  { %v6802_v44 = vsel %vm884_vm11, %v6799_v42, %v6801_v43  ;;  %v6803_v45 = vsel %vm884_vm11, %v6801_v43, %v6799_v42  ;;  %7024 = vmatprep.mubr.f32.mxu1 %v7576_v0 }
0x2a7c   :  { %7434 = vmatprep.subr.msk.mxu1 %vm102_vm12, %v6803_v45 }
0x2a7d   :  { %6991 = vmatpush1.msra.mxu1 %v6802_v44 }
0x2a7e   :  { %7435 = vmatmul.mubr.msk.f32.vlgmr.msra.gmra.mxu1 %vm112_vm0, %v7433_v46 }
0x2a7f   :  { %7200 = vmatprep.mubr.f32.mxu1 %v7576_v0 }
0x2a85   :  { %v7037_v47 = vpop.permute.xlu0 %7036 }
0x2a89   :  { %v3609_v48 = vpop.permute.xlu0 %3608 }
0x2a8a   :  { %v3681_v49 = vadd.f32 %v8162_v23, %v3609_v48  ;;  %v3683_v15 = vadd.f32 %v8164_v24, %v3609_v48  ;;  %v7048_v24 = vpop.permute.xlu1 %7047 }
0x2a8c   :  { %3686 = vst [vmem:[#allocation10 + $0x40] sm:$0xff] %v3681_v49  ;;  %3687 = vst [vmem:[#allocation10 + $0x48] sm:$0xff] %v3683_v15 }
0x2a8e   :  { %v7131_v6 = vpop.permute.xlu1 %7130 }
0x2ac6   :  { %v6951_v50 = vpop.f32.mrf.mxu0 }
0x2ac8   :  { %v6953_v53 = vpop.f32.mrf.mxu0 }
0x2b3a   :  { %v6877_v51 = vpop.f32.mrf.mxu1 }
0x2b3b   :  { %v6952_v54 = vadd.f32 %v6951_v50, %v6877_v51 }
0x2b3c   :  { %v6879_v52 = vpop.f32.mrf.mxu1 }
0x2b3d   :  { %v6954_v55 = vadd.f32 %v6953_v53, %v6879_v52 }
0x2b3e   :  { %v7026_v17 = vpop.f32.mrf.mxu1 }
0x2b3f   :  { %v7031_v56 = vadd.f32 %v7026_v17, %v6952_v54 }
0x2b40   :  { %v7028_v57 = vpop.f32.mrf.mxu1 }
0x2b41   :  { %v7032_v58 = vadd.f32 %v7028_v57, %v6954_v55  ;;  %v7039_v59 = vadd.f32 %v7037_v47, %v7031_v56 }
0x2b43   :  { %v7040_v0 = vadd.f32 %v7037_v47, %v7032_v58  ;;  %v7041_v61 = vmax.f32 %v7039_v59, 0.0 }
0x2b45   :  { %v7042_v60 = vmax.f32 %v7040_v0, 0.0 }
0x2b47   :  { %7083 = vmatprep.subr.mxu0 %v7042_v60 }
0x2b48   :  { %7084 = vmatpush1.msra.mxu0 %v7041_v61 }
0x2b49   :  { %7438 = vmatmul.mubr.msk.f32.vlgmr.msra.gmra.mxu0 %vm112_vm0, %v7043_v62 }
0x2c09   :  { %v7119_v23 = vpop.f32.mrf.mxu0 }
0x2c0a   :  { %v7120_v63 = vadd.f32 %v7119_v23, %v7048_v24 }
0x2c0b   :  { %v7121_v1 = vpop.f32.mrf.mxu0 }
0x2c0c   :  { %v7122_v2 = vadd.f32 %v7121_v1, %v7048_v24  ;;  %v7124_v4 = vadd.f32 %v7120_v63, %v8475_v30 }
0x2c0e   :  { %v7125_v3 = vadd.f32 %v7122_v2, %v8477_v32 }
0x2c10   :  { %7166 = vmatprep.subr.mxu1 %v7125_v3 }
0x2c11   :  { %7167 = vmatpush1.msra.mxu1 %v7124_v4 }
0x2c12   :  { %7440 = vmatmul.mubr.msk.f32.vlgmr.msra.gmra.mxu1 %vm112_vm0, %v7126_v5 }
0x2cd2   :  { %v7202_v7 = vpop.f32.mrf.mxu1 }
0x2cd3   :  { %v7203_v8 = vadd.f32 %v7202_v7, %v7131_v6 }
0x2cd4   :  { %v7204_v9 = vpop.f32.mrf.mxu1 }
0x2cd5   :  { %7208 = vst [vmem:[#allocation10 + $0x50] sm:$0xff] %v7203_v8  ;;  %v7205_v10 = vadd.f32 %v7204_v9, %v7131_v6 }
0x2cd7   :  { %7209 = vst [vmem:[#allocation10 + $0x58] sm:$0xff] %v7205_v10 }
0x2cd8   :  { %7551 = shalt.err (!%p7548_p10)
}
0x2cd9   :  { %7221 = dma.vmem_to_hbm [thread:$0]  %s7216_s11, 1536, %s8546_s9, [#allocation4], %s7572_s19, %s7572_s19, %s7573_s20  }
0x2cda   :  { %7566 = dma.done.wait [#allocation4], 1536  }
0x2cdb   :  { %7567 = vsyncadd [#allocation4], 4294965760 }
0x2cdc   :  { %7225 = vsyncpa [#allocation3], 1 }
0x2cdd   :  { %7226 = vsyncpa [#allocation6], 1 }
0x2cde   :  { %7227 = vsyncpa [#allocation9], 1 }
0x2cdf   :  { %7228 = vsyncpa [#allocation4], 1 }

</bundles_post_ra>
